<compile_context>
chip_gen: v7x
topology: tpu7x:2x2x1
jax: 0.10.0
libtpu: 0.0.40
codegen_flags: <defaults>
</compile_context>

<pallas_src>
from functools import partial

import jax
import jax.numpy as jnp
from jax.experimental import pallas as pl
from jax.experimental.pallas import tpu as pltpu


# ----------------------------------------------------------------------------
# small helpers
# ----------------------------------------------------------------------------
def _round_up(x, m):
    return ((x + m - 1) // m) * m


def _pad_axis(x, axis, size):
    pad = size - x.shape[axis]
    if pad <= 0:
        return x
    widths = [(0, 0)] * x.ndim
    widths[axis] = (0, pad)
    return jnp.pad(x, widths)


def _seq_pad_mask(lens, max_len):
    # 1.0 where position >= length (i.e. padded) -- sequence_mask(...).eq(0)
    pos = jnp.arange(max_len)
    return (pos >= lens[..., None]).astype(jnp.float32)


# ----------------------------------------------------------------------------
# Fused decoder kernel: grid = (T_dec,), hidden/context carried in VMEM scratch.
# ----------------------------------------------------------------------------
def _fused_decoder_kernel(
        # step-varying inputs
        x_ref, valid_ref,
        # initial state
        h0_ref, c0_ref,
        # step-invariant memories / masks / pointer one-hots
        utt_out_ref, utt_mask_ref, cue_out_ref, cue_mask_ref,
        goal_out_ref, goal_mask_ref, kg_ref,
        oh_utt_ref, oh_cue_ref, oh_goal_ref,
        # weights (pre-split, transposed)
        w_ih_x_ref, w_ih_c_ref, w_hh_ref, b_ih_ref, b_hh_ref,
        w_pg_x_ref, w_pg_h_ref, w_pg_c_ref, b_pg_ref,
        w_o1_h_ref, w_o1_c_ref, b_o1_ref, w_o2_ref, b_o2_ref,
        # outputs
        out_ref, h_out_ref, c_out_ref,
        # scratch (carried state)
        hid_scr, ctx_scr):
    f32 = jnp.float32
    t = pl.program_id(0)
    last = pl.num_programs(0) - 1

    @pl.when(t == 0)
    def _():
        hid_scr[...] = h0_ref[...]
        ctx_scr[...] = c0_ref[...]

    x = x_ref[0]                       # (Bp, I)
    valid = valid_ref[0]               # (Bp, 1)
    h = hid_scr[...]                   # (Bp, H)
    prev_ctx = ctx_scr[...]            # (Bp, H)
    H = h.shape[-1]
    Bp = x.shape[0]
    Vp = oh_utt_ref.shape[-1]
    Ns = cue_out_ref.shape[0]

    # ---- GRU cell (PyTorch gate order r, z, n); split weights, no concat ----
    gi = (jnp.dot(x, w_ih_x_ref[...], preferred_element_type=f32)
          + jnp.dot(prev_ctx, w_ih_c_ref[...], preferred_element_type=f32)
          + b_ih_ref[...])
    gh = jnp.dot(h, w_hh_ref[...], preferred_element_type=f32) + b_hh_ref[...]
    r = jax.nn.sigmoid(gi[:, 0:H] + gh[:, 0:H])
    z = jax.nn.sigmoid(gi[:, H:2 * H] + gh[:, H:2 * H])
    n = jnp.tanh(gi[:, 2 * H:3 * H] + r * gh[:, 2 * H:3 * H])
    h_new = (1.0 - z) * n + z * h
    q3 = h_new[:, None, :]             # (Bp, 1, H)

    def masked_attend(mem, mask):
        # mem (Bp,T,H), mask (Bp,T) with 1.0 == padded
        s = jnp.einsum('bqh,bth->bqt', q3, mem, preferred_element_type=f32)
        s = s - 1e30 * mask[:, None, :]
        m = jnp.max(s, axis=-1, keepdims=True)
        e = jnp.exp(s - m)
        w = e * pl.reciprocal(jnp.sum(e, axis=-1, keepdims=True), approx=True)
        ctx = jnp.einsum('bqt,bth->bqh', w, mem, preferred_element_type=f32)
        return ctx[:, 0, :], w[:, 0, :]

    # utterance / goal attention ('dot' mode, project=False)
    utt_ctx, utt_w = masked_attend(utt_out_ref[...], utt_mask_ref[...])
    goal_ctx, goal_w = masked_attend(goal_out_ref[...], goal_mask_ref[...])

    # cue attention per knowledge sentence (static unrolled loop, no rep matrix)
    kg = kg_ref[...]                   # (Bp, Ns)
    cue_ctx = jnp.zeros((Bp, H), f32)
    ptr_cue = jnp.zeros((Bp, Vp), f32)
    for s_i in range(Ns):
        ctx_n, w_n = masked_attend(cue_out_ref[s_i], cue_mask_ref[s_i])
        kg_n = kg[:, s_i:s_i + 1]      # (Bp, 1)
        cue_ctx = cue_ctx + kg_n * ctx_n
        ptr_cue = ptr_cue + jnp.einsum(
            'bqt,btv->bqv', (kg_n * w_n)[:, None, :], oh_cue_ref[s_i],
            preferred_element_type=f32)[:, 0, :]

    # ---- high-level attention over the 3 contexts: VPU row-dot-products ----
    s_u = jnp.sum(h_new * utt_ctx, axis=-1, keepdims=True)
    s_c = jnp.sum(h_new * cue_ctx, axis=-1, keepdims=True)
    s_g = jnp.sum(h_new * goal_ctx, axis=-1, keepdims=True)
    m_hl = jnp.maximum(jnp.maximum(s_u, s_c), s_g)
    e_u = jnp.exp(s_u - m_hl)
    e_c = jnp.exp(s_c - m_hl)
    e_g = jnp.exp(s_g - m_hl)
    inv_hl = pl.reciprocal(e_u + e_c + e_g, approx=True)
    w_utt, w_cue, w_goal = e_u * inv_hl, e_c * inv_hl, e_g * inv_hl
    new_ctx = w_utt * utt_ctx + w_cue * cue_ctx + w_goal * goal_ctx

    # ---- p_gen: Linear(I+2H, 1) as a VPU multiply-reduce ----
    p_gen = jax.nn.sigmoid(
        jnp.sum(x * w_pg_x_ref[...], axis=-1, keepdims=True)
        + jnp.sum(h_new * w_pg_h_ref[...], axis=-1, keepdims=True)
        + jnp.sum(new_ctx * w_pg_c_ref[...], axis=-1, keepdims=True)
        + b_pg_ref[...])

    # ---- output head + softmax (lane-padded logits carry -1e30 bias -> 0) ----
    hmid = (jnp.dot(h_new, w_o1_h_ref[...], preferred_element_type=f32)
            + jnp.dot(new_ctx, w_o1_c_ref[...], preferred_element_type=f32)
            + b_o1_ref[...])
    logits = jnp.dot(hmid, w_o2_ref[...], preferred_element_type=f32) + b_o2_ref[...]
    lmax = jnp.max(logits, axis=-1, keepdims=True)
    le = jnp.exp(logits - lmax)
    vocab = le * pl.reciprocal(jnp.sum(le, axis=-1, keepdims=True), approx=True)

    # ---- pointer scatter_add via one-hot matmuls (indices are step-invariant) ----
    scat_u = jnp.einsum('bqt,btv->bqv', (w_utt * utt_w)[:, None, :], oh_utt_ref[...],
                        preferred_element_type=f32)[:, 0, :]
    scat_g = jnp.einsum('bqt,btv->bqv', (w_goal * goal_w)[:, None, :], oh_goal_ref[...],
                        preferred_element_type=f32)[:, 0, :]
    final = p_gen * vocab + (1.0 - p_gen) * (scat_u + w_cue * ptr_cue + scat_g)

    # ---- validity masking (mirrors the length-sorted per-step slicing) ----
    out_ref[...] = (valid * final)[None]
    hid_scr[...] = valid * h_new + (1.0 - valid) * h
    ctx_scr[...] = valid * new_ctx + (1.0 - valid) * prev_ctx

    @pl.when(t == last)
    def _():
        h_out_ref[...] = hid_scr[...]
        c_out_ref[...] = ctx_scr[...]


# ----------------------------------------------------------------------------
# JIT wrapper: builds padded, step-invariant operands and launches the kernel.
# ----------------------------------------------------------------------------
@partial(jax.jit, static_argnames=('oovs_max',))
def _decoder_forward_pallas_jit(params, token_ids, lengths,
                                src_ext, cue_ext, goal_ext, state, *, oovs_max):
    f32 = jnp.float32
    I = params['w_ih_x_t'].shape[0]
    H = params['w_hh_t'].shape[0]
    V = params['w_o2_t'].shape[1]
    B, T_dec = token_ids.shape
    Ns = cue_ext.shape[1]
    Tu = state['utt_outputs'].shape[1]
    Tc = state['cue_outputs'].shape[2]
    Tg = state['goal_outputs'].shape[1]
    Vext = V + oovs_max
    Vp = _round_up(Vext, 128)          # lane-dense output / one-hot width
    Bp = _round_up(B, 8)               # sublane-dense batch

    # ---- step-varying operands: all-step embeddings + validity (time-major) ----
    x_all = jnp.transpose(params['embedding'][token_ids], (1, 0, 2)).astype(f32)
    x_all = _pad_axis(x_all, 1, Bp)                                    # (T, Bp, I)
    valid = (jnp.arange(T_dec)[:, None] < lengths[None, :]).astype(f32)
    valid = _pad_axis(valid, 1, Bp)[..., None]                         # (T, Bp, 1)

    # ---- step-invariant operands (DMA'd into VMEM exactly once) ----
    h0 = _pad_axis(state['utt_hidden'].astype(f32), 0, Bp)
    c0 = _pad_axis(state['dec_init_context'].astype(f32), 0, Bp)
    utt_out = _pad_axis(state['utt_outputs'].astype(f32), 0, Bp)       # (Bp,Tu,H)
    goal_out = _pad_axis(state['goal_outputs'].astype(f32), 0, Bp)     # (Bp,Tg,H)
    utt_mask = _pad_axis(_seq_pad_mask(state['utt_lens'], Tu), 0, Bp)
    goal_mask = _pad_axis(_seq_pad_mask(state['goal_lens'], Tg), 0, Bp)
    # cue tensors: sentence axis leading so the kernel slices whole tiles
    cue_out = _pad_axis(jnp.transpose(state['cue_outputs'].astype(f32),
                                      (1, 0, 2, 3)), 1, Bp)            # (Ns,Bp,Tc,H)
    cue_mask = _pad_axis(jnp.transpose(_seq_pad_mask(state['cue_lens'], Tc),
                                       (1, 0, 2)), 1, Bp)              # (Ns,Bp,Tc)
    kg = _pad_axis(state['pr_attn_dist'].astype(f32), 0, Bp)           # (Bp,Ns)

    oh_utt = _pad_axis(jax.nn.one_hot(src_ext, Vp, dtype=f32), 0, Bp)  # (Bp,Tu,Vp)
    oh_goal = _pad_axis(jax.nn.one_hot(goal_ext, Vp, dtype=f32), 0, Bp)
    oh_cue = _pad_axis(jnp.transpose(jax.nn.one_hot(cue_ext, Vp, dtype=f32),
                                     (1, 0, 2, 3)), 1, Bp)             # (Ns,Bp,Tc,Vp)

    # output-head weights lane-padded; padded logits biased to -1e30 -> prob 0
    w_o2 = _pad_axis(params['w_o2_t'], 1, Vp)
    b_o2 = jnp.concatenate([params['b_o2'],
                            jnp.full((1, Vp - V), -1e30, f32)], axis=-1)

    ops = (x_all, valid, h0, c0,
           utt_out, utt_mask, cue_out, cue_mask, goal_out, goal_mask, kg,
           oh_utt, oh_cue, oh_goal,
           params['w_ih_x_t'], params['w_ih_c_t'], params['w_hh_t'],
           params['b_ih'], params['b_hh'],
           params['w_pg_x'], params['w_pg_h'], params['w_pg_c'], params['b_pg'],
           params['w_o1_h_t'], params['w_o1_c_t'], params['b_o1'], w_o2, b_o2)

    def _const(shape):
        nd = len(shape)
        return pl.BlockSpec(shape, lambda t, _nd=nd: (0,) * _nd)

    in_specs = ([pl.BlockSpec((1, Bp, I), lambda t: (t, 0, 0)),
                 pl.BlockSpec((1, Bp, 1), lambda t: (t, 0, 0))]
                + [_const(a.shape) for a in ops[2:]])
    out_specs = (pl.BlockSpec((1, Bp, Vp), lambda t: (t, 0, 0)),
                 pl.BlockSpec((Bp, H), lambda t: (0, 0)),
                 pl.BlockSpec((Bp, H), lambda t: (0, 0)))
    out_shape = (jax.ShapeDtypeStruct((T_dec, Bp, Vp), f32),
                 jax.ShapeDtypeStruct((Bp, H), f32),
                 jax.ShapeDtypeStruct((Bp, H), f32))

    flops_step = 2 * Bp * ((I + 2 * H) * 3 * H
                           + 2 * H * (Tu + Ns * Tc + Tg)
                           + 2 * H * H + H * Vp
                           + (Tu + Ns * Tc + Tg) * Vp)
    bytes_in = sum(int(a.size) * 4 for a in ops)
    cost = pl.CostEstimate(
        flops=int(T_dec * flops_step),
        transcendentals=int(T_dec * Bp * (Tu + Ns * Tc + Tg + 3 * H + Vp + 16)),
        bytes_accessed=int(bytes_in + T_dec * Bp * Vp * 4 + 2 * Bp * H * 4))

    out_all, h_fin, c_fin = pl.pallas_call(
        _fused_decoder_kernel,
        grid_spec=pltpu.PrefetchScalarGridSpec(
            num_scalar_prefetch=0,
            grid=(T_dec,),
            in_specs=in_specs,
            out_specs=out_specs,
            scratch_shapes=[pltpu.VMEM((Bp, H), f32),    # carried GRU hidden
                            pltpu.VMEM((Bp, H), f32)]),  # carried context
        out_shape=out_shape,
        compiler_params=pltpu.CompilerParams(
            dimension_semantics=("arbitrary",),
            vmem_limit_bytes=48 * 1024 * 1024),
        cost_estimate=cost,
    )(*ops)

    out = jnp.transpose(out_all[:, :B, :Vext], (1, 0, 2))   # (B, T_dec, Vext)
    return out, h_fin[:B], c_fin[:B]


def decoder_forward(params, inputs_tuple, state):
    """Mirrors Decoder.forward; the length sort + index_select is replaced by the
    equivalent per-(batch, step) validity masking (results are identical)."""
    (token_ids, lengths, src_ext_full, cue_ext_full,
     goal_ext_full, merge_oovs_str) = inputs_tuple
    oovs_max = max(len(s) for s in merge_oovs_str)
    out, h_fin, c_fin = _decoder_forward_pallas_jit(
        params, token_ids, lengths,
        src_ext_full[..., 1:-1], cue_ext_full[..., 1:-1], goal_ext_full[..., 1:-1],
        state, oovs_max=oovs_max)
    new_state = dict(state, utt_hidden=h_fin, dec_init_context=c_fin)
    return out, new_state


# ----------------------------------------------------------------------------
# Pure-JAX reference (independent of the one-hot / padding tricks): uses a real
# batched scatter-add, exact division softmaxes, unpadded shapes.
# ----------------------------------------------------------------------------
def reference_forward(params, token_ids, lengths, src_ext, cue_ext, goal_ext,
                      state, oovs_max):
    f32 = jnp.float32
    I = params['w_ih_x_t'].shape[0]
    H = params['w_hh_t'].shape[0]
    V = params['w_o2_t'].shape[1]
    B, T_dec = token_ids.shape
    Ns = cue_ext.shape[1]
    Tu = state['utt_outputs'].shape[1]
    Tc = state['cue_outputs'].shape[2]
    Tg = state['goal_outputs'].shape[1]

    utt_out, goal_out = state['utt_outputs'], state['goal_outputs']
    cue_out = state['cue_outputs']
    utt_mask = _seq_pad_mask(state['utt_lens'], Tu)
    cue_mask = _seq_pad_mask(state['cue_lens'], Tc)
    goal_mask = _seq_pad_mask(state['goal_lens'], Tg)
    kg = state['pr_attn_dist']

    ext_ids = jnp.concatenate([src_ext, cue_ext.reshape(B, -1), goal_ext], axis=-1)
    b_idx = jnp.arange(B)[:, None]

    hidden = state['utt_hidden'].astype(f32)
    ctx = state['dec_init_context'].astype(f32)
    outs = []
    for t in range(T_dec):
        x = params['embedding'][token_ids[:, t]]
        gi = x @ params['w_ih_x_t'] + ctx @ params['w_ih_c_t'] + params['b_ih']
        gh = hidden @ params['w_hh_t'] + params['b_hh']
        r = jax.nn.sigmoid(gi[:, :H] + gh[:, :H])
        z = jax.nn.sigmoid(gi[:, H:2 * H] + gh[:, H:2 * H])
        n = jnp.tanh(gi[:, 2 * H:] + r * gh[:, 2 * H:])
        h_new = (1.0 - z) * n + z * hidden

        def attend(mem, mask):
            s = jnp.einsum('bh,bth->bt', h_new, mem) - 1e30 * mask
            w = jax.nn.softmax(s, axis=-1)
            return jnp.einsum('bt,bth->bh', w, mem), w

        utt_ctx, utt_w = attend(utt_out, utt_mask)
        goal_ctx, goal_w = attend(goal_out, goal_mask)
        cue_ctx = jnp.zeros_like(h_new)
        cue_w_parts = []
        for s_i in range(Ns):
            c_n, w_n = attend(cue_out[:, s_i], cue_mask[:, s_i])
            cue_ctx = cue_ctx + kg[:, s_i:s_i + 1] * c_n
            cue_w_parts.append(kg[:, s_i:s_i + 1] * w_n)
        cue_w_flat = jnp.concatenate(cue_w_parts, axis=-1)

        s_hl = jnp.stack([jnp.sum(h_new * utt_ctx, -1),
                          jnp.sum(h_new * cue_ctx, -1),
                          jnp.sum(h_new * goal_ctx, -1)], axis=-1)
        hw = jax.nn.softmax(s_hl, axis=-1)
        new_ctx = hw[:, 0:1] * utt_ctx + hw[:, 1:2] * cue_ctx + hw[:, 2:3] * goal_ctx

        p_gen = jax.nn.sigmoid(
            jnp.sum(x * params['w_pg_x'], -1, keepdims=True)
            + jnp.sum(h_new * params['w_pg_h'], -1, keepdims=True)
            + jnp.sum(new_ctx * params['w_pg_c'], -1, keepdims=True)
            + params['b_pg'])
        hmid = h_new @ params['w_o1_h_t'] + new_ctx @ params['w_o1_c_t'] + params['b_o1']
        vocab = jax.nn.softmax(hmid @ params['w_o2_t'] + params['b_o2'], axis=-1)
        vocab_ext = jnp.concatenate([p_gen * vocab,
                                     jnp.zeros((B, oovs_max), f32)], axis=-1)
        attn_merge = (1.0 - p_gen) * jnp.concatenate(
            [hw[:, 0:1] * utt_w, hw[:, 1:2] * cue_w_flat, hw[:, 2:3] * goal_w], axis=-1)
        final = vocab_ext.at[b_idx, ext_ids].add(attn_merge)

        valid = (t < lengths).astype(f32)[:, None]
        outs.append(final * valid)
        hidden = valid * h_new + (1.0 - valid) * hidden
        ctx = valid * new_ctx + (1.0 - valid) * ctx
    return jnp.stack(outs, axis=1), hidden, ctx


# ----------------------------------------------------------------------------
# parameters
# ----------------------------------------------------------------------------
def init_decoder_params(key, input_size, hidden_size, output_size, emb_vocab):
    H, I, V = hidden_size, input_size, output_size
    ks = jax.random.split(key, 16)

    def p(k, shape, scale=0.2):
        return (scale * jax.random.normal(k, shape)).astype(jnp.float32)

    return dict(
        embedding=p(ks[0], (emb_vocab, I)),
        # GRU; weight_ih split over the concatenated [embedded_input ; prev_context]
        w_ih_x_t=p(ks[1], (I, 3 * H)), w_ih_c_t=p(ks[2], (H, 3 * H)),
        w_hh_t=p(ks[3], (H, 3 * H)),
        b_ih=p(ks[4], (1, 3 * H)), b_hh=p(ks[5], (1, 3 * H)),
        # p_gen_linear (Linear(I+2H,1)) split over [x ; dec_hidden ; context_merge]
        w_pg_x=p(ks[6], (1, I)), w_pg_h=p(ks[7], (1, H)), w_pg_c=p(ks[8], (1, H)),
        b_pg=p(ks[9], (1, 1)),
        # output head: Linear(2H,H) split over [dec_hidden ; context_merge] -> Linear(H,V)
        w_o1_h_t=p(ks[10], (H, H)), w_o1_c_t=p(ks[11], (H, H)), b_o1=p(ks[12], (1, H)),
        w_o2_t=p(ks[13], (H, V)), b_o2=p(ks[14], (1, V)),
    )


# ----------------------------------------------------------------------------
if __name__ == "__main__":
    key = jax.random.PRNGKey(0)
    B, H, I, V = 2, 32, 32, 32           # batch, hidden, input(=emb dim), output vocab
    Tu, Ns, Tc, Tg, T_dec = 8, 2, 8, 8, 6

    params = init_decoder_params(key, I, H, V, emb_vocab=V)

    ks = jax.random.split(jax.random.PRNGKey(1), 16)
    merge_oovs_str = [["oov_a", "oov_b", "oov_c"], ["oov_x"]]
    oovs_max = max(len(s) for s in merge_oovs_str)
    Vext = V + oovs_max

    token_ids = jax.random.randint(ks[0], (B, T_dec), 0, V)
    lengths = jnp.array([6, 4], dtype=jnp.int32)
    src_ext_full = jax.random.randint(ks[1], (B, Tu + 2), 0, Vext)
    cue_ext_full = jax.random.randint(ks[2], (B, Ns, Tc + 2), 0, Vext)
    goal_ext_full = jax.random.randint(ks[3], (B, Tg + 2), 0, Vext)
    inputs_tuple = (token_ids, lengths, src_ext_full, cue_ext_full,
                    goal_ext_full, merge_oovs_str)

    nrm = lambda k, s: (0.3 * jax.random.normal(k, s)).astype(jnp.float32)
    state = dict(
        utt_hidden=nrm(ks[4], (B, H)),
        dec_init_context=nrm(ks[5], (B, H)),
        utt_outputs=nrm(ks[6], (B, Tu, H)),
        utt_lens=jnp.array([8, 5], dtype=jnp.int32),
        cue_outputs=nrm(ks[7], (B, Ns, Tc, H)),
        cue_lens=jnp.array([[8, 6], [7, 8]], dtype=jnp.int32),
        goal_outputs=nrm(ks[8], (B, Tg, H)),
        goal_lens=jnp.array([7, 8], dtype=jnp.int32),
        pr_attn_dist=jax.nn.softmax(nrm(ks[9], (B, Ns)), axis=-1),
    )

    out_pallas, new_state = decoder_forward(params, inputs_tuple, state)
    jax.block_until_ready(out_pallas)

    out_ref, h_ref, c_ref = reference_forward(
        params, token_ids, lengths, src_ext_full[..., 1:-1],
        cue_ext_full[..., 1:-1], goal_ext_full[..., 1:-1], state, oovs_max)

    # final_dist rows must sum to 1 for valid (b, t) positions, 0 otherwise
    valid = (jnp.arange(T_dec)[None, :] < lengths[:, None]).astype(jnp.float32)
    row_sum_err = float(jnp.max(jnp.abs(out_pallas.sum(-1) - valid)))
    max_diff = float(jnp.max(jnp.abs(out_pallas - out_ref)))
    hid_diff = float(jnp.max(jnp.abs(new_state['utt_hidden'] - h_ref)))
    ctx_diff = float(jnp.max(jnp.abs(new_state['dec_init_context'] - c_ref)))

    assert out_pallas.shape == (B, T_dec, Vext)
    assert bool(jnp.all(jnp.isfinite(out_pallas)))
    # tolerances account only for the approx (EUP) reciprocals in the softmaxes
    assert row_sum_err < 5e-3, f"row-sum error {row_sum_err}"
    assert max_diff < 5e-3, f"kernel vs reference max diff {max_diff}"
    assert hid_diff < 5e-3 and ctx_diff < 5e-3, (hid_diff, ctx_diff)

    print("KERNEL_OK")
</pallas_src>

<mosaic_0001>
module attributes {stable_mosaic.version = 11 : i64} {
  func.func @_fused_decoder_kernel(%arg0: i32, %arg1: memref<1x8x32xf32, #tpu.memory_space<vmem>>, %arg2: memref<1x8x1xf32, #tpu.memory_space<vmem>>, %arg3: memref<8x32xf32, #tpu.memory_space<vmem>>, %arg4: memref<8x32xf32, #tpu.memory_space<vmem>>, %arg5: memref<8x8x32xf32, #tpu.memory_space<vmem>>, %arg6: memref<8x8xf32, #tpu.memory_space<vmem>>, %arg7: memref<2x8x8x32xf32, #tpu.memory_space<vmem>>, %arg8: memref<2x8x8xf32, #tpu.memory_space<vmem>>, %arg9: memref<8x8x32xf32, #tpu.memory_space<vmem>>, %arg10: memref<8x8xf32, #tpu.memory_space<vmem>>, %arg11: memref<8x2xf32, #tpu.memory_space<vmem>>, %arg12: memref<8x8x128xf32, #tpu.memory_space<vmem>>, %arg13: memref<2x8x8x128xf32, #tpu.memory_space<vmem>>, %arg14: memref<8x8x128xf32, #tpu.memory_space<vmem>>, %arg15: memref<32x96xf32, #tpu.memory_space<vmem>>, %arg16: memref<32x96xf32, #tpu.memory_space<vmem>>, %arg17: memref<32x96xf32, #tpu.memory_space<vmem>>, %arg18: memref<1x96xf32, #tpu.memory_space<vmem>>, %arg19: memref<1x96xf32, #tpu.memory_space<vmem>>, %arg20: memref<1x32xf32, #tpu.memory_space<vmem>>, %arg21: memref<1x32xf32, #tpu.memory_space<vmem>>, %arg22: memref<1x32xf32, #tpu.memory_space<vmem>>, %arg23: memref<1x1xf32, #tpu.memory_space<vmem>>, %arg24: memref<32x32xf32, #tpu.memory_space<vmem>>, %arg25: memref<32x32xf32, #tpu.memory_space<vmem>>, %arg26: memref<1x32xf32, #tpu.memory_space<vmem>>, %arg27: memref<32x128xf32, #tpu.memory_space<vmem>>, %arg28: memref<1x128xf32, #tpu.memory_space<vmem>>, %arg29: memref<1x8x128xf32, #tpu.memory_space<vmem>>, %arg30: memref<8x32xf32, #tpu.memory_space<vmem>>, %arg31: memref<8x32xf32, #tpu.memory_space<vmem>>, %arg32: memref<8x32xf32, #tpu.memory_space<vmem>>, %arg33: memref<8x32xf32, #tpu.memory_space<vmem>>) attributes {dimension_semantics = [#tpu.dimension_semantics<arbitrary>], iteration_bounds = array<i64: 6>, scalar_prefetch = 0 : i64, scratch_operands = 2 : i64, tpu.core_type = #tpu.core_type<tc>, window_params = [{transform_indices = @transform_0, window_bounds = array<i64: 1, 8, 32>}, {transform_indices = @transform_1, window_bounds = array<i64: 1, 8, 1>}, {pipeline_mode = #tpu.pipeline_mode<synchronous>, transform_indices = @transform_2, window_bounds = array<i64: 8, 32>}, {pipeline_mode = #tpu.pipeline_mode<synchronous>, transform_indices = @transform_3, window_bounds = array<i64: 8, 32>}, {pipeline_mode = #tpu.pipeline_mode<synchronous>, transform_indices = @transform_4, window_bounds = array<i64: 8, 8, 32>}, {pipeline_mode = #tpu.pipeline_mode<synchronous>, transform_indices = @transform_5, window_bounds = array<i64: 8, 8>}, {pipeline_mode = #tpu.pipeline_mode<synchronous>, transform_indices = @transform_6, window_bounds = array<i64: 2, 8, 8, 32>}, {pipeline_mode = #tpu.pipeline_mode<synchronous>, transform_indices = @transform_7, window_bounds = array<i64: 2, 8, 8>}, {pipeline_mode = #tpu.pipeline_mode<synchronous>, transform_indices = @transform_8, window_bounds = array<i64: 8, 8, 32>}, {pipeline_mode = #tpu.pipeline_mode<synchronous>, transform_indices = @transform_9, window_bounds = array<i64: 8, 8>}, {pipeline_mode = #tpu.pipeline_mode<synchronous>, transform_indices = @transform_10, window_bounds = array<i64: 8, 2>}, {pipeline_mode = #tpu.pipeline_mode<synchronous>, transform_indices = @transform_11, window_bounds = array<i64: 8, 8, 128>}, {pipeline_mode = #tpu.pipeline_mode<synchronous>, transform_indices = @transform_12, window_bounds = array<i64: 2, 8, 8, 128>}, {pipeline_mode = #tpu.pipeline_mode<synchronous>, transform_indices = @transform_13, window_bounds = array<i64: 8, 8, 128>}, {pipeline_mode = #tpu.pipeline_mode<synchronous>, transform_indices = @transform_14, window_bounds = array<i64: 32, 96>}, {pipeline_mode = #tpu.pipeline_mode<synchronous>, transform_indices = @transform_15, window_bounds = array<i64: 32, 96>}, {pipeline_mode = #tpu.pipeline_mode<synchronous>, transform_indices = @transform_16, window_bounds = array<i64: 32, 96>}, {pipeline_mode = #tpu.pipeline_mode<synchronous>, transform_indices = @transform_17, window_bounds = array<i64: 1, 96>}, {pipeline_mode = #tpu.pipeline_mode<synchronous>, transform_indices = @transform_18, window_bounds = array<i64: 1, 96>}, {pipeline_mode = #tpu.pipeline_mode<synchronous>, transform_indices = @transform_19, window_bounds = array<i64: 1, 32>}, {pipeline_mode = #tpu.pipeline_mode<synchronous>, transform_indices = @transform_20, window_bounds = array<i64: 1, 32>}, {pipeline_mode = #tpu.pipeline_mode<synchronous>, transform_indices = @transform_21, window_bounds = array<i64: 1, 32>}, {pipeline_mode = #tpu.pipeline_mode<synchronous>, transform_indices = @transform_22, window_bounds = array<i64: 1, 1>}, {pipeline_mode = #tpu.pipeline_mode<synchronous>, transform_indices = @transform_23, window_bounds = array<i64: 32, 32>}, {pipeline_mode = #tpu.pipeline_mode<synchronous>, transform_indices = @transform_24, window_bounds = array<i64: 32, 32>}, {pipeline_mode = #tpu.pipeline_mode<synchronous>, transform_indices = @transform_25, window_bounds = array<i64: 1, 32>}, {pipeline_mode = #tpu.pipeline_mode<synchronous>, transform_indices = @transform_26, window_bounds = array<i64: 32, 128>}, {pipeline_mode = #tpu.pipeline_mode<synchronous>, transform_indices = @transform_27, window_bounds = array<i64: 1, 128>}, {transform_indices = @transform_28, window_bounds = array<i64: 1, 8, 128>}, {pipeline_mode = #tpu.pipeline_mode<synchronous>, transform_indices = @transform_29, window_bounds = array<i64: 8, 32>}, {pipeline_mode = #tpu.pipeline_mode<synchronous>, transform_indices = @transform_30, window_bounds = array<i64: 8, 32>}]} {
    %c0_i32 = arith.constant 0 : i32
    %0 = arith.cmpi eq, %arg0, %c0_i32 : i32
    %1 = arith.extui %0 : i1 to i32
    %c0_i32_0 = arith.constant 0 : i32
    %2 = arith.cmpi ne, %1, %c0_i32_0 : i32
    scf.if %2 {
      %c0_131 = arith.constant 0 : index
      %c0_132 = arith.constant 0 : index
      %285 = vector.load %arg3[%c0_131, %c0_132] : memref<8x32xf32, #tpu.memory_space<vmem>>, vector<8x32xf32>
      %c0_133 = arith.constant 0 : index
      %c0_134 = arith.constant 0 : index
      %286 = vector.load %arg32[%c0_133, %c0_134] : memref<8x32xf32, #tpu.memory_space<vmem>>, vector<8x32xf32>
      tpu.vector_store %arg32[%c0_133, %c0_134], %285 {strides = array<i32>} : memref<8x32xf32, #tpu.memory_space<vmem>>, vector<8x32xf32>,
      %c0_135 = arith.constant 0 : index
      %c0_136 = arith.constant 0 : index
      %287 = vector.load %arg4[%c0_135, %c0_136] : memref<8x32xf32, #tpu.memory_space<vmem>>, vector<8x32xf32>
      %c0_137 = arith.constant 0 : index
      %c0_138 = arith.constant 0 : index
      %288 = vector.load %arg33[%c0_137, %c0_138] : memref<8x32xf32, #tpu.memory_space<vmem>>, vector<8x32xf32>
      tpu.vector_store %arg33[%c0_137, %c0_138], %287 {strides = array<i32>} : memref<8x32xf32, #tpu.memory_space<vmem>>, vector<8x32xf32>,
    } else {
    }
    %c0 = arith.constant 0 : index
    %c0_1 = arith.constant 0 : index
    %c0_2 = arith.constant 0 : index
    %3 = vector.load %arg1[%c0, %c0_1, %c0_2] : memref<1x8x32xf32, #tpu.memory_space<vmem>>, vector<1x8x32xf32>
    %4 = vector.shape_cast %3 : vector<1x8x32xf32> to vector<8x32xf32>
    %c0_3 = arith.constant 0 : index
    %c0_4 = arith.constant 0 : index
    %c0_5 = arith.constant 0 : index
    %5 = vector.load %arg2[%c0_3, %c0_4, %c0_5] : memref<1x8x1xf32, #tpu.memory_space<vmem>>, vector<1x8x1xf32>
    %6 = vector.shape_cast %5 : vector<1x8x1xf32> to vector<8x1xf32>
    %c0_6 = arith.constant 0 : index
    %c0_7 = arith.constant 0 : index
    %7 = vector.load %arg32[%c0_6, %c0_7] : memref<8x32xf32, #tpu.memory_space<vmem>>, vector<8x32xf32>
    %c0_8 = arith.constant 0 : index
    %c0_9 = arith.constant 0 : index
    %8 = vector.load %arg33[%c0_8, %c0_9] : memref<8x32xf32, #tpu.memory_space<vmem>>, vector<8x32xf32>
    %c0_10 = arith.constant 0 : index
    %c0_11 = arith.constant 0 : index
    %9 = vector.load %arg15[%c0_10, %c0_11] : memref<32x96xf32, #tpu.memory_space<vmem>>, vector<32x96xf32>
    %cst = arith.constant dense<0.000000e+00> : vector<8x96xf32>
    %10 = tpu.matmul %4, %9, %cst {dimension_numbers = #tpu.dot_dimension_numbers<[1], [0], [0], [1], [0, 0, 1, 1], [], []>} : vector<8x32xf32>, vector<32x96xf32>, vector<8x96xf32> -> vector<8x96xf32>
    %c0_12 = arith.constant 0 : index
    %c0_13 = arith.constant 0 : index
    %11 = vector.load %arg16[%c0_12, %c0_13] : memref<32x96xf32, #tpu.memory_space<vmem>>, vector<32x96xf32>
    %cst_14 = arith.constant dense<0.000000e+00> : vector<8x96xf32>
    %12 = tpu.matmul %8, %11, %cst_14 {dimension_numbers = #tpu.dot_dimension_numbers<[1], [0], [0], [1], [0, 0, 1, 1], [], []>} : vector<8x32xf32>, vector<32x96xf32>, vector<8x96xf32> -> vector<8x96xf32>
    %13 = arith.addf %10, %12 : vector<8x96xf32>
    %c0_15 = arith.constant 0 : index
    %c0_16 = arith.constant 0 : index
    %14 = vector.load %arg18[%c0_15, %c0_16] : memref<1x96xf32, #tpu.memory_space<vmem>>, vector<1x96xf32>
    %15 = vector.broadcast %14 : vector<1x96xf32> to vector<8x96xf32>
    %16 = arith.addf %13, %15 : vector<8x96xf32>
    %c0_17 = arith.constant 0 : index
    %c0_18 = arith.constant 0 : index
    %17 = vector.load %arg17[%c0_17, %c0_18] : memref<32x96xf32, #tpu.memory_space<vmem>>, vector<32x96xf32>
    %cst_19 = arith.constant dense<0.000000e+00> : vector<8x96xf32>
    %18 = tpu.matmul %7, %17, %cst_19 {dimension_numbers = #tpu.dot_dimension_numbers<[1], [0], [0], [1], [0, 0, 1, 1], [], []>} : vector<8x32xf32>, vector<32x96xf32>, vector<8x96xf32> -> vector<8x96xf32>
    %c0_20 = arith.constant 0 : index
    %c0_21 = arith.constant 0 : index
    %19 = vector.load %arg19[%c0_20, %c0_21] : memref<1x96xf32, #tpu.memory_space<vmem>>, vector<1x96xf32>
    %20 = vector.broadcast %19 : vector<1x96xf32> to vector<8x96xf32>
    %21 = arith.addf %18, %20 : vector<8x96xf32>
    %22 = vector.extract_strided_slice %16 {offsets = [0, 0], sizes = [8, 32], strides = [1, 1]} : vector<8x96xf32> to vector<8x32xf32>
    %23 = vector.extract_strided_slice %21 {offsets = [0, 0], sizes = [8, 32], strides = [1, 1]} : vector<8x96xf32> to vector<8x32xf32>
    %24 = arith.addf %22, %23 : vector<8x32xf32>
    %25 = arith.negf %24 : vector<8x32xf32>
    %26 = math.exp %25 : vector<8x32xf32>
    %cst_22 = arith.constant 1.000000e+00 : f32
    %27 = vector.broadcast %cst_22 : f32 to vector<8x32xf32>
    %28 = arith.addf %27, %26 : vector<8x32xf32>
    %29 = arith.divf %27, %28 : vector<8x32xf32>
    %30 = vector.extract_strided_slice %16 {offsets = [0, 32], sizes = [8, 32], strides = [1, 1]} : vector<8x96xf32> to vector<8x32xf32>
    %31 = vector.extract_strided_slice %21 {offsets = [0, 32], sizes = [8, 32], strides = [1, 1]} : vector<8x96xf32> to vector<8x32xf32>
    %32 = arith.addf %30, %31 : vector<8x32xf32>
    %33 = arith.negf %32 : vector<8x32xf32>
    %34 = math.exp %33 : vector<8x32xf32>
    %cst_23 = arith.constant 1.000000e+00 : f32
    %35 = vector.broadcast %cst_23 : f32 to vector<8x32xf32>
    %36 = arith.addf %35, %34 : vector<8x32xf32>
    %37 = arith.divf %35, %36 : vector<8x32xf32>
    %38 = vector.extract_strided_slice %16 {offsets = [0, 64], sizes = [8, 32], strides = [1, 1]} : vector<8x96xf32> to vector<8x32xf32>
    %39 = vector.extract_strided_slice %21 {offsets = [0, 64], sizes = [8, 32], strides = [1, 1]} : vector<8x96xf32> to vector<8x32xf32>
    %40 = arith.mulf %29, %39 : vector<8x32xf32>
    %41 = arith.addf %38, %40 : vector<8x32xf32>
    %42 = math.tanh %41 : vector<8x32xf32>
    %cst_24 = arith.constant 1.000000e+00 : f32
    %43 = vector.broadcast %cst_24 : f32 to vector<8x32xf32>
    %44 = arith.subf %43, %37 : vector<8x32xf32>
    %45 = arith.mulf %44, %42 : vector<8x32xf32>
    %46 = arith.mulf %37, %7 : vector<8x32xf32>
    %47 = arith.addf %45, %46 : vector<8x32xf32>
    %48 = vector.shape_cast %47 : vector<8x32xf32> to vector<8x1x32xf32>
    %c0_25 = arith.constant 0 : index
    %c0_26 = arith.constant 0 : index
    %c0_27 = arith.constant 0 : index
    %49 = vector.load %arg5[%c0_25, %c0_26, %c0_27] : memref<8x8x32xf32, #tpu.memory_space<vmem>>, vector<8x8x32xf32>
    %c0_28 = arith.constant 0 : index
    %c0_29 = arith.constant 0 : index
    %50 = vector.load %arg6[%c0_28, %c0_29] : memref<8x8xf32, #tpu.memory_space<vmem>>, vector<8x8xf32>
    "tpu.trace_start"() <{level = 10 : i32, message = "bqh,bth->bqt"}> : () -> ()
    %cst_30 = arith.constant dense<0.000000e+00> : vector<8x1x8xf32>
    %51 = tpu.matmul %48, %49, %cst_30 {dimension_numbers = #tpu.dot_dimension_numbers<[2], [2], [1], [1], [0, 0, 0, 1, 1, 1], [0], [0]>} : vector<8x1x32xf32>, vector<8x8x32xf32>, vector<8x1x8xf32> -> vector<8x1x8xf32>
    "tpu.trace_stop"() : () -> ()
    %52 = vector.shape_cast %50 : vector<8x8xf32> to vector<8x1x8xf32>
    %cst_31 = arith.constant 1.000000e+30 : f32
    %53 = vector.broadcast %cst_31 : f32 to vector<8x1x8xf32>
    %54 = arith.mulf %53, %52 : vector<8x1x8xf32>
    %55 = arith.subf %51, %54 : vector<8x1x8xf32>
    %cst_32 = arith.constant dense<0xFF800000> : vector<8x1xf32>
    %56 = vector.multi_reduction <maximumf>, %55, %cst_32 [2] : vector<8x1x8xf32> to vector<8x1xf32>
    %57 = vector.shape_cast %56 : vector<8x1xf32> to vector<8x1x1xf32>
    %58 = vector.broadcast %57 : vector<8x1x1xf32> to vector<8x1x8xf32>
    %59 = arith.subf %55, %58 : vector<8x1x8xf32>
    %60 = math.exp %59 : vector<8x1x8xf32>
    %cst_33 = arith.constant dense<0.000000e+00> : vector<8x1xf32>
    %61 = vector.multi_reduction <add>, %60, %cst_33 [2] : vector<8x1x8xf32> to vector<8x1xf32>
    %62 = vector.shape_cast %61 : vector<8x1xf32> to vector<8x1x1xf32>
    %63 = tpu.reciprocal %62 {approx = true} : vector<8x1x1xf32> -> vector<8x1x1xf32>
    %64 = vector.broadcast %63 : vector<8x1x1xf32> to vector<8x1x8xf32>
    %65 = arith.mulf %60, %64 : vector<8x1x8xf32>
    "tpu.trace_start"() <{level = 10 : i32, message = "bqt,bth->bqh"}> : () -> ()
    %cst_34 = arith.constant dense<0.000000e+00> : vector<8x1x32xf32>
    %66 = tpu.matmul %65, %49, %cst_34 {dimension_numbers = #tpu.dot_dimension_numbers<[2], [1], [1], [2], [0, 0, 0, 1, 1, 2], [0], [0]>} : vector<8x1x8xf32>, vector<8x8x32xf32>, vector<8x1x32xf32> -> vector<8x1x32xf32>
    "tpu.trace_stop"() : () -> ()
    %67 = vector.shape_cast %66 : vector<8x1x32xf32> to vector<8x32xf32>
    %68 = vector.shape_cast %65 : vector<8x1x8xf32> to vector<8x8xf32>
    %c0_35 = arith.constant 0 : index
    %c0_36 = arith.constant 0 : index
    %c0_37 = arith.constant 0 : index
    %69 = vector.load %arg9[%c0_35, %c0_36, %c0_37] : memref<8x8x32xf32, #tpu.memory_space<vmem>>, vector<8x8x32xf32>
    %c0_38 = arith.constant 0 : index
    %c0_39 = arith.constant 0 : index
    %70 = vector.load %arg10[%c0_38, %c0_39] : memref<8x8xf32, #tpu.memory_space<vmem>>, vector<8x8xf32>
    "tpu.trace_start"() <{level = 10 : i32, message = "bqh,bth->bqt"}> : () -> ()
    %cst_40 = arith.constant dense<0.000000e+00> : vector<8x1x8xf32>
    %71 = tpu.matmul %48, %69, %cst_40 {dimension_numbers = #tpu.dot_dimension_numbers<[2], [2], [1], [1], [0, 0, 0, 1, 1, 1], [0], [0]>} : vector<8x1x32xf32>, vector<8x8x32xf32>, vector<8x1x8xf32> -> vector<8x1x8xf32>
    "tpu.trace_stop"() : () -> ()
    %72 = vector.shape_cast %70 : vector<8x8xf32> to vector<8x1x8xf32>
    %cst_41 = arith.constant 1.000000e+30 : f32
    %73 = vector.broadcast %cst_41 : f32 to vector<8x1x8xf32>
    %74 = arith.mulf %73, %72 : vector<8x1x8xf32>
    %75 = arith.subf %71, %74 : vector<8x1x8xf32>
    %cst_42 = arith.constant dense<0xFF800000> : vector<8x1xf32>
    %76 = vector.multi_reduction <maximumf>, %75, %cst_42 [2] : vector<8x1x8xf32> to vector<8x1xf32>
    %77 = vector.shape_cast %76 : vector<8x1xf32> to vector<8x1x1xf32>
    %78 = vector.broadcast %77 : vector<8x1x1xf32> to vector<8x1x8xf32>
    %79 = arith.subf %75, %78 : vector<8x1x8xf32>
    %80 = math.exp %79 : vector<8x1x8xf32>
    %cst_43 = arith.constant dense<0.000000e+00> : vector<8x1xf32>
    %81 = vector.multi_reduction <add>, %80, %cst_43 [2] : vector<8x1x8xf32> to vector<8x1xf32>
    %82 = vector.shape_cast %81 : vector<8x1xf32> to vector<8x1x1xf32>
    %83 = tpu.reciprocal %82 {approx = true} : vector<8x1x1xf32> -> vector<8x1x1xf32>
    %84 = vector.broadcast %83 : vector<8x1x1xf32> to vector<8x1x8xf32>
    %85 = arith.mulf %80, %84 : vector<8x1x8xf32>
    "tpu.trace_start"() <{level = 10 : i32, message = "bqt,bth->bqh"}> : () -> ()
    %cst_44 = arith.constant dense<0.000000e+00> : vector<8x1x32xf32>
    %86 = tpu.matmul %85, %69, %cst_44 {dimension_numbers = #tpu.dot_dimension_numbers<[2], [1], [1], [2], [0, 0, 0, 1, 1, 2], [0], [0]>} : vector<8x1x8xf32>, vector<8x8x32xf32>, vector<8x1x32xf32> -> vector<8x1x32xf32>
    "tpu.trace_stop"() : () -> ()
    %87 = vector.shape_cast %86 : vector<8x1x32xf32> to vector<8x32xf32>
    %88 = vector.shape_cast %85 : vector<8x1x8xf32> to vector<8x8xf32>
    %c0_45 = arith.constant 0 : index
    %c0_46 = arith.constant 0 : index
    %89 = vector.load %arg11[%c0_45, %c0_46] : memref<8x2xf32, #tpu.memory_space<vmem>>, vector<8x2xf32>
    %cst_47 = arith.constant 0.000000e+00 : f32
    %90 = vector.broadcast %cst_47 : f32 to vector<8x32xf32>
    %cst_48 = arith.constant 0.000000e+00 : f32
    %91 = vector.broadcast %cst_48 : f32 to vector<8x128xf32>
    %c0_49 = arith.constant 0 : index
    %c0_50 = arith.constant 0 : index
    %c0_51 = arith.constant 0 : index
    %c0_52 = arith.constant 0 : index
    %92 = vector.load %arg7[%c0_49, %c0_50, %c0_51, %c0_52] : memref<2x8x8x32xf32, #tpu.memory_space<vmem>>, vector<1x8x8x32xf32>
    %93 = vector.shape_cast %92 : vector<1x8x8x32xf32> to vector<8x8x32xf32>
    %c0_53 = arith.constant 0 : index
    %c0_54 = arith.constant 0 : index
    %c0_55 = arith.constant 0 : index
    %94 = vector.load %arg8[%c0_53, %c0_54, %c0_55] : memref<2x8x8xf32, #tpu.memory_space<vmem>>, vector<1x8x8xf32>
    %95 = vector.shape_cast %94 : vector<1x8x8xf32> to vector<8x8xf32>
    "tpu.trace_start"() <{level = 10 : i32, message = "bqh,bth->bqt"}> : () -> ()
    %cst_56 = arith.constant dense<0.000000e+00> : vector<8x1x8xf32>
    %96 = tpu.matmul %48, %93, %cst_56 {dimension_numbers = #tpu.dot_dimension_numbers<[2], [2], [1], [1], [0, 0, 0, 1, 1, 1], [0], [0]>} : vector<8x1x32xf32>, vector<8x8x32xf32>, vector<8x1x8xf32> -> vector<8x1x8xf32>
    "tpu.trace_stop"() : () -> ()
    %97 = vector.shape_cast %95 : vector<8x8xf32> to vector<8x1x8xf32>
    %cst_57 = arith.constant 1.000000e+30 : f32
    %98 = vector.broadcast %cst_57 : f32 to vector<8x1x8xf32>
    %99 = arith.mulf %98, %97 : vector<8x1x8xf32>
    %100 = arith.subf %96, %99 : vector<8x1x8xf32>
    %cst_58 = arith.constant dense<0xFF800000> : vector<8x1xf32>
    %101 = vector.multi_reduction <maximumf>, %100, %cst_58 [2] : vector<8x1x8xf32> to vector<8x1xf32>
    %102 = vector.shape_cast %101 : vector<8x1xf32> to vector<8x1x1xf32>
    %103 = vector.broadcast %102 : vector<8x1x1xf32> to vector<8x1x8xf32>
    %104 = arith.subf %100, %103 : vector<8x1x8xf32>
    %105 = math.exp %104 : vector<8x1x8xf32>
    %cst_59 = arith.constant dense<0.000000e+00> : vector<8x1xf32>
    %106 = vector.multi_reduction <add>, %105, %cst_59 [2] : vector<8x1x8xf32> to vector<8x1xf32>
    %107 = vector.shape_cast %106 : vector<8x1xf32> to vector<8x1x1xf32>
    %108 = tpu.reciprocal %107 {approx = true} : vector<8x1x1xf32> -> vector<8x1x1xf32>
    %109 = vector.broadcast %108 : vector<8x1x1xf32> to vector<8x1x8xf32>
    %110 = arith.mulf %105, %109 : vector<8x1x8xf32>
    "tpu.trace_start"() <{level = 10 : i32, message = "bqt,bth->bqh"}> : () -> ()
    %cst_60 = arith.constant dense<0.000000e+00> : vector<8x1x32xf32>
    %111 = tpu.matmul %110, %93, %cst_60 {dimension_numbers = #tpu.dot_dimension_numbers<[2], [1], [1], [2], [0, 0, 0, 1, 1, 2], [0], [0]>} : vector<8x1x8xf32>, vector<8x8x32xf32>, vector<8x1x32xf32> -> vector<8x1x32xf32>
    "tpu.trace_stop"() : () -> ()
    %112 = vector.shape_cast %111 : vector<8x1x32xf32> to vector<8x32xf32>
    %113 = vector.shape_cast %110 : vector<8x1x8xf32> to vector<8x8xf32>
    %114 = vector.extract_strided_slice %89 {offsets = [0, 0], sizes = [8, 1], strides = [1, 1]} : vector<8x2xf32> to vector<8x1xf32>
    %115 = vector.broadcast %114 : vector<8x1xf32> to vector<8x32xf32>
    %116 = arith.mulf %115, %112 : vector<8x32xf32>
    %117 = arith.addf %90, %116 : vector<8x32xf32>
    %118 = vector.broadcast %114 : vector<8x1xf32> to vector<8x8xf32>
    %119 = arith.mulf %118, %113 : vector<8x8xf32>
    %120 = vector.shape_cast %119 : vector<8x8xf32> to vector<8x1x8xf32>
    %c0_61 = arith.constant 0 : index
    %c0_62 = arith.constant 0 : index
    %c0_63 = arith.constant 0 : index
    %c0_64 = arith.constant 0 : index
    %121 = vector.load %arg13[%c0_61, %c0_62, %c0_63, %c0_64] : memref<2x8x8x128xf32, #tpu.memory_space<vmem>>, vector<1x8x8x128xf32>
    %122 = vector.shape_cast %121 : vector<1x8x8x128xf32> to vector<8x8x128xf32>
    "tpu.trace_start"() <{level = 10 : i32, message = "bqt,btv->bqv"}> : () -> ()
    %cst_65 = arith.constant dense<0.000000e+00> : vector<8x1x128xf32>
    %123 = tpu.matmul %120, %122, %cst_65 {dimension_numbers = #tpu.dot_dimension_numbers<[2], [1], [1], [2], [0, 0, 0, 1, 1, 2], [0], [0]>} : vector<8x1x8xf32>, vector<8x8x128xf32>, vector<8x1x128xf32> -> vector<8x1x128xf32>
    "tpu.trace_stop"() : () -> ()
    %124 = vector.shape_cast %123 : vector<8x1x128xf32> to vector<8x128xf32>
    %125 = arith.addf %91, %124 : vector<8x128xf32>
    %c1 = arith.constant 1 : index
    %c0_66 = arith.constant 0 : index
    %c0_67 = arith.constant 0 : index
    %c0_68 = arith.constant 0 : index
    %126 = vector.load %arg7[%c1, %c0_66, %c0_67, %c0_68] : memref<2x8x8x32xf32, #tpu.memory_space<vmem>>, vector<1x8x8x32xf32>
    %127 = vector.shape_cast %126 : vector<1x8x8x32xf32> to vector<8x8x32xf32>
    %c1_69 = arith.constant 1 : index
    %c0_70 = arith.constant 0 : index
    %c0_71 = arith.constant 0 : index
    %128 = vector.load %arg8[%c1_69, %c0_70, %c0_71] : memref<2x8x8xf32, #tpu.memory_space<vmem>>, vector<1x8x8xf32>
    %129 = vector.shape_cast %128 : vector<1x8x8xf32> to vector<8x8xf32>
    "tpu.trace_start"() <{level = 10 : i32, message = "bqh,bth->bqt"}> : () -> ()
    %cst_72 = arith.constant dense<0.000000e+00> : vector<8x1x8xf32>
    %130 = tpu.matmul %48, %127, %cst_72 {dimension_numbers = #tpu.dot_dimension_numbers<[2], [2], [1], [1], [0, 0, 0, 1, 1, 1], [0], [0]>} : vector<8x1x32xf32>, vector<8x8x32xf32>, vector<8x1x8xf32> -> vector<8x1x8xf32>
    "tpu.trace_stop"() : () -> ()
    %131 = vector.shape_cast %129 : vector<8x8xf32> to vector<8x1x8xf32>
    %cst_73 = arith.constant 1.000000e+30 : f32
    %132 = vector.broadcast %cst_73 : f32 to vector<8x1x8xf32>
    %133 = arith.mulf %132, %131 : vector<8x1x8xf32>
    %134 = arith.subf %130, %133 : vector<8x1x8xf32>
    %cst_74 = arith.constant dense<0xFF800000> : vector<8x1xf32>
    %135 = vector.multi_reduction <maximumf>, %134, %cst_74 [2] : vector<8x1x8xf32> to vector<8x1xf32>
    %136 = vector.shape_cast %135 : vector<8x1xf32> to vector<8x1x1xf32>
    %137 = vector.broadcast %136 : vector<8x1x1xf32> to vector<8x1x8xf32>
    %138 = arith.subf %134, %137 : vector<8x1x8xf32>
    %139 = math.exp %138 : vector<8x1x8xf32>
    %cst_75 = arith.constant dense<0.000000e+00> : vector<8x1xf32>
    %140 = vector.multi_reduction <add>, %139, %cst_75 [2] : vector<8x1x8xf32> to vector<8x1xf32>
    %141 = vector.shape_cast %140 : vector<8x1xf32> to vector<8x1x1xf32>
    %142 = tpu.reciprocal %141 {approx = true} : vector<8x1x1xf32> -> vector<8x1x1xf32>
    %143 = vector.broadcast %142 : vector<8x1x1xf32> to vector<8x1x8xf32>
    %144 = arith.mulf %139, %143 : vector<8x1x8xf32>
    "tpu.trace_start"() <{level = 10 : i32, message = "bqt,bth->bqh"}> : () -> ()
    %cst_76 = arith.constant dense<0.000000e+00> : vector<8x1x32xf32>
    %145 = tpu.matmul %144, %127, %cst_76 {dimension_numbers = #tpu.dot_dimension_numbers<[2], [1], [1], [2], [0, 0, 0, 1, 1, 2], [0], [0]>} : vector<8x1x8xf32>, vector<8x8x32xf32>, vector<8x1x32xf32> -> vector<8x1x32xf32>
    "tpu.trace_stop"() : () -> ()
    %146 = vector.shape_cast %145 : vector<8x1x32xf32> to vector<8x32xf32>
    %147 = vector.shape_cast %144 : vector<8x1x8xf32> to vector<8x8xf32>
    %148 = vector.extract_strided_slice %89 {offsets = [0, 1], sizes = [8, 1], strides = [1, 1]} : vector<8x2xf32> to vector<8x1xf32>
    %149 = vector.broadcast %148 : vector<8x1xf32> to vector<8x32xf32>
    %150 = arith.mulf %149, %146 : vector<8x32xf32>
    %151 = arith.addf %117, %150 : vector<8x32xf32>
    %152 = vector.broadcast %148 : vector<8x1xf32> to vector<8x8xf32>
    %153 = arith.mulf %152, %147 : vector<8x8xf32>
    %154 = vector.shape_cast %153 : vector<8x8xf32> to vector<8x1x8xf32>
    %c1_77 = arith.constant 1 : index
    %c0_78 = arith.constant 0 : index
    %c0_79 = arith.constant 0 : index
    %c0_80 = arith.constant 0 : index
    %155 = vector.load %arg13[%c1_77, %c0_78, %c0_79, %c0_80] : memref<2x8x8x128xf32, #tpu.memory_space<vmem>>, vector<1x8x8x128xf32>
    %156 = vector.shape_cast %155 : vector<1x8x8x128xf32> to vector<8x8x128xf32>
    "tpu.trace_start"() <{level = 10 : i32, message = "bqt,btv->bqv"}> : () -> ()
    %cst_81 = arith.constant dense<0.000000e+00> : vector<8x1x128xf32>
    %157 = tpu.matmul %154, %156, %cst_81 {dimension_numbers = #tpu.dot_dimension_numbers<[2], [1], [1], [2], [0, 0, 0, 1, 1, 2], [0], [0]>} : vector<8x1x8xf32>, vector<8x8x128xf32>, vector<8x1x128xf32> -> vector<8x1x128xf32>
    "tpu.trace_stop"() : () -> ()
    %158 = vector.shape_cast %157 : vector<8x1x128xf32> to vector<8x128xf32>
    %159 = arith.addf %125, %158 : vector<8x128xf32>
    %160 = arith.mulf %47, %67 : vector<8x32xf32>
    %cst_82 = arith.constant dense<0.000000e+00> : vector<8xf32>
    %161 = vector.multi_reduction <add>, %160, %cst_82 [1] : vector<8x32xf32> to vector<8xf32>
    %162 = vector.shape_cast %161 : vector<8xf32> to vector<8x1xf32>
    %163 = arith.mulf %47, %151 : vector<8x32xf32>
    %cst_83 = arith.constant dense<0.000000e+00> : vector<8xf32>
    %164 = vector.multi_reduction <add>, %163, %cst_83 [1] : vector<8x32xf32> to vector<8xf32>
    %165 = vector.shape_cast %164 : vector<8xf32> to vector<8x1xf32>
    %166 = arith.mulf %47, %87 : vector<8x32xf32>
    %cst_84 = arith.constant dense<0.000000e+00> : vector<8xf32>
    %167 = vector.multi_reduction <add>, %166, %cst_84 [1] : vector<8x32xf32> to vector<8xf32>
    %168 = vector.shape_cast %167 : vector<8xf32> to vector<8x1xf32>
    %169 = arith.maximumf %162, %165 : vector<8x1xf32>
    %170 = arith.maximumf %169, %168 : vector<8x1xf32>
    %171 = arith.subf %162, %170 : vector<8x1xf32>
    %172 = math.exp %171 : vector<8x1xf32>
    %173 = arith.subf %165, %170 : vector<8x1xf32>
    %174 = math.exp %173 : vector<8x1xf32>
    %175 = arith.subf %168, %170 : vector<8x1xf32>
    %176 = math.exp %175 : vector<8x1xf32>
    %177 = arith.addf %172, %174 : vector<8x1xf32>
    %178 = arith.addf %177, %176 : vector<8x1xf32>
    %179 = tpu.reciprocal %178 {approx = true} : vector<8x1xf32> -> vector<8x1xf32>
    %180 = arith.mulf %172, %179 : vector<8x1xf32>
    %181 = arith.mulf %174, %179 : vector<8x1xf32>
    %182 = arith.mulf %176, %179 : vector<8x1xf32>
    %183 = vector.broadcast %180 : vector<8x1xf32> to vector<8x32xf32>
    %184 = arith.mulf %183, %67 : vector<8x32xf32>
    %185 = vector.broadcast %181 : vector<8x1xf32> to vector<8x32xf32>
    %186 = arith.mulf %185, %151 : vector<8x32xf32>
    %187 = arith.addf %184, %186 : vector<8x32xf32>
    %188 = vector.broadcast %182 : vector<8x1xf32> to vector<8x32xf32>
    %189 = arith.mulf %188, %87 : vector<8x32xf32>
    %190 = arith.addf %187, %189 : vector<8x32xf32>
    %c0_85 = arith.constant 0 : index
    %c0_86 = arith.constant 0 : index
    %191 = vector.load %arg20[%c0_85, %c0_86] : memref<1x32xf32, #tpu.memory_space<vmem>>, vector<1x32xf32>
    %192 = vector.broadcast %191 : vector<1x32xf32> to vector<8x32xf32>
    %193 = arith.mulf %4, %192 : vector<8x32xf32>
    %cst_87 = arith.constant dense<0.000000e+00> : vector<8xf32>
    %194 = vector.multi_reduction <add>, %193, %cst_87 [1] : vector<8x32xf32> to vector<8xf32>
    %195 = vector.shape_cast %194 : vector<8xf32> to vector<8x1xf32>
    %c0_88 = arith.constant 0 : index
    %c0_89 = arith.constant 0 : index
    %196 = vector.load %arg21[%c0_88, %c0_89] : memref<1x32xf32, #tpu.memory_space<vmem>>, vector<1x32xf32>
    %197 = vector.broadcast %196 : vector<1x32xf32> to vector<8x32xf32>
    %198 = arith.mulf %47, %197 : vector<8x32xf32>
    %cst_90 = arith.constant dense<0.000000e+00> : vector<8xf32>
    %199 = vector.multi_reduction <add>, %198, %cst_90 [1] : vector<8x32xf32> to vector<8xf32>
    %200 = vector.shape_cast %199 : vector<8xf32> to vector<8x1xf32>
    %201 = arith.addf %195, %200 : vector<8x1xf32>
    %c0_91 = arith.constant 0 : index
    %c0_92 = arith.constant 0 : index
    %202 = vector.load %arg22[%c0_91, %c0_92] : memref<1x32xf32, #tpu.memory_space<vmem>>, vector<1x32xf32>
    %203 = vector.broadcast %202 : vector<1x32xf32> to vector<8x32xf32>
    %204 = arith.mulf %190, %203 : vector<8x32xf32>
    %cst_93 = arith.constant dense<0.000000e+00> : vector<8xf32>
    %205 = vector.multi_reduction <add>, %204, %cst_93 [1] : vector<8x32xf32> to vector<8xf32>
    %206 = vector.shape_cast %205 : vector<8xf32> to vector<8x1xf32>
    %207 = arith.addf %201, %206 : vector<8x1xf32>
    %c0_94 = arith.constant 0 : index
    %c0_95 = arith.constant 0 : index
    %208 = vector.load %arg23[%c0_94, %c0_95] : memref<1x1xf32, #tpu.memory_space<vmem>>, vector<1x1xf32>
    %209 = vector.broadcast %208 : vector<1x1xf32> to vector<8x1xf32>
    %210 = arith.addf %207, %209 : vector<8x1xf32>
    %211 = arith.negf %210 : vector<8x1xf32>
    %212 = math.exp %211 : vector<8x1xf32>
    %cst_96 = arith.constant 1.000000e+00 : f32
    %213 = vector.broadcast %cst_96 : f32 to vector<8x1xf32>
    %214 = arith.addf %213, %212 : vector<8x1xf32>
    %215 = arith.divf %213, %214 : vector<8x1xf32>
    %c0_97 = arith.constant 0 : index
    %c0_98 = arith.constant 0 : index
    %216 = vector.load %arg24[%c0_97, %c0_98] : memref<32x32xf32, #tpu.memory_space<vmem>>, vector<32x32xf32>
    %cst_99 = arith.constant dense<0.000000e+00> : vector<8x32xf32>
    %217 = tpu.matmul %47, %216, %cst_99 {dimension_numbers = #tpu.dot_dimension_numbers<[1], [0], [0], [1], [0, 0, 1, 1], [], []>} : vector<8x32xf32>, vector<32x32xf32>, vector<8x32xf32> -> vector<8x32xf32>
    %c0_100 = arith.constant 0 : index
    %c0_101 = arith.constant 0 : index
    %218 = vector.load %arg25[%c0_100, %c0_101] : memref<32x32xf32, #tpu.memory_space<vmem>>, vector<32x32xf32>
    %cst_102 = arith.constant dense<0.000000e+00> : vector<8x32xf32>
    %219 = tpu.matmul %190, %218, %cst_102 {dimension_numbers = #tpu.dot_dimension_numbers<[1], [0], [0], [1], [0, 0, 1, 1], [], []>} : vector<8x32xf32>, vector<32x32xf32>, vector<8x32xf32> -> vector<8x32xf32>
    %220 = arith.addf %217, %219 : vector<8x32xf32>
    %c0_103 = arith.constant 0 : index
    %c0_104 = arith.constant 0 : index
    %221 = vector.load %arg26[%c0_103, %c0_104] : memref<1x32xf32, #tpu.memory_space<vmem>>, vector<1x32xf32>
    %222 = vector.broadcast %221 : vector<1x32xf32> to vector<8x32xf32>
    %223 = arith.addf %220, %222 : vector<8x32xf32>
    %c0_105 = arith.constant 0 : index
    %c0_106 = arith.constant 0 : index
    %224 = vector.load %arg27[%c0_105, %c0_106] : memref<32x128xf32, #tpu.memory_space<vmem>>, vector<32x128xf32>
    %cst_107 = arith.constant dense<0.000000e+00> : vector<8x128xf32>
    %225 = tpu.matmul %223, %224, %cst_107 {dimension_numbers = #tpu.dot_dimension_numbers<[1], [0], [0], [1], [0, 0, 1, 1], [], []>} : vector<8x32xf32>, vector<32x128xf32>, vector<8x128xf32> -> vector<8x128xf32>
    %c0_108 = arith.constant 0 : index
    %c0_109 = arith.constant 0 : index
    %226 = vector.load %arg28[%c0_108, %c0_109] : memref<1x128xf32, #tpu.memory_space<vmem>>, vector<1x128xf32>
    %227 = vector.broadcast %226 : vector<1x128xf32> to vector<8x128xf32>
    %228 = arith.addf %225, %227 : vector<8x128xf32>
    %cst_110 = arith.constant dense<0xFF800000> : vector<8xf32>
    %229 = vector.multi_reduction <maximumf>, %228, %cst_110 [1] : vector<8x128xf32> to vector<8xf32>
    %230 = vector.shape_cast %229 : vector<8xf32> to vector<8x1xf32>
    %231 = vector.broadcast %230 : vector<8x1xf32> to vector<8x128xf32>
    %232 = arith.subf %228, %231 : vector<8x128xf32>
    %233 = math.exp %232 : vector<8x128xf32>
    %cst_111 = arith.constant dense<0.000000e+00> : vector<8xf32>
    %234 = vector.multi_reduction <add>, %233, %cst_111 [1] : vector<8x128xf32> to vector<8xf32>
    %235 = vector.shape_cast %234 : vector<8xf32> to vector<8x1xf32>
    %236 = tpu.reciprocal %235 {approx = true} : vector<8x1xf32> -> vector<8x1xf32>
    %237 = vector.broadcast %236 : vector<8x1xf32> to vector<8x128xf32>
    %238 = arith.mulf %233, %237 : vector<8x128xf32>
    %239 = vector.broadcast %180 : vector<8x1xf32> to vector<8x8xf32>
    %240 = arith.mulf %239, %68 : vector<8x8xf32>
    %241 = vector.shape_cast %240 : vector<8x8xf32> to vector<8x1x8xf32>
    %c0_112 = arith.constant 0 : index
    %c0_113 = arith.constant 0 : index
    %c0_114 = arith.constant 0 : index
    %242 = vector.load %arg12[%c0_112, %c0_113, %c0_114] : memref<8x8x128xf32, #tpu.memory_space<vmem>>, vector<8x8x128xf32>
    "tpu.trace_start"() <{level = 10 : i32, message = "bqt,btv->bqv"}> : () -> ()
    %cst_115 = arith.constant dense<0.000000e+00> : vector<8x1x128xf32>
    %243 = tpu.matmul %241, %242, %cst_115 {dimension_numbers = #tpu.dot_dimension_numbers<[2], [1], [1], [2], [0, 0, 0, 1, 1, 2], [0], [0]>} : vector<8x1x8xf32>, vector<8x8x128xf32>, vector<8x1x128xf32> -> vector<8x1x128xf32>
    "tpu.trace_stop"() : () -> ()
    %244 = vector.shape_cast %243 : vector<8x1x128xf32> to vector<8x128xf32>
    %245 = vector.broadcast %182 : vector<8x1xf32> to vector<8x8xf32>
    %246 = arith.mulf %245, %88 : vector<8x8xf32>
    %247 = vector.shape_cast %246 : vector<8x8xf32> to vector<8x1x8xf32>
    %c0_116 = arith.constant 0 : index
    %c0_117 = arith.constant 0 : index
    %c0_118 = arith.constant 0 : index
    %248 = vector.load %arg14[%c0_116, %c0_117, %c0_118] : memref<8x8x128xf32, #tpu.memory_space<vmem>>, vector<8x8x128xf32>
    "tpu.trace_start"() <{level = 10 : i32, message = "bqt,btv->bqv"}> : () -> ()
    %cst_119 = arith.constant dense<0.000000e+00> : vector<8x1x128xf32>
    %249 = tpu.matmul %247, %248, %cst_119 {dimension_numbers = #tpu.dot_dimension_numbers<[2], [1], [1], [2], [0, 0, 0, 1, 1, 2], [0], [0]>} : vector<8x1x8xf32>, vector<8x8x128xf32>, vector<8x1x128xf32> -> vector<8x1x128xf32>
    "tpu.trace_stop"() : () -> ()
    %250 = vector.shape_cast %249 : vector<8x1x128xf32> to vector<8x128xf32>
    %251 = vector.broadcast %215 : vector<8x1xf32> to vector<8x128xf32>
    %252 = arith.mulf %251, %238 : vector<8x128xf32>
    %cst_120 = arith.constant 1.000000e+00 : f32
    %253 = vector.broadcast %cst_120 : f32 to vector<8x1xf32>
    %254 = arith.subf %253, %215 : vector<8x1xf32>
    %255 = vector.broadcast %181 : vector<8x1xf32> to vector<8x128xf32>
    %256 = arith.mulf %255, %159 : vector<8x128xf32>
    %257 = arith.addf %244, %256 : vector<8x128xf32>
    %258 = arith.addf %257, %250 : vector<8x128xf32>
    %259 = vector.broadcast %254 : vector<8x1xf32> to vector<8x128xf32>
    %260 = arith.mulf %259, %258 : vector<8x128xf32>
    %261 = arith.addf %252, %260 : vector<8x128xf32>
    %262 = vector.broadcast %6 : vector<8x1xf32> to vector<8x128xf32>
    %263 = arith.mulf %262, %261 : vector<8x128xf32>
    %264 = vector.shape_cast %263 : vector<8x128xf32> to vector<1x8x128xf32>
    %c0_121 = arith.constant 0 : index
    %c0_122 = arith.constant 0 : index
    %c0_123 = arith.constant 0 : index
    %265 = vector.load %arg29[%c0_121, %c0_122, %c0_123] : memref<1x8x128xf32, #tpu.memory_space<vmem>>, vector<1x8x128xf32>
    tpu.vector_store %arg29[%c0_121, %c0_122, %c0_123], %264 {strides = array<i32>} : memref<1x8x128xf32, #tpu.memory_space<vmem>>, vector<1x8x128xf32>,
    %266 = vector.broadcast %6 : vector<8x1xf32> to vector<8x32xf32>
    %267 = arith.mulf %266, %47 : vector<8x32xf32>
    %cst_124 = arith.constant 1.000000e+00 : f32
    %268 = vector.broadcast %cst_124 : f32 to vector<8x1xf32>
    %269 = arith.subf %268, %6 : vector<8x1xf32>
    %270 = vector.broadcast %269 : vector<8x1xf32> to vector<8x32xf32>
    %271 = arith.mulf %270, %7 : vector<8x32xf32>
    %272 = arith.addf %267, %271 : vector<8x32xf32>
    %c0_125 = arith.constant 0 : index
    %c0_126 = arith.constant 0 : index
    %273 = vector.load %arg32[%c0_125, %c0_126] : memref<8x32xf32, #tpu.memory_space<vmem>>, vector<8x32xf32>
    tpu.vector_store %arg32[%c0_125, %c0_126], %272 {strides = array<i32>} : memref<8x32xf32, #tpu.memory_space<vmem>>, vector<8x32xf32>,
    %274 = vector.broadcast %6 : vector<8x1xf32> to vector<8x32xf32>
    %275 = arith.mulf %274, %190 : vector<8x32xf32>
    %cst_127 = arith.constant 1.000000e+00 : f32
    %276 = vector.broadcast %cst_127 : f32 to vector<8x1xf32>
    %277 = arith.subf %276, %6 : vector<8x1xf32>
    %278 = vector.broadcast %277 : vector<8x1xf32> to vector<8x32xf32>
    %279 = arith.mulf %278, %8 : vector<8x32xf32>
    %280 = arith.addf %275, %279 : vector<8x32xf32>
    %c0_128 = arith.constant 0 : index
    %c0_129 = arith.constant 0 : index
    %281 = vector.load %arg33[%c0_128, %c0_129] : memref<8x32xf32, #tpu.memory_space<vmem>>, vector<8x32xf32>
    tpu.vector_store %arg33[%c0_128, %c0_129], %280 {strides = array<i32>} : memref<8x32xf32, #tpu.memory_space<vmem>>, vector<8x32xf32>,
    %c5_i32 = arith.constant 5 : i32
    %282 = arith.cmpi eq, %arg0, %c5_i32 : i32
    %283 = arith.extui %282 : i1 to i32
    %c0_i32_130 = arith.constant 0 : i32
    %284 = arith.cmpi ne, %283, %c0_i32_130 : i32
    scf.if %284 {
      %c0_131 = arith.constant 0 : index
      %c0_132 = arith.constant 0 : index
      %285 = vector.load %arg32[%c0_131, %c0_132] : memref<8x32xf32, #tpu.memory_space<vmem>>, vector<8x32xf32>
      %c0_133 = arith.constant 0 : index
      %c0_134 = arith.constant 0 : index
      %286 = vector.load %arg30[%c0_133, %c0_134] : memref<8x32xf32, #tpu.memory_space<vmem>>, vector<8x32xf32>
      tpu.vector_store %arg30[%c0_133, %c0_134], %285 {strides = array<i32>} : memref<8x32xf32, #tpu.memory_space<vmem>>, vector<8x32xf32>,
      %c0_135 = arith.constant 0 : index
      %c0_136 = arith.constant 0 : index
      %287 = vector.load %arg33[%c0_135, %c0_136] : memref<8x32xf32, #tpu.memory_space<vmem>>, vector<8x32xf32>
      %c0_137 = arith.constant 0 : index
      %c0_138 = arith.constant 0 : index
      %288 = vector.load %arg31[%c0_137, %c0_138] : memref<8x32xf32, #tpu.memory_space<vmem>>, vector<8x32xf32>
      tpu.vector_store %arg31[%c0_137, %c0_138], %287 {strides = array<i32>} : memref<8x32xf32, #tpu.memory_space<vmem>>, vector<8x32xf32>,
    } else {
    }
    return
  }
  func.func @transform_0(%arg0: i32) -> (i32, i32, i32) {
    %c0_i32 = arith.constant 0 : i32
    %c0_i32_0 = arith.constant 0 : i32
    %c0_i32_1 = arith.constant 0 : i32
    return %arg0, %c0_i32, %c0_i32_0 : i32, i32, i32
  }
  func.func @transform_1(%arg0: i32) -> (i32, i32, i32) {
    %c0_i32 = arith.constant 0 : i32
    %c0_i32_0 = arith.constant 0 : i32
    %c0_i32_1 = arith.constant 0 : i32
    return %arg0, %c0_i32, %c0_i32_0 : i32, i32, i32
  }
  func.func @transform_2(%arg0: i32) -> (i32, i32) {
    %c0_i32 = arith.constant 0 : i32
    %c0_i32_0 = arith.constant 0 : i32
    %c0_i32_1 = arith.constant 0 : i32
    return %c0_i32, %c0_i32_0 : i32, i32
  }
  func.func @transform_3(%arg0: i32) -> (i32, i32) {
    %c0_i32 = arith.constant 0 : i32
    %c0_i32_0 = arith.constant 0 : i32
    %c0_i32_1 = arith.constant 0 : i32
    return %c0_i32, %c0_i32_0 : i32, i32
  }
  func.func @transform_4(%arg0: i32) -> (i32, i32, i32) {
    %c0_i32 = arith.constant 0 : i32
    %c0_i32_0 = arith.constant 0 : i32
    %c0_i32_1 = arith.constant 0 : i32
    %c0_i32_2 = arith.constant 0 : i32
    return %c0_i32, %c0_i32_0, %c0_i32_1 : i32, i32, i32
  }
  func.func @transform_5(%arg0: i32) -> (i32, i32) {
    %c0_i32 = arith.constant 0 : i32
    %c0_i32_0 = arith.constant 0 : i32
    %c0_i32_1 = arith.constant 0 : i32
    return %c0_i32, %c0_i32_0 : i32, i32
  }
  func.func @transform_6(%arg0: i32) -> (i32, i32, i32, i32) {
    %c0_i32 = arith.constant 0 : i32
    %c0_i32_0 = arith.constant 0 : i32
    %c0_i32_1 = arith.constant 0 : i32
    %c0_i32_2 = arith.constant 0 : i32
    %c0_i32_3 = arith.constant 0 : i32
    return %c0_i32, %c0_i32_0, %c0_i32_1, %c0_i32_2 : i32, i32, i32, i32
  }
  func.func @transform_7(%arg0: i32) -> (i32, i32, i32) {
    %c0_i32 = arith.constant 0 : i32
    %c0_i32_0 = arith.constant 0 : i32
    %c0_i32_1 = arith.constant 0 : i32
    %c0_i32_2 = arith.constant 0 : i32
    return %c0_i32, %c0_i32_0, %c0_i32_1 : i32, i32, i32
  }
  func.func @transform_8(%arg0: i32) -> (i32, i32, i32) {
    %c0_i32 = arith.constant 0 : i32
    %c0_i32_0 = arith.constant 0 : i32
    %c0_i32_1 = arith.constant 0 : i32
    %c0_i32_2 = arith.constant 0 : i32
    return %c0_i32, %c0_i32_0, %c0_i32_1 : i32, i32, i32
  }
  func.func @transform_9(%arg0: i32) -> (i32, i32) {
    %c0_i32 = arith.constant 0 : i32
    %c0_i32_0 = arith.constant 0 : i32
    %c0_i32_1 = arith.constant 0 : i32
    return %c0_i32, %c0_i32_0 : i32, i32
  }
  func.func @transform_10(%arg0: i32) -> (i32, i32) {
    %c0_i32 = arith.constant 0 : i32
    %c0_i32_0 = arith.constant 0 : i32
    %c0_i32_1 = arith.constant 0 : i32
    return %c0_i32, %c0_i32_0 : i32, i32
  }
  func.func @transform_11(%arg0: i32) -> (i32, i32, i32) {
    %c0_i32 = arith.constant 0 : i32
    %c0_i32_0 = arith.constant 0 : i32
    %c0_i32_1 = arith.constant 0 : i32
    %c0_i32_2 = arith.constant 0 : i32
    return %c0_i32, %c0_i32_0, %c0_i32_1 : i32, i32, i32
  }
  func.func @transform_12(%arg0: i32) -> (i32, i32, i32, i32) {
    %c0_i32 = arith.constant 0 : i32
    %c0_i32_0 = arith.constant 0 : i32
    %c0_i32_1 = arith.constant 0 : i32
    %c0_i32_2 = arith.constant 0 : i32
    %c0_i32_3 = arith.constant 0 : i32
    return %c0_i32, %c0_i32_0, %c0_i32_1, %c0_i32_2 : i32, i32, i32, i32
  }
  func.func @transform_13(%arg0: i32) -> (i32, i32, i32) {
    %c0_i32 = arith.constant 0 : i32
    %c0_i32_0 = arith.constant 0 : i32
    %c0_i32_1 = arith.constant 0 : i32
    %c0_i32_2 = arith.constant 0 : i32
    return %c0_i32, %c0_i32_0, %c0_i32_1 : i32, i32, i32
  }
  func.func @transform_14(%arg0: i32) -> (i32, i32) {
    %c0_i32 = arith.constant 0 : i32
    %c0_i32_0 = arith.constant 0 : i32
    %c0_i32_1 = arith.constant 0 : i32
    return %c0_i32, %c0_i32_0 : i32, i32
  }
  func.func @transform_15(%arg0: i32) -> (i32, i32) {
    %c0_i32 = arith.constant 0 : i32
    %c0_i32_0 = arith.constant 0 : i32
    %c0_i32_1 = arith.constant 0 : i32
    return %c0_i32, %c0_i32_0 : i32, i32
  }
  func.func @transform_16(%arg0: i32) -> (i32, i32) {
    %c0_i32 = arith.constant 0 : i32
    %c0_i32_0 = arith.constant 0 : i32
    %c0_i32_1 = arith.constant 0 : i32
    return %c0_i32, %c0_i32_0 : i32, i32
  }
  func.func @transform_17(%arg0: i32) -> (i32, i32) {
    %c0_i32 = arith.constant 0 : i32
    %c0_i32_0 = arith.constant 0 : i32
    %c0_i32_1 = arith.constant 0 : i32
    return %c0_i32, %c0_i32_0 : i32, i32
  }
  func.func @transform_18(%arg0: i32) -> (i32, i32) {
    %c0_i32 = arith.constant 0 : i32
    %c0_i32_0 = arith.constant 0 : i32
    %c0_i32_1 = arith.constant 0 : i32
    return %c0_i32, %c0_i32_0 : i32, i32
  }
  func.func @transform_19(%arg0: i32) -> (i32, i32) {
    %c0_i32 = arith.constant 0 : i32
    %c0_i32_0 = arith.constant 0 : i32
    %c0_i32_1 = arith.constant 0 : i32
    return %c0_i32, %c0_i32_0 : i32, i32
  }
  func.func @transform_20(%arg0: i32) -> (i32, i32) {
    %c0_i32 = arith.constant 0 : i32
    %c0_i32_0 = arith.constant 0 : i32
    %c0_i32_1 = arith.constant 0 : i32
    return %c0_i32, %c0_i32_0 : i32, i32
  }
  func.func @transform_21(%arg0: i32) -> (i32, i32) {
    %c0_i32 = arith.constant 0 : i32
    %c0_i32_0 = arith.constant 0 : i32
    %c0_i32_1 = arith.constant 0 : i32
    return %c0_i32, %c0_i32_0 : i32, i32
  }
  func.func @transform_22(%arg0: i32) -> (i32, i32) {
    %c0_i32 = arith.constant 0 : i32
    %c0_i32_0 = arith.constant 0 : i32
    %c0_i32_1 = arith.constant 0 : i32
    return %c0_i32, %c0_i32_0 : i32, i32
  }
  func.func @transform_23(%arg0: i32) -> (i32, i32) {
    %c0_i32 = arith.constant 0 : i32
    %c0_i32_0 = arith.constant 0 : i32
    %c0_i32_1 = arith.constant 0 : i32
    return %c0_i32, %c0_i32_0 : i32, i32
  }
  func.func @transform_24(%arg0: i32) -> (i32, i32) {
    %c0_i32 = arith.constant 0 : i32
    %c0_i32_0 = arith.constant 0 : i32
    %c0_i32_1 = arith.constant 0 : i32
    return %c0_i32, %c0_i32_0 : i32, i32
  }
  func.func @transform_25(%arg0: i32) -> (i32, i32) {
    %c0_i32 = arith.constant 0 : i32
    %c0_i32_0 = arith.constant 0 : i32
    %c0_i32_1 = arith.constant 0 : i32
    return %c0_i32, %c0_i32_0 : i32, i32
  }
  func.func @transform_26(%arg0: i32) -> (i32, i32) {
    %c0_i32 = arith.constant 0 : i32
    %c0_i32_0 = arith.constant 0 : i32
    %c0_i32_1 = arith.constant 0 : i32
    return %c0_i32, %c0_i32_0 : i32, i32
  }
  func.func @transform_27(%arg0: i32) -> (i32, i32) {
    %c0_i32 = arith.constant 0 : i32
    %c0_i32_0 = arith.constant 0 : i32
    %c0_i32_1 = arith.constant 0 : i32
    return %c0_i32, %c0_i32_0 : i32, i32
  }
  func.func @transform_28(%arg0: i32) -> (i32, i32, i32) {
    %c0_i32 = arith.constant 0 : i32
    %c0_i32_0 = arith.constant 0 : i32
    %c0_i32_1 = arith.constant 0 : i32
    return %arg0, %c0_i32, %c0_i32_0 : i32, i32, i32
  }
  func.func @transform_29(%arg0: i32) -> (i32, i32) {
    %c0_i32 = arith.constant 0 : i32
    %c0_i32_0 = arith.constant 0 : i32
    %c0_i32_1 = arith.constant 0 : i32
    return %c0_i32, %c0_i32_0 : i32, i32
  }
  func.func @transform_30(%arg0: i32) -> (i32, i32) {
    %c0_i32 = arith.constant 0 : i32
    %c0_i32_0 = arith.constant 0 : i32
    %c0_i32_1 = arith.constant 0 : i32
    return %c0_i32, %c0_i32_0 : i32, i32
  }
}

</mosaic_0001>

<bundles_post_ra>
// kernel: _decoder_forward_pallas_jit.1
= control target key start
LH: loop header
LB: loop body
LE: loop exit
PB: predicated region body
PF: predicated region fallthrough
CT: control target
= control target key end

     0   :  { %s11270_s6 = smov 1   ;;  %s11271_s10 = smov 2   ;;  %s12558_s0 = inlined_call_operand.smem [shape: u32[31], index: -1, kind: input, shape index: {}] }
   0x1   :  { %s11317_s5 = sld [smem:[%s12558_s0]]   ;;  %s11272_s14 = smov 3  }
   0x2   :  { %s11322_s9 = sld [smem:[%s12558_s0 + %s11270_s6]]   ;;  %s11273_s18 = smov 4  }
   0x3   :  { %s11327_s13 = sld [smem:[%s12558_s0 + %s11271_s10]]   ;;  %s11274_s22 = smov 5  }
   0x4   :  { %s11332_s17 = sld [smem:[%s12558_s0 + %s11272_s14]]   ;;  %s11275_s26 = smov 6  }
   0x5   :  { %s11337_s21 = sld [smem:[%s12558_s0 + %s11273_s18]]   ;;  %s11276_s30 = smov 7  }
   0x6   :  { %s11342_s25 = sld [smem:[%s12558_s0 + %s11274_s22]]   ;;  %s11277_s4 = smov 8  }
   0x7   :  { %s11347_s29 = sld [smem:[%s12558_s0 + %s11275_s26]]   ;;  %s11278_s10 = smov 9  }
   0x8   :  { %s11352_s3 = sld [smem:[%s12558_s0 + %s11276_s30]]   ;;  %s11279_s15 = smov 10  }
   0x9   :  { %s11357_s8 = sld [smem:[%s12558_s0 + %s11277_s4]]   ;;  %s11280_s20 = smov 11  }
   0xa   :  { %s11362_s14 = sld [smem:[%s12558_s0 + %s11278_s10]]   ;;  %s11281_s26 = smov 12  }
   0xb   :  { %s11367_s19 = sld [smem:[%s12558_s0 + %s11279_s15]]   ;;  %s11282_s1 = smov 13  }
   0xc   :  { %s11372_s24 = sld [smem:[%s12558_s0 + %s11280_s20]]   ;;  %s11283_s7 = smov 14  }
   0xd   :  { %12567 = sst [smem:[#allocation5_spill]] %s11347_s29  ;;  %s11284_s15 = smov 15  }
   0xe   :  { %12568 = sst [smem:[#allocation6_spill]] %s11352_s3  ;;  %s11285_s22 = smov 16  }
   0xf   :  { %s11377_s30 = sld [smem:[%s12558_s0 + %s11281_s26]]   ;;  %s11286_s28 = smov 17  }
  0x10   :  { %s11382_s6 = sld [smem:[%s12558_s0 + %s11282_s1]]   ;;  %s11292_s16 = smov 23  }
  0x11   :  { %12569 = sst [smem:[#allocation7_spill]] %s11367_s19  ;;  %s11293_s23 = smov 24  }
  0x12   :  { %12570 = sst [smem:[#allocation8_spill]] %s11372_s24  ;;  %s11294_s1 = smov 25  }
  0x13   :  { %s11387_s12 = sld [smem:[%s12558_s0 + %s11283_s7]]   ;;  %s11287_s7 = smov 18  }
  0x14   :  { %s11392_s20 = sld [smem:[%s12558_s0 + %s11284_s15]]   ;;  %s11288_s15 = smov 19  }
  0x15   :  { %12571 = sst [smem:[#allocation9_spill]] %s11377_s30  ;;  %s11295_s10 = smov 26  }
  0x16   :  { %12572 = sst [smem:[#allocation10_spill]] %s11382_s6 }
  0x17   :  { %s11397_s27 = sld [smem:[%s12558_s0 + %s11285_s22]]   ;;  %s11289_s22 = smov 20  }
  0x18   :  { %s11402_s4 = sld [smem:[%s12558_s0 + %s11286_s28]]   ;;  %s11290_s28 = smov 21  }
  0x19   :  { %s11407_s6 = sld [smem:[%s12558_s0 + %s11287_s7]]   ;;  %s11291_s7 = smov 22  }
  0x1a   :  { %s11412_s24 = sld [smem:[%s12558_s0 + %s11288_s15]]   ;;  %s11467_s15 = smov 0  }
  0x1b   :  { %s11417_s30 = sld [smem:[%s12558_s0 + %s11289_s22]]  }
  0x1c   :  { %s11422_s19 = sld [smem:[%s12558_s0 + %s11290_s28]]  }
  0x1d   :  { %s10028_s3 = sld [smem:[%s12558_s0 + %s11291_s7]]  }
  0x1e   :  { %s11445_s29 = sld [smem:[%s12558_s0 + %s11295_s10]]   ;;  %s11299_s10 = smov 30  }
  0x20   :  { %12573 = sst [smem:[#allocation11_spill]] %s11412_s24 }
  0x21   :  { %12574 = sst [smem:[#allocation12_spill]] %s11417_s30 }
  0x22   :  { %12575 = sst [smem:[#allocation13_spill]] %s11422_s19 }
  0x23   :  { %s11430_s24 = sld [smem:[%s12558_s0 + %s11292_s16]]   ;;  %s11296_s16 = smov 27   ;;  %v67_v0 = vstv %s10028_s3 }
  0x24   :  { %s11435_s30 = sld [smem:[%s12558_s0 + %s11293_s23]]   ;;  %s11297_s23 = smov 28   ;;  %68 = vst [vmem:[#allocation4] sm:$0x1] %v67_v0 }
  0x25   :  { %s11440_s19 = sld [smem:[%s12558_s0 + %s11294_s1]]   ;;  %s11298_s1 = smov 29  }
  0x26   :  { %s11460_s7 = sld [smem:[%s12558_s0 + %s11298_s1]]  }
  0x29   :  { %12576 = sst [smem:[#allocation14_spill]] %s11430_s24 }
  0x2a   :  { %12577 = sst [smem:[#allocation15_spill]] %s11435_s30 }
  0x2b   :  { %12578 = sst [smem:[#allocation16_spill]] %s11440_s19 }
  0x2c   :  { %s11450_s24 = sld [smem:[%s12558_s0 + %s11296_s16]]  }
  0x2d   :  { %s11455_s30 = sld [smem:[%s12558_s0 + %s11297_s23]]  }
  0x2e   :  { %s11465_s16 = sld [smem:[%s12558_s0 + %s11299_s10]]  }
  0x2f LB: > { %s11473_s3 = sadd.s32 4294967295, %s11268_s15   ;;  %p10041_p0 = scmp.ge.s32.totalorder %s11268_s15, 1  ;;  %s11268_s15 = sphi %s11467_s15, %s74_s15  }
  0x30   : > { %p848_p1 = scmp.lt.s32.totalorder %s11268_s15, 7 }
  0x32   : > { %p849_p2 = pnand %p10041_p0, %p848_p1 }
  0x33   : > { %p928_p3 = scmp.lt.s32.totalorder (!%p849_p2), %s11473_s3, 5  ;;  %p10045_p4 = scmp.ne.s32.totalorder (!%p849_p2), %s11473_s3, 0 }
  0x34   : > { %852 = sbr.rel (%p849_p2) target bundleno = 4398 (0x112e), region = 132 }
  0x3b   : > { %s929_s0 = scalar_select %p928_p3, %s11473_s3, 5 }
  0x3c   : > { %943 = sbr.rel (%p10045_p4) target bundleno = 67 (0x43), region = 136  ;;  %v944_v1 = vld [vmem:[%s11327_s13] sm:$0xff] (!%p10045_p4)  ;;  %vm945_vm0 = vcmask (!%p10045_p4), 261120  }
  0x3d   : > { %s11479_s19 = sshll.u32 %s929_s0, 3  ;;  %v947_v2 = vld [vmem:[%s11332_s17] sm:$0xff] (!%p10045_p4)  ;;  %946 = vst.msk [vmem:[#allocation2] sm:$0xff] (!%p10045_p4), %vm945_vm0, %v944_v1 }
  0x3e   : > { %s11483_s18 = scalar_lea.vmem %s11317_s5, %s11479_s19  ;;  %948 = vst.msk [vmem:[#allocation3] sm:$0xff] (!%p10045_p4), %vm945_vm0, %v947_v2 }
  0x43 PF: > { %v957_v3 = vld [vmem:[%s11392_s20] sm:$0xff]  ;;  %v958_v4 = vld [vmem:[%s11392_s20 + $0x8] sm:$0xff]  ;;  %v11300_v6 = vmov 0.0|0.0   ;;  %v959_v9 = vld [vmem:[%s11392_s20 + $0x10] sm:$0xff]  ;;  %vm11301_vm1 = vmmov 0   ;;  %v11302_v14 = vmov 0.0   ;;  %v1234_v51 = vlaneseq }
  0x44   : > { %v953_v5 = vld [vmem:[%s11387_s12] sm:$0xff]  ;;  %10978 = vmatprep.subr.bf16.mxu0 %v11300_v6  ;;  %v10979_v7 = vpack.c.bf16 %v958_v4, %v957_v3  ;;  %10984 = vmatprep.subr.bf16.mxu1 %v11300_v6  ;;  %v954_v8 = vld [vmem:[%s11387_s12 + $0x8] sm:$0xff]  ;;  %v960_v10 = vld [vmem:[%s11392_s20 + $0x18] sm:$0xff]  ;;  %vm961_vm2 = vcmask 261120   ;;  %s11303_s26 = smov 64   ;;  %s11304_s1 = smov 96  }
  0x45   : > { %v10985_v11 = vpack.c.bf16 %v954_v8, %v953_v5  ;;  %v955_v12 = vld [vmem:[%s11387_s12 + $0x10] sm:$0xff]  ;;  %v956_v13 = vld [vmem:[%s11387_s12 + $0x18] sm:$0xff]  ;;  %10440 = vmatprep.mubr.msk.f32.mxu0 %vm11301_vm1, %v11302_v14  ;;  %10451 = vmatprep.mubr.msk.f32.mxu1 %vm11301_vm1, %v11302_v14  ;;  %v10982_v15 = vpack.c.bf16 %v960_v10, %v959_v9  ;;  %v1116_v17 = vld [vmem:[%s11397_s27] sm:$0xff]  ;;  %s12566_s28 = smov 32   ;;  %v11306_v49 = vmov 1966171168  }
  0x46   : > { %10980 = vmatpush3.bf16.msra.mxu0 %v10979_v7  ;;  %v10988_v16 = vpack.c.bf16 %v956_v13, %v955_v12  ;;  %v1117_v18 = vld [vmem:[%s11397_s27 + $0x8] sm:$0xff]  ;;  %v949_v21 = vld [vmem:[%s11483_s18] sm:$0xff]  ;;  %v1118_v22 = vld [vmem:[%s11397_s27 + $0x10] sm:$0xff]  ;;  %v1232_v50 = vunpack.c.l.s4 %v11306_v49  ;;  %v1235_v54 = vshrl.u32 %v1234_v51, 7  ;;  %vm2010_vm3 = vcmask 57344   ;;  %s12579_s2 = sld [smem:[#allocation5_spill]] }
  0x47   : > { %10986 = vmatpush3.bf16.msra.mxu1 %v10985_v11  ;;  %10981 = vmatprep.subr.bf16.mxu0 %v11300_v6  ;;  %v952_v19 = vld [vmem:[#allocation3] sm:$0xff]  ;;  %v10991_v20 = vpack.c.bf16 %v1117_v18, %v1116_v17  ;;  %v1119_v23 = vld [vmem:[%s11397_s27 + $0x18] sm:$0xff]  ;;  %v951_v25 = vld [vmem:[#allocation2] sm:$0xff]  ;;  %vm2099_vm4 = vcmask 64512   ;;  %vm5377_vm5 = vcmask 1041409   ;;  %vm5380_vm6 = vcmask 1042434  }
  0x48   : > { %10987 = vmatprep.subr.bf16.mxu1 %v11300_v6  ;;  %v10994_v24 = vpack.c.bf16 %v1119_v23, %v1118_v22  ;;  %v10049_v31 = vld [vmem:[%s11407_s6] ss:$0 sm:$0xff]  ;;  %v11534_v48 = vld [vmem:[%s11337_s21 + $0x8] sm:$0xff]  ;;  %v1233_v53 = vunpack.c.0.s8 %v1232_v50  ;;  %v1290_v62 = vsub.s32 0, %v1235_v54  ;;  %v11571_v23 = vld [vmem:[%s11337_s21 + $0x18] sm:$0xff]  ;;  %vm5383_vm7 = vcmask 1043459  }
  0x49   : > { %v10048_v35 = vld [vmem:[%s11402_s4] ss:$0 sm:$0xff]  ;;  %vm5386_vm8 = vcmask 1044484   ;;  %vm5389_vm9 = vcmask 1045509   ;;  %vm5392_vm10 = vcmask 1046534   ;;  %vm5395_vm11 = vcmask 1047559  }
  0x4a   : > { %10983 = vmatpush3.bf16.msra.mxu0 %v10982_v15  ;;  %v11531_v47 = vld [vmem:[%s11337_s21] sm:$0xff]  ;;  %v11542_v59 = vsub.s32 %v1233_v53, %v1235_v54  ;;  %s12580_s10 = sld [smem:[#allocation6_spill]]  ;;  %s12581_s11 = sld [smem:[#allocation7_spill]] }
  0x4b   : > { %10989 = vmatpush3.bf16.msra.mxu1 %v10988_v16  ;;  %10990 = vmatprep.subr.bf16.mxu0 %v11300_v6  ;;  %s12582_s0 = sld [smem:[#allocation9_spill]]  ;;  %s12585_s22 = sld [smem:[#allocation15_spill]] }
  0x4c   : > { %10470 = vmatprep.subr.mxu1 %v11302_v14  ;;  %s12586_s23 = sld [smem:[#allocation8_spill]]  ;;  %p10207_p5 = scmp.ne.s32.totalorder %s11473_s3, 5 }
  0x4d   : > { %10441 = vmatmul.mubr.msk.f32.vlgmr.msra.gmra.mrb[0].mxu0 %vm961_vm2, %v952_v19 }
  0x4e   : > { %10452 = vmatmul.mubr.msk.f32.vlgmr.msra.gmra.mrb[0].mxu1 %vm961_vm2, %v949_v21  ;;  %10992 = vmatpush3.bf16.msra.mxu0 %v10991_v20  ;;  %v11564_v21 = vld [vmem:[%s11337_s21 + $0x10] sm:$0xff] }
  0x4f   : > { %10993 = vmatprep.subr.bf16.mxu0 %v11300_v6  ;;  %10462 = vmatprep.mubr.msk.f32.mxu0 %vm11301_vm1, %v11302_v14 }
  0x50   : > { %10472 = vmatprep.mubr.msk.f32.mxu1 %vm11301_vm1, %v11302_v14 }
  0x52   : > { %10995 = vmatpush3.bf16.msra.mxu0 %v10994_v24 }
  0x53   : > { %10465 = vmatprep.subr.mxu0 %v11302_v14 }
  0x54   : > { %10471 = vmatpush3.xpose.msk.msra.mxu1 %vm961_vm2, %v11534_v48 }
  0x55   : > { %10463 = vmatmul.mubr.msk.f32.vlgmr.msra.gmra.mrb[2].mxu0 %vm961_vm2, %v951_v25  ;;  %10480 = vmatprep.subr.mxu1 %v11302_v14 }
  0x56   : > { %10467 = vmatprep.mubr.msk.f32.mxu0 %vm11301_vm1, %v11302_v14 }
  0x5b   : > { %10466 = vmatpush3.xpose.msk.msra.mxu0 %vm961_vm2, %v11531_v47 }
  0x5c   : > { %10475 = vmatprep.subr.mxu0 %v11302_v14 }
 0x120   : > { %v1031_v26 = vpop.f32.mrb[0].mxu0 }
 0x121   : > { %v10442_v27 = vpop.f32.mrb[1].mxu0  ;;  %v1104_v28 = vpop.f32.mrb[0].mxu1 }
 0x122   : > { %v1105_v29 = vadd.f32 %v1104_v28, %v1031_v26  ;;  %v10453_v30 = vpop.f32.mrb[1].mxu1  ;;  %v11595_v27 = vld [vmem:[%s11337_s21 + $0x28] sm:$0xff] }
 0x124   : > { %v1115_v36 = vadd.f32 %v10048_v35, %v1105_v29  ;;  %v11607_v29 = vld [vmem:[%s11337_s21 + $0x30] sm:$0xff]  ;;  %v1287_v35 = vld [vmem:[%s11342_s25] sm:$0xff] }
 0x128   : > { %v1196_v32 = vpop.f32.mrb[2].mxu0 }
 0x129   : > { %v1197_v33 = vadd.f32 %v10049_v31, %v1196_v32  ;;  %v10464_v34 = vpop.f32.mrb[3].mxu0  ;;  %v11619_v31 = vld [vmem:[%s11337_s21 + $0x38] sm:$0xff] }
 0x12b   : > { %1208 = vrot.lane.b32.xlu0 %v1197_v33, %s11303_s26  ;;  %v1200_v37 = vadd.f32 %v1197_v33, %v1115_v36 }
 0x12d   : > { %v10051_v38 = vmul.f32 -1.442695, %v1200_v37 }
 0x12f   : > { %11109 = vpow2.f32 %v10051_v38  ;;  %v1937_v38 = vcombine.high %v1287_v35, %v1287_v35 }
 0x139   : > { %v11110_v39 = vpop.eup %11109 }
 0x13a   : > { %v1204_v40 = vadd.f32 1.0, %v11110_v39 }
 0x13c   : > { %11111 = vrcp.f32 %v1204_v40 }
 0x146   : > { %v11112_v41 = vpop.eup %11111 }
 0x147   : > { %v1218_v55 = vsub.f32 1.0, %v11112_v41 }
 0x19d   : > { %v1209_v42 = vpop.permute.xlu0 %1208 }
 0x19e   : > { %v1211_v43 = vmul.f32 %v11112_v41, %v1209_v42 }
 0x1a0   : > { %1213 = vrot.lane.b32.xlu0 %v1211_v43, %s11303_s26  ;;  %s12583_s26 = sld [smem:[#allocation14_spill]] }
 0x212   : > { %v1214_v44 = vpop.permute.xlu0 %1213 }
 0x213   : > { %v1216_v45 = vadd.f32 %v1214_v44, %v1115_v36  ;;  %v1944_v36 = vrot.slane %v1287_v35, %v11542_v59 }
 0x215   : > { %11113 = vtanh.f32 %v1216_v45  ;;  %v1952_v37 = vcombine.high %v1944_v36, %v1944_v36  ;;  %v1960_v39 = vrot.slane %v1944_v36, %v11542_v59 }
 0x217   : > { %v1974_v40 = vrot.slane %v1952_v37, %v11542_v59  ;;  %v1994_v42 = vmul.f32 1e+30, %v1960_v39  ;;  %v1982_v43 = vcombine.high %v1960_v39, %v1960_v39 }
 0x219   : > { %v1995_v44 = vmul.f32 1e+30, %v1974_v40  ;;  %v1984_v45 = vcombine.high %v1974_v40, %v1974_v40  ;;  %v1996_v50 = vmul.f32 1e+30, %v1982_v43 }
 0x21f   : > { %v11114_v46 = vpop.eup %11113 }
 0x220   : > { %1220 = vrot.lane.b32.xlu1 %v11114_v46, %s11304_s1 }
 0x224   : > { %1224 = vrot.lane.b32.xlu1 %v951_v25, %s12566_s28  ;;  %v11583_v25 = vld [vmem:[%s11337_s21 + $0x20] sm:$0xff] }
 0x292   : > { %v1221_v52 = vpop.permute.xlu1 %1220 }
 0x293   : > { %v1223_v57 = vmul.f32 %v1221_v52, %v1218_v55 }
 0x296   : > { %v1225_v56 = vpop.permute.xlu1 %1224 }
 0x297   : > { %v1227_v58 = vmul.f32 %v11112_v41, %v1225_v56  ;;  %v1951_v41 = vrot.slane %v1937_v38, %v11542_v59  ;;  %v1997_v56 = vmul.f32 1e+30, %v1984_v45 }
 0x299   : > { %v11544_v60 = vadd.f32 %v1227_v58, %v1223_v57  ;;  %v1953_v46 = vcombine.high %v1951_v41, %v1951_v41  ;;  %v1967_v51 = vrot.slane %v1951_v41, %v11542_v59 }
 0x29b   : > { %v1237_v61 = vrot.slane %v11544_v60, %v11542_v59  ;;  %v1230_v63 = vcombine.high %v11544_v60, %v11544_v60  ;;  %v1981_v57 = vrot.slane %v1953_v46, %v11542_v59 }
 0x29d   : > { %v1253_v0 = vrot.slane %v1237_v61, %v11542_v59  ;;  %v1245_v1 = vcombine.high %v1237_v61, %v1237_v61  ;;  %v1244_v2 = vrot.slane %v1230_v63, %v11542_v59 }
 0x29f   : > { %v1291_v3 = vrot.slane %v1253_v0, %v1290_v62  ;;  %v1267_v4 = vrot.slane %v1245_v1, %v11542_v59  ;;  %v1275_v5 = vcombine.high %v1253_v0, %v1253_v0  ;;  %v1246_v9 = vcombine.high %v1244_v2, %v1244_v2 }
 0x2a0   : > { %v1260_v11 = vrot.slane %v1244_v2, %v11542_v59  ;;  %v1998_v0 = vmul.f32 1e+30, %v1967_v51  ;;  %v1983_v1 = vcombine.high %v1967_v51, %v1967_v51 }
 0x2a1   : > { %1292 = vrot.lane.b32.xlu0 %v1291_v3, %s11304_s1  ;;  %v1372_v7 = vrot.slane %v1267_v4, %v1290_v62  ;;  %v1277_v8 = vcombine.high %v1267_v4, %v1267_v4  ;;  %v1453_v10 = vrot.slane %v1275_v5, %v1290_v62  ;;  %v1274_v13 = vrot.slane %v1246_v9, %v11542_v59 }
 0x2a2   : > { %v1615_v15 = vrot.slane %v1260_v11, %v1290_v62  ;;  %v1276_v16 = vcombine.high %v1260_v11, %v1260_v11 }
 0x2a3   : > { %1373 = vrot.lane.b32.xlu1 %v1372_v7, %s11304_s1  ;;  %v1534_v12 = vrot.slane %v1277_v8, %v1290_v62  ;;  %v1696_v17 = vrot.slane %v1274_v13, %v1290_v62  ;;  %v1278_v18 = vcombine.high %v1274_v13, %v1274_v13  ;;  %v1999_v7 = vmul.f32 1e+30, %v1981_v57 }
 0x2a4   : > { %v1777_v19 = vrot.slane %v1276_v16, %v1290_v62  ;;  %v1985_v8 = vcombine.high %v1981_v57, %v1981_v57 }
 0x2a5   : > { %1454 = vrot.lane.b32.xlu0 %v1453_v10, %s11304_s1  ;;  %v1858_v20 = vrot.slane %v1278_v18, %v1290_v62 }
 0x2a7   : > { %1535 = vrot.lane.b32.xlu1 %v1534_v12, %s11304_s1  ;;  %v2000_v12 = vmul.f32 1e+30, %v1983_v1 }
 0x2a9   : > { %1616 = vrot.lane.b32.xlu0 %v1615_v15, %s11304_s1 }
 0x2ab   : > { %1697 = vrot.lane.b32.xlu1 %v1696_v17, %s11304_s1 }
 0x2ad   : > { %1778 = vrot.lane.b32.xlu0 %v1777_v19, %s11304_s1  ;;  %v2001_v19 = vmul.f32 1e+30, %v1985_v8 }
 0x2af   : > { %1859 = vrot.lane.b32.xlu1 %v1858_v20, %s11304_s1 }
 0x313   : > { %v11566_v22 = vpop.permute.xlu0 %1292 }
 0x314   : > { %10468 = vmatmul.mubr.msk.f32.vlgmr.msra.gmra.mrb[4].mxu0 %vm961_vm2, %v11566_v22 }
 0x315   : > { %10476 = vmatpush3.xpose.msk.msra.mxu0 %vm961_vm2, %v11564_v21  ;;  %v11575_v24 = vpop.permute.xlu1 %1373  ;;  %10477 = vmatprep.mubr.msk.f32.mxu0 %vm11301_vm1, %v11302_v14 }
 0x316   : > { %10473 = vmatmul.mubr.msk.f32.vlgmr.msra.gmra.mrb[2].mxu1 %vm961_vm2, %v11575_v24  ;;  %10485 = vmatprep.subr.mxu0 %v11302_v14 }
 0x317   : > { %v11585_v26 = vpop.permute.xlu0 %1454  ;;  %10481 = vmatpush3.xpose.msk.msra.mxu1 %vm961_vm2, %v11571_v23  ;;  %10482 = vmatprep.mubr.msk.f32.mxu1 %vm11301_vm1, %v11302_v14 }
 0x318   : > { %10478 = vmatmul.mubr.msk.f32.vlgmr.msra.gmra.mrb[6].mxu0 %vm961_vm2, %v11585_v26  ;;  %10490 = vmatprep.subr.mxu1 %v11302_v14 }
 0x319   : > { %10486 = vmatpush3.xpose.msk.msra.mxu0 %vm961_vm2, %v11583_v25  ;;  %v11599_v28 = vpop.permute.xlu1 %1535  ;;  %10487 = vmatprep.mubr.msk.f32.mxu0 %vm11301_vm1, %v11302_v14 }
 0x31a   : > { %10483 = vmatmul.mubr.msk.f32.vlgmr.msra.gmra.mrb[4].mxu1 %vm961_vm2, %v11599_v28  ;;  %10495 = vmatprep.subr.mxu0 %v11302_v14 }
 0x31b   : > { %10491 = vmatpush3.xpose.msk.msra.mxu1 %vm961_vm2, %v11595_v27  ;;  %v11611_v30 = vpop.permute.xlu0 %1616  ;;  %10492 = vmatprep.mubr.msk.f32.mxu1 %vm11301_vm1, %v11302_v14 }
 0x31c   : > { %10488 = vmatmul.mubr.msk.f32.vlgmr.msra.gmra.mrb[8].mxu0 %vm961_vm2, %v11611_v30  ;;  %10500 = vmatprep.subr.mxu1 %v11302_v14 }
 0x31d   : > { %10496 = vmatpush3.xpose.msk.msra.mxu0 %vm961_vm2, %v11607_v29  ;;  %v11623_v32 = vpop.permute.xlu1 %1697  ;;  %10497 = vmatprep.mubr.msk.f32.mxu0 %vm11301_vm1, %v11302_v14 }
 0x31e   : > { %10493 = vmatmul.mubr.msk.f32.vlgmr.msra.gmra.mrb[6].mxu1 %vm961_vm2, %v11623_v32  ;;  %10505 = vmatprep.subr.mxu0 %v11302_v14 }
 0x31f   : > { %v11630_v33 = vpop.permute.xlu0 %1778  ;;  %10501 = vmatpush3.xpose.msk.msra.mxu1 %vm961_vm2, %v11619_v31  ;;  %10502 = vmatprep.mubr.msk.f32.mxu1 %vm11301_vm1, %v11302_v14 }
 0x320   : > { %10498 = vmatmul.mubr.msk.f32.vlgmr.msra.gmra.mrb[10].mxu0 %vm961_vm2, %v11630_v33  ;;  %10510 = vmatprep.subr.mxu1 %v11302_v14 }
 0x321   : > { %v11639_v34 = vpop.permute.xlu1 %1859  ;;  %10506 = vmatpush3.msra.mxu0 %v11531_v47  ;;  %10507 = vmatprep.mubr.msk.f32.mxu0 %vm11301_vm1, %v11302_v14 }
 0x322   : > { %10503 = vmatmul.mubr.msk.f32.vlgmr.msra.gmra.mrb[8].mxu1 %vm961_vm2, %v11639_v34  ;;  %10515 = vmatprep.subr.mxu0 %v11302_v14 }
 0x323   : > { %10511 = vmatpush3.msra.mxu1 %v11534_v48  ;;  %10512 = vmatprep.mubr.msk.f32.mxu1 %vm11301_vm1, %v11302_v14 }
 0x324   : > { %10520 = vmatprep.subr.mxu1 %v11302_v14 }
 0x3e7   : > { %v1365_v47 = vpop.f32.mrb[4].mxu0 }
 0x3e8   : > { %v2002_v48 = vsub.f32 %v1365_v47, %v1994_v42  ;;  %v10469_v49 = vpop.f32.mrb[5].mxu0 }
 0x3e9   : > { %v1446_v52 = vpop.f32.mrb[2].mxu1 }
 0x3ea   : > { %v2003_v53 = vsub.f32 %v1446_v52, %v1995_v44  ;;  %v10474_v54 = vpop.f32.mrb[3].mxu1  ;;  %v2011_v55 = vsel %vm2010_vm3, %v2002_v48, -inf }
 0x3eb   : > { %v1527_v58 = vpop.f32.mrb[6].mxu0  ;;  %2012 = vmax.xlane.f32.xlu0 %v2011_v55 }
 0x3ec   : > { %v2004_v61 = vsub.f32 %v1527_v58, %v1996_v50  ;;  %v10479_v62 = vpop.f32.mrb[7].mxu0  ;;  %v2014_v63 = vsel %vm2010_vm3, %v2003_v53, -inf }
 0x3ed   : > { %2015 = vmax.xlane.f32.xlu1 %v2014_v63  ;;  %v1608_v2 = vpop.f32.mrb[4].mxu1 }
 0x3ee   : > { %v2005_v3 = vsub.f32 %v1608_v2, %v1997_v56  ;;  %v10484_v4 = vpop.f32.mrb[5].mxu1  ;;  %v2017_v5 = vsel %vm2010_vm3, %v2004_v61, -inf }
 0x3ef   : > { %v1689_v9 = vpop.f32.mrb[8].mxu0  ;;  %2018 = vmax.xlane.f32.xlu0 %v2017_v5 }
 0x3f0   : > { %v2006_v10 = vsub.f32 %v1689_v9, %v1998_v0  ;;  %v10489_v11 = vpop.f32.mrb[9].mxu0  ;;  %v2020_v18 = vsel %vm2010_vm3, %v2005_v3, -inf }
 0x3f1   : > { %v1770_v13 = vpop.f32.mrb[6].mxu1 }
 0x3f2   : > { %v2007_v15 = vsub.f32 %v1770_v13, %v1999_v7  ;;  %v10494_v16 = vpop.f32.mrb[7].mxu1  ;;  %v2023_v17 = vsel %vm2010_vm3, %v2006_v10, -inf }
 0x3f3   : > { %v1851_v20 = vpop.f32.mrb[10].mxu0  ;;  %2024 = vmax.xlane.f32.xlu1 %v2023_v17  ;;  %2021 = vmax.xlane.f32.xlu0 %v2020_v18 }
 0x3f4   : > { %v2008_v35 = vsub.f32 %v1851_v20, %v2000_v12  ;;  %v10499_v36 = vpop.f32.mrb[11].mxu0  ;;  %v2026_v41 = vsel %vm2010_vm3, %v2007_v15, -inf }
 0x3f5   : > { %v1932_v37 = vpop.f32.mrb[8].mxu1 }
 0x3f6   : > { %v2009_v38 = vsub.f32 %v1932_v37, %v2001_v19  ;;  %v10504_v39 = vpop.f32.mrb[9].mxu1  ;;  %v2029_v40 = vsel %vm2010_vm3, %v2008_v35, -inf }
 0x3f7   : > { %2030 = vmax.xlane.f32.xlu1 %v2029_v40  ;;  %2027 = vmax.xlane.f32.xlu0 %v2026_v41 }
 0x3f8   : > { %v2032_v42 = vsel %vm2010_vm3, %v2009_v38, -inf }
 0x3fb   : > { %2033 = vmax.xlane.f32.xlu0 %v2032_v42 }
 0x478   : > { %v2013_v43 = vpop.xlane.xlu0 %2012 }
 0x479   : > { %v2035_v44 = vsub.f32 %v2002_v48, %v2013_v43 }
 0x47a   : > { %v2016_v45 = vpop.xlane.xlu1 %2015 }
 0x47b   : > { %v2043_v46 = vmul.f32 1.442695, %v2035_v44  ;;  %v2036_v47 = vsub.f32 %v2003_v53, %v2016_v45 }
 0x47c   : > { %v2019_v49 = vpop.xlane.xlu0 %2018 }
 0x47d   : > { %11115 = vpow2.f32 %v2043_v46  ;;  %v2045_v50 = vmul.f32 1.442695, %v2036_v47  ;;  %v2037_v51 = vsub.f32 %v2004_v61, %v2019_v49 }
 0x47f   : > { %11117 = vpow2.f32 %v2045_v50  ;;  %v2047_v52 = vmul.f32 1.442695, %v2037_v51 }
 0x480   : > { %v2025_v54 = vpop.xlane.xlu1 %2024  ;;  %v2022_v55 = vpop.xlane.xlu0 %2021 }
 0x481   : > { %11119 = vpow2.f32 %v2047_v52  ;;  %v2039_v56 = vsub.f32 %v2006_v10, %v2025_v54  ;;  %v2038_v57 = vsub.f32 %v2005_v3, %v2022_v55 }
 0x483   : > { %v2051_v58 = vmul.f32 1.442695, %v2039_v56  ;;  %v2049_v62 = vmul.f32 1.442695, %v2038_v57 }
 0x484   : > { %v2031_v63 = vpop.xlane.xlu1 %2030  ;;  %v2028_v0 = vpop.xlane.xlu0 %2027 }
 0x485   : > { %11121 = vpow2.f32 %v2051_v58  ;;  %v2041_v48 = vsub.f32 %v2008_v35, %v2031_v63  ;;  %v2040_v1 = vsub.f32 %v2007_v15, %v2028_v0 }
 0x486   : > { %11123 = vpow2.f32 %v2049_v62 }
 0x487   : > { %v11116_v53 = vpop.eup %11115  ;;  %v2055_v2 = vmul.f32 1.442695, %v2041_v48  ;;  %v2053_v4 = vmul.f32 1.442695, %v2040_v1 }
 0x488   : > { %v2034_v5 = vpop.xlane.xlu0 %2033  ;;  %v2059_v61 = vsel %vm2010_vm3, %v11116_v53, 0.0 }
 0x489   : > { %v11118_v7 = vpop.eup %11117  ;;  %11125 = vpow2.f32 %v2055_v2  ;;  %v2042_v8 = vsub.f32 %v2009_v38, %v2034_v5  ;;  %2060 = vadd.xlane.f32.xlu1 %v2059_v61 }
 0x48a   : > { %11127 = vpow2.f32 %v2053_v4  ;;  %v2062_v3 = vsel %vm2010_vm3, %v11118_v7, 0.0  ;;  %v2684_v4 = vld [vmem:[%s11357_s8] sm:$0xff] }
 0x48b   : > { %v11120_v9 = vpop.eup %11119  ;;  %v2057_v10 = vmul.f32 1.442695, %v2042_v8  ;;  %2063 = vadd.xlane.f32.xlu0 %v2062_v3 }
 0x48c   : > { %v2065_v11 = vsel %vm2010_vm3, %v11120_v9, 0.0 }
 0x48d   : > { %11129 = vpow2.f32 %v2057_v10  ;;  %2066 = vadd.xlane.f32.xlu1 %v2065_v11  ;;  %v11747_v11 = vld [vmem:[%s11357_s8 + $0x20] sm:$0xff] }
 0x48f   : > { %v11122_v12 = vpop.eup %11121 }
 0x490   : > { %v11124_v13 = vpop.eup %11123  ;;  %v2071_v15 = vsel %vm2010_vm3, %v11122_v12, 0.0 }
 0x491   : > { %2072 = vadd.xlane.f32.xlu1 %v2071_v15  ;;  %v2068_v16 = vsel %vm2010_vm3, %v11124_v13, 0.0  ;;  %v11770_v15 = vld [vmem:[%s11357_s8 + $0x28] sm:$0xff] }
 0x492   : > { %2069 = vadd.xlane.f32.xlu0 %v2068_v16  ;;  %v11787_v16 = vld [vmem:[%s11357_s8 + $0x38] sm:$0xff] }
 0x493   : > { %v11671_v17 = vpop.eup %11125 }
 0x494   : > { %v11673_v18 = vpop.eup %11127  ;;  %v2077_v19 = vsel %vm2010_vm3, %v11671_v17, 0.0 }
 0x495   : > { %2078 = vadd.xlane.f32.xlu1 %v2077_v19  ;;  %v2074_v20 = vsel %vm2010_vm3, %v11673_v18, 0.0 }
 0x496   : > { %2075 = vadd.xlane.f32.xlu0 %v2074_v20 }
 0x497   : > { %v11679_v35 = vpop.eup %11129 }
 0x498   : > { %v2080_v36 = vsel %vm2010_vm3, %v11679_v35, 0.0 }
 0x49a   : > { %2081 = vadd.xlane.f32.xlu0 %v2080_v36 }
 0x516   : > { %v2061_v37 = vpop.xlane.xlu1 %2060 }
 0x517   : > { %11131 = vrcp.f32 %v2061_v37 }
 0x518   : > { %v2064_v38 = vpop.xlane.xlu0 %2063 }
 0x519   : > { %11133 = vrcp.f32 %v2064_v38 }
 0x51a   : > { %v2067_v39 = vpop.xlane.xlu1 %2066 }
 0x51b   : > { %11135 = vrcp.f32 %v2067_v39 }
 0x51e   : > { %v2073_v40 = vpop.xlane.xlu1 %2072 }
 0x51f   : > { %11137 = vrcp.f32 %v2073_v40  ;;  %v2070_v41 = vpop.xlane.xlu0 %2069  ;;  %v2692_v40 = vld [vmem:[%s11362_s14] sm:$0xff] }
 0x520   : > { %11139 = vrcp.f32 %v2070_v41 }
 0x521   : > { %v11132_v42 = vpop.eup %11131 }
 0x522   : > { %v2091_v43 = vmul.f32 %v11132_v42, %v11116_v53  ;;  %v2079_v44 = vpop.xlane.xlu1 %2078 }
 0x523   : > { %v11134_v45 = vpop.eup %11133  ;;  %11141 = vrcp.f32 %v2079_v44  ;;  %v2076_v46 = vpop.xlane.xlu0 %2075 }
 0x524   : > { %v2092_v47 = vmul.f32 %v11134_v45, %v11118_v7  ;;  %11143 = vrcp.f32 %v2076_v46  ;;  %10508 = vmatmul.mubr.msk.f32.vlgmr.msra.gmra.mrb[12].mxu0 %vm2099_vm4, %v2091_v43 }
 0x525   : > { %v11136_v49 = vpop.eup %11135  ;;  %10516 = vmatpush3.msra.mxu0 %v11564_v21  ;;  %10517 = vmatprep.mubr.msk.f32.mxu0 %vm11301_vm1, %v11302_v14 }
 0x526   : > { %v8500_v50 = vrot.slane %v2092_v47, 7  ;;  %v2093_v51 = vmul.f32 %v11136_v49, %v11120_v9  ;;  %10513 = vmatmul.mubr.msk.f32.vlgmr.msra.gmra.mrb[10].mxu1 %vm2099_vm4, %v2092_v47  ;;  %10525 = vmatprep.subr.mxu0 %v11302_v14  ;;  %v2685_v9 = vld [vmem:[%s11357_s8 + $0x8] sm:$0xff] }
 0x527   : > { %v2082_v52 = vpop.xlane.xlu0 %2081  ;;  %10521 = vmatpush3.msra.mxu1 %v11571_v23  ;;  %10522 = vmatprep.mubr.msk.f32.mxu1 %vm11301_vm1, %v11302_v14 }
 0x528   : > { %v8501_v54 = vsel %vm5377_vm5, %v8500_v50, %v2091_v43  ;;  %v8502_v55 = vrot.slane %v2093_v51, 6  ;;  %11145 = vrcp.f32 %v2082_v52  ;;  %10518 = vmatmul.mubr.msk.f32.vlgmr.msra.gmra.mrb[14].mxu0 %vm2099_vm4, %v2093_v51  ;;  %10530 = vmatprep.subr.mxu1 %v11302_v14  ;;  %v3285_v43 = vrot.slane %v2692_v40, %v11542_v59 }
 0x529   : > { %v11138_v21 = vpop.eup %11137  ;;  %10526 = vmatpush3.msra.mxu0 %v11583_v25  ;;  %10527 = vmatprep.mubr.msk.f32.mxu0 %vm11301_vm1, %v11302_v14 }
 0x52a   : > { %v11140_v56 = vpop.eup %11139  ;;  %v8503_v23 = vsel %vm5380_vm6, %v8502_v55, %v8501_v54  ;;  %v2095_v57 = vmul.f32 %v11138_v21, %v11122_v12  ;;  %10535 = vmatprep.subr.mxu0 %v11302_v14  ;;  %v11751_v12 = vld [vmem:[%s11357_s8 + $0x18] sm:$0xff]  ;;  %v3301_v52 = vrot.slane %v3285_v43, %v11542_v59  ;;  %v3278_v54 = vcombine.high %v2692_v40, %v2692_v40 }
 0x52b   : > { %v2094_v58 = vmul.f32 %v11140_v56, %v11124_v13  ;;  %v11764_v13 = vld [vmem:[%s11357_s8 + $0x30] sm:$0xff] }
 0x52c   : > { %v8506_v62 = vrot.slane %v2095_v57, 4  ;;  %10528 = vmatmul.mubr.msk.f32.vlgmr.msra.gmra.mrb[16].mxu0 %vm2099_vm4, %v2095_v57  ;;  %v3293_v57 = vcombine.high %v3285_v43, %v3285_v43 }
 0x52d   : > { %v11142_v63 = vpop.eup %11141  ;;  %v8504_v0 = vrot.slane %v2094_v58, 5  ;;  %10523 = vmatmul.mubr.msk.f32.vlgmr.msra.gmra.mrb[12].mxu1 %vm2099_vm4, %v2094_v58  ;;  %10536 = vmatpush3.msra.mxu0 %v11607_v29 }
 0x52e   : > { %v11144_v25 = vpop.eup %11143  ;;  %v2097_v48 = vmul.f32 %v11142_v63, %v11671_v17  ;;  %10531 = vmatpush3.msra.mxu1 %v11595_v27  ;;  %10532 = vmatprep.mubr.msk.f32.mxu1 %vm11301_vm1, %v11302_v14 }
 0x52f   : > { %v8505_v1 = vsel %vm5383_vm7, %v8504_v0, %v8503_v23  ;;  %v2096_v53 = vmul.f32 %v11144_v25, %v11673_v18  ;;  %10537 = vmatprep.mubr.msk.f32.mxu0 %vm11301_vm1, %v11302_v14  ;;  %10540 = vmatprep.subr.mxu1 %v11302_v14  ;;  %v3335_v0 = vmul.f32 1e+30, %v3301_v52  ;;  %v3323_v25 = vcombine.high %v3301_v52, %v3301_v52 }
 0x530   : > { %v8510_v2 = vrot.slane %v2097_v48, 2  ;;  %v8507_v29 = vsel %vm5386_vm8, %v8506_v62, %v8505_v1  ;;  %10538 = vmatmul.mubr.msk.f32.vlgmr.msra.gmra.mrb[18].mxu0 %vm2099_vm4, %v2097_v48  ;;  %10545 = vmatprep.subr.mxu0 %v11302_v14  ;;  %v3292_v48 = vrot.slane %v3278_v54, %v11542_v59 }
 0x531   : > { %v8508_v27 = vrot.slane %v2096_v53, 3  ;;  %10533 = vmatmul.mubr.msk.f32.vlgmr.msra.gmra.mrb[14].mxu1 %vm2099_vm4, %v2096_v53  ;;  %10547 = vmatprep.mubr.msk.f32.mxu0 %vm11301_vm1, %v11302_v14  ;;  %v3315_v53 = vrot.slane %v3293_v57, %v11542_v59 }
 0x532   : > { %v11146_v5 = vpop.eup %11145  ;;  %10541 = vmatpush3.msra.mxu1 %v11619_v31  ;;  %10542 = vmatprep.mubr.msk.f32.mxu1 %vm11301_vm1, %v11302_v14  ;;  %v11730_v31 = vld [vmem:[%s11357_s8 + $0x10] sm:$0xff] }
 0x533   : > { %v8509_v61 = vsel %vm5389_vm9, %v8508_v27, %v8507_v29  ;;  %v2098_v7 = vmul.f32 %v11146_v5, %v11679_v35  ;;  %10550 = vmatprep.subr.mxu1 %v11302_v14 }
 0x534   : > { %10546 = vmatpush3.xpose.msk.msra.mxu0 %vm961_vm2, %v2684_v4  ;;  %v8511_v8 = vsel %vm5392_vm10, %v8510_v2, %v8509_v61 }
 0x535   : > { %v8512_v3 = vrot.slane %v2098_v7, 1  ;;  %10543 = vmatmul.mubr.msk.f32.vlgmr.msra.gmra.mrb[16].mxu1 %vm2099_vm4, %v2098_v7  ;;  %10555 = vmatprep.subr.mxu0 %v11302_v14  ;;  %v3337_v7 = vmul.f32 1e+30, %v3323_v25 }
 0x536   : > { %10552 = vmatprep.mubr.msk.f32.mxu1 %vm11301_vm1, %v11302_v14 }
 0x537   : > { %10548 = vmatmul.mubr.msk.f32.vlgmr.msra.gmra.mrb[20].mxu0 %vm961_vm2, %v11566_v22  ;;  %v11738_v10 = vsel %vm5395_vm11, %v8512_v3, %v8511_v8  ;;  %v3308_v8 = vrot.slane %v3292_v48, %v11542_v59 }
 0x538   : > { %10556 = vmatpush3.xpose.msk.msra.mxu0 %vm961_vm2, %v11730_v31  ;;  %10557 = vmatprep.mubr.msk.f32.mxu0 %vm11301_vm1, %v11302_v14 }
 0x539   : > { %10551 = vmatpush3.xpose.msk.msra.mxu1 %vm961_vm2, %v2685_v9  ;;  %10565 = vmatprep.subr.mxu0 %v11302_v14 }
 0x53a   : > { %10560 = vmatprep.subr.mxu1 %v11302_v14 }
 0x53b   : > { %10558 = vmatmul.mubr.msk.f32.vlgmr.msra.gmra.mrb[22].mxu0 %vm961_vm2, %v11585_v26 }
 0x53c   : > { %10553 = vmatmul.mubr.msk.f32.vlgmr.msra.gmra.mrb[18].mxu1 %vm961_vm2, %v11575_v24  ;;  %10566 = vmatpush3.xpose.msk.msra.mxu0 %vm961_vm2, %v11747_v11 }
 0x53d   : > { %10561 = vmatpush3.xpose.msk.msra.mxu1 %vm961_vm2, %v11751_v12  ;;  %10562 = vmatprep.mubr.msk.f32.mxu1 %vm11301_vm1, %v11302_v14 }
 0x53e   : > { %10567 = vmatprep.mubr.msk.f32.mxu0 %vm11301_vm1, %v11302_v14  ;;  %10570 = vmatprep.subr.mxu1 %v11302_v14 }
 0x53f   : > { %10568 = vmatmul.mubr.msk.f32.vlgmr.msra.gmra.mrb[24].mxu0 %vm961_vm2, %v11611_v30  ;;  %10575 = vmatprep.subr.mxu0 %v11302_v14 }
 0x540   : > { %10563 = vmatmul.mubr.msk.f32.vlgmr.msra.gmra.mrb[20].mxu1 %vm961_vm2, %v11599_v28  ;;  %10576 = vmatpush3.xpose.msk.msra.mxu0 %vm961_vm2, %v11764_v13 }
 0x541   : > { %10571 = vmatpush3.xpose.msk.msra.mxu1 %vm961_vm2, %v11770_v15  ;;  %10572 = vmatprep.mubr.msk.f32.mxu1 %vm11301_vm1, %v11302_v14 }
 0x542   : > { %10577 = vmatprep.mubr.msk.f32.mxu0 %vm11301_vm1, %v11302_v14  ;;  %10580 = vmatprep.subr.mxu1 %v11302_v14 }
 0x543   : > { %10578 = vmatmul.mubr.msk.f32.vlgmr.msra.gmra.mrb[26].mxu0 %vm961_vm2, %v11630_v33  ;;  %10585 = vmatprep.subr.mxu0 %v11302_v14 }
 0x544   : > { %10573 = vmatmul.mubr.msk.f32.vlgmr.msra.gmra.mrb[22].mxu1 %vm961_vm2, %v11623_v32  ;;  %10586 = vmatpush3.msra.mxu0 %v2684_v4 }
 0x545   : > { %10581 = vmatpush3.xpose.msk.msra.mxu1 %vm961_vm2, %v11787_v16  ;;  %10582 = vmatprep.mubr.msk.f32.mxu1 %vm11301_vm1, %v11302_v14 }
 0x546   : > { %10587 = vmatprep.mubr.msk.f32.mxu0 %vm11301_vm1, %v11302_v14  ;;  %10590 = vmatprep.subr.mxu1 %v11302_v14 }
 0x547   : > { %10595 = vmatprep.subr.mxu0 %v11302_v14 }
 0x548   : > { %10583 = vmatmul.mubr.msk.f32.vlgmr.msra.gmra.mrb[24].mxu1 %vm961_vm2, %v11639_v34 }
 0x549   : > { %10591 = vmatpush3.msra.mxu1 %v2685_v9  ;;  %10592 = vmatprep.mubr.msk.f32.mxu1 %vm11301_vm1, %v11302_v14  ;;  %v3336_v9 = vmul.f32 1e+30, %v3315_v53 }
 0x54a   : > { %10600 = vmatprep.subr.mxu1 %v11302_v14 }
 0x5f7   : > { %v2169_v17 = vpop.f32.mrb[12].mxu0 }
 0x5f8   : > { %v10509_v18 = vpop.f32.mrb[13].mxu0 }
 0x5f9   : > { %v2242_v19 = vpop.f32.mrb[10].mxu1  ;;  %v3294_v18 = vcombine.high %v3292_v48, %v3292_v48 }
 0x5fa   : > { %v8095_v20 = vrot.slane %v2242_v19, 7  ;;  %v10514_v35 = vpop.f32.mrb[11].mxu1 }
 0x5fb   : > { %v2315_v36 = vpop.f32.mrb[14].mxu0  ;;  %v3322_v43 = vrot.slane %v3294_v18, %v11542_v59 }
 0x5fc   : > { %v8096_v37 = vsel %vm5377_vm5, %v8095_v20, %v2169_v17  ;;  %v8097_v38 = vrot.slane %v2315_v36, 6  ;;  %v10519_v39 = vpop.f32.mrb[15].mxu0  ;;  %v3325_v17 = vcombine.high %v3315_v53, %v3315_v53 }
 0x5fd   : > { %v3324_v39 = vcombine.high %v3308_v8, %v3308_v8 }
 0x5fe   : > { %v8098_v41 = vsel %vm5380_vm6, %v8097_v38, %v8096_v37  ;;  %v3339_v38 = vmul.f32 1e+30, %v3308_v8 }
 0x5ff   : > { %v2461_v42 = vpop.f32.mrb[16].mxu0 }
 0x600   : > { %v2388_v44 = vpop.f32.mrb[12].mxu1  ;;  %v8101_v45 = vrot.slane %v2461_v42, 4  ;;  %v10529_v46 = vpop.f32.mrb[17].mxu0  ;;  %v3338_v42 = vmul.f32 1e+30, %v3325_v17 }
 0x601   : > { %v8099_v47 = vrot.slane %v2388_v44, 5  ;;  %v10524_v49 = vpop.f32.mrb[13].mxu1 }
 0x603   : > { %v8100_v50 = vsel %vm5383_vm7, %v8099_v47, %v8098_v41  ;;  %v2607_v51 = vpop.f32.mrb[18].mxu0 }
 0x604   : > { %v8102_v55 = vsel %vm5386_vm8, %v8101_v45, %v8100_v50  ;;  %v2534_v21 = vpop.f32.mrb[14].mxu1  ;;  %v8105_v56 = vrot.slane %v2607_v51, 2  ;;  %v10539_v23 = vpop.f32.mrb[19].mxu0  ;;  %v3341_v51 = vmul.f32 1e+30, %v3324_v39 }
 0x605   : > { %v8103_v58 = vrot.slane %v2534_v21, 3  ;;  %v10534_v62 = vpop.f32.mrb[15].mxu1  ;;  %v3326_v21 = vcombine.high %v3322_v43, %v3322_v43 }
 0x607   : > { %v8104_v63 = vsel %vm5389_vm9, %v8103_v58, %v8102_v55  ;;  %v3340_v55 = vmul.f32 1e+30, %v3322_v43  ;;  %v3342_v48 = vmul.f32 1e+30, %v3326_v21 }
 0x608   : > { %v2680_v1 = vpop.f32.mrb[16].mxu1  ;;  %v8106_v2 = vsel %vm5392_vm10, %v8105_v56, %v8104_v63 }
 0x609   : > { %v8107_v29 = vrot.slane %v2680_v1, 1  ;;  %v10544_v27 = vpop.f32.mrb[17].mxu1 }
 0x60a   : > { %v2762_v4 = vpop.f32.mrb[20].mxu0 }
 0x60b   : > { %v3343_v5 = vsub.f32 %v2762_v4, %v3335_v0  ;;  %v10549_v61 = vpop.f32.mrb[21].mxu0  ;;  %v11820_v3 = vsel %vm5395_vm11, %v8107_v29, %v8106_v2 }
 0x60d   : > { %v3351_v19 = vsel %vm2010_vm3, %v3343_v5, -inf }
 0x60e   : > { %3352 = vmax.xlane.f32.xlu1 %v3351_v19  ;;  %v2908_v20 = vpop.f32.mrb[22].mxu0 }
 0x60f   : > { %v2835_v35 = vpop.f32.mrb[18].mxu1  ;;  %v3345_v36 = vsub.f32 %v2908_v20, %v3337_v7  ;;  %v10559_v37 = vpop.f32.mrb[23].mxu0 }
 0x610   : > { %v3344_v40 = vsub.f32 %v2835_v35, %v3336_v9  ;;  %v10554_v41 = vpop.f32.mrb[19].mxu1 }
 0x611   : > { %v3357_v44 = vsel %vm2010_vm3, %v3345_v36, -inf }
 0x612   : > { %3358 = vmax.xlane.f32.xlu1 %v3357_v44  ;;  %v3054_v45 = vpop.f32.mrb[24].mxu0  ;;  %v3354_v46 = vsel %vm2010_vm3, %v3344_v40, -inf }
 0x613   : > { %v3347_v47 = vsub.f32 %v3054_v45, %v3339_v38  ;;  %3355 = vmax.xlane.f32.xlu0 %v3354_v46  ;;  %v2981_v49 = vpop.f32.mrb[20].mxu1  ;;  %v10569_v50 = vpop.f32.mrb[25].mxu0 }
 0x614   : > { %v3346_v52 = vsub.f32 %v2981_v49, %v3338_v42  ;;  %v10564_v54 = vpop.f32.mrb[21].mxu1 }
 0x615   : > { %v3363_v56 = vsel %vm2010_vm3, %v3347_v47, -inf }
 0x616   : > { %3364 = vmax.xlane.f32.xlu1 %v3363_v56  ;;  %v3200_v23 = vpop.f32.mrb[26].mxu0  ;;  %v3360_v57 = vsel %vm2010_vm3, %v3346_v52, -inf }
 0x617   : > { %v3349_v58 = vsub.f32 %v3200_v23, %v3341_v51  ;;  %3361 = vmax.xlane.f32.xlu0 %v3360_v57  ;;  %v3127_v62 = vpop.f32.mrb[22].mxu1  ;;  %v10579_v63 = vpop.f32.mrb[27].mxu0 }
 0x618   : > { %v3348_v0 = vsub.f32 %v3127_v62, %v3340_v55  ;;  %v10574_v25 = vpop.f32.mrb[23].mxu1 }
 0x619   : > { %v3369_v1 = vsel %vm2010_vm3, %v3349_v58, -inf }
 0x61a   : > { %3370 = vmax.xlane.f32.xlu1 %v3369_v1  ;;  %v3366_v53 = vsel %vm2010_vm3, %v3348_v0, -inf }
 0x61b   : > { %3367 = vmax.xlane.f32.xlu0 %v3366_v53  ;;  %v3273_v2 = vpop.f32.mrb[24].mxu1 }
 0x61c   : > { %v3350_v29 = vsub.f32 %v3273_v2, %v3342_v48  ;;  %v10584_v27 = vpop.f32.mrb[25].mxu1 }
 0x61e   : > { %v3372_v4 = vsel %vm2010_vm3, %v3350_v29, -inf }
 0x61f   : > { %3373 = vmax.xlane.f32.xlu0 %v3372_v4 }
 0x69b   : > { %v3353_v61 = vpop.xlane.xlu1 %3352 }
 0x69c   : > { %v3375_v7 = vsub.f32 %v3343_v5, %v3353_v61 }
 0x69e   : > { %v3383_v8 = vmul.f32 1.442695, %v3375_v7 }
 0x69f   : > { %v3359_v9 = vpop.xlane.xlu1 %3358 }
 0x6a0   : > { %11147 = vpow2.f32 %v3383_v8  ;;  %v3377_v17 = vsub.f32 %v3345_v36, %v3359_v9  ;;  %v3356_v18 = vpop.xlane.xlu0 %3355 }
 0x6a1   : > { %v3376_v19 = vsub.f32 %v3344_v40, %v3356_v18 }
 0x6a2   : > { %v3387_v20 = vmul.f32 1.442695, %v3377_v17 }
 0x6a3   : > { %v3385_v35 = vmul.f32 1.442695, %v3376_v19  ;;  %v3365_v37 = vpop.xlane.xlu1 %3364 }
 0x6a4   : > { %11149 = vpow2.f32 %v3387_v20  ;;  %v3379_v38 = vsub.f32 %v3347_v47, %v3365_v37  ;;  %v3362_v39 = vpop.xlane.xlu0 %3361 }
 0x6a5   : > { %11151 = vpow2.f32 %v3385_v35  ;;  %v3378_v41 = vsub.f32 %v3346_v52, %v3362_v39 }
 0x6a6   : > { %v3391_v42 = vmul.f32 1.442695, %v3379_v38 }
 0x6a7   : > { %v3389_v43 = vmul.f32 1.442695, %v3378_v41  ;;  %v3371_v44 = vpop.xlane.xlu1 %3370 }
 0x6a8   : > { %11153 = vpow2.f32 %v3391_v42  ;;  %v3381_v45 = vsub.f32 %v3349_v58, %v3371_v44  ;;  %v3368_v5 = vpop.xlane.xlu0 %3367 }
 0x6a9   : > { %11155 = vpow2.f32 %v3389_v43  ;;  %v3380_v46 = vsub.f32 %v3348_v0, %v3368_v5 }
 0x6aa   : > { %v11148_v49 = vpop.eup %11147  ;;  %v3395_v36 = vmul.f32 1.442695, %v3381_v45 }
 0x6ab   : > { %v3393_v50 = vmul.f32 1.442695, %v3380_v46  ;;  %v3399_v40 = vsel %vm2010_vm3, %v11148_v49, 0.0 }
 0x6ac   : > { %11157 = vpow2.f32 %v3395_v36  ;;  %v3374_v51 = vpop.xlane.xlu0 %3373  ;;  %3400 = vadd.xlane.f32.xlu1 %v3399_v40 }
 0x6ad   : > { %11159 = vpow2.f32 %v3393_v50  ;;  %v3382_v47 = vsub.f32 %v3350_v29, %v3374_v51 }
 0x6ae   : > { %v11150_v54 = vpop.eup %11149 }
 0x6af   : > { %v11152_v52 = vpop.eup %11151  ;;  %v3397_v55 = vmul.f32 1.442695, %v3382_v47  ;;  %v3405_v21 = vsel %vm2010_vm3, %v11150_v54, 0.0 }
 0x6b0   : > { %3406 = vadd.xlane.f32.xlu1 %v3405_v21  ;;  %v3402_v56 = vsel %vm2010_vm3, %v11152_v52, 0.0 }
 0x6b1   : > { %11161 = vpow2.f32 %v3397_v55  ;;  %3403 = vadd.xlane.f32.xlu0 %v3402_v56  ;;  %v4025_v56 = vld [vmem:[%s12579_s2 + $0x8] sm:$0xff] }
 0x6b2   : > { %v11154_v23 = vpop.eup %11153 }
 0x6b3   : > { %v11156_v57 = vpop.eup %11155  ;;  %v3411_v58 = vsel %vm2010_vm3, %v11154_v23, 0.0 }
 0x6b4   : > { %3412 = vadd.xlane.f32.xlu1 %v3411_v58  ;;  %v3408_v62 = vsel %vm2010_vm3, %v11156_v57, 0.0  ;;  %v11908_v58 = vld [vmem:[%s12579_s2 + $0x18] sm:$0xff] }
 0x6b5   : > { %3409 = vadd.xlane.f32.xlu0 %v3408_v62  ;;  %v11921_v62 = vld [vmem:[%s12579_s2 + $0x30] sm:$0xff] }
 0x6b6   : > { %v11158_v63 = vpop.eup %11157 }
 0x6b7   : > { %v11160_v0 = vpop.eup %11159  ;;  %v3417_v25 = vsel %vm2010_vm3, %v11158_v63, 0.0 }
 0x6b8   : > { %3418 = vadd.xlane.f32.xlu1 %v3417_v25  ;;  %v3414_v48 = vsel %vm2010_vm3, %v11160_v0, 0.0 }
 0x6b9   : > { %3415 = vadd.xlane.f32.xlu0 %v3414_v48 }
 0x6bb   : > { %v11838_v1 = vpop.eup %11161 }
 0x6bc   : > { %v3420_v53 = vsel %vm2010_vm3, %v11838_v1, 0.0 }
 0x6bd   : > { %3421 = vadd.xlane.f32.xlu0 %v3420_v53 }
 0x739   : > { %v3401_v2 = vpop.xlane.xlu1 %3400 }
 0x73a   : > { %11163 = vrcp.f32 %v3401_v2 }
 0x73d   : > { %v3407_v29 = vpop.xlane.xlu1 %3406 }
 0x73e   : > { %11165 = vrcp.f32 %v3407_v29  ;;  %v3404_v27 = vpop.xlane.xlu0 %3403 }
 0x73f   : > { %11167 = vrcp.f32 %v3404_v27  ;;  %v4032_v27 = vld [vmem:[%s12580_s10] sm:$0xff] }
 0x741   : > { %v3413_v4 = vpop.xlane.xlu1 %3412 }
 0x742   : > { %11169 = vrcp.f32 %v3413_v4  ;;  %v3410_v61 = vpop.xlane.xlu0 %3409 }
 0x743   : > { %11171 = vrcp.f32 %v3410_v61 }
 0x744   : > { %v11164_v7 = vpop.eup %11163 }
 0x745   : > { %v3431_v8 = vmul.f32 %v11164_v7, %v11148_v49  ;;  %v3419_v9 = vpop.xlane.xlu1 %3418 }
 0x746   : > { %11173 = vrcp.f32 %v3419_v9  ;;  %v3416_v17 = vpop.xlane.xlu0 %3415  ;;  %v4625_v9 = vrot.slane %v4032_v27, %v11542_v59 }
 0x747   : > { %11175 = vrcp.f32 %v3416_v17  ;;  %10588 = vmatmul.mubr.msk.f32.vlgmr.msra.gmra.mrb[28].mxu0 %vm2099_vm4, %v3431_v8 }
 0x748   : > { %v11166_v18 = vpop.eup %11165  ;;  %10596 = vmatpush3.msra.mxu0 %v11730_v31  ;;  %10597 = vmatprep.mubr.msk.f32.mxu0 %vm11301_vm1, %v11302_v14 }
 0x749   : > { %v11168_v19 = vpop.eup %11167  ;;  %v3433_v20 = vmul.f32 %v11166_v18, %v11150_v54  ;;  %10605 = vmatprep.subr.mxu0 %v11302_v14 }
 0x74a   : > { %v3432_v35 = vmul.f32 %v11168_v19, %v11152_v52  ;;  %v3422_v37 = vpop.xlane.xlu0 %3421 }
 0x74b   : > { %v9152_v38 = vrot.slane %v3433_v20, 6  ;;  %11177 = vrcp.f32 %v3422_v37  ;;  %10598 = vmatmul.mubr.msk.f32.vlgmr.msra.gmra.mrb[30].mxu0 %vm2099_vm4, %v3433_v20 }
 0x74c   : > { %v11170_v39 = vpop.eup %11169  ;;  %v9150_v41 = vrot.slane %v3432_v35, 7  ;;  %10593 = vmatmul.mubr.msk.f32.vlgmr.msra.gmra.mrb[26].mxu1 %vm2099_vm4, %v3432_v35  ;;  %10606 = vmatpush3.msra.mxu0 %v11747_v11 }
 0x74d   : > { %v11172_v31 = vpop.eup %11171  ;;  %v3435_v42 = vmul.f32 %v11170_v39, %v11154_v23  ;;  %10601 = vmatpush3.msra.mxu1 %v11751_v12  ;;  %10602 = vmatprep.mubr.msk.f32.mxu1 %vm11301_vm1, %v11302_v14 }
 0x74e   : > { %v9151_v43 = vsel %vm5377_vm5, %v9150_v41, %v3431_v8  ;;  %v3434_v44 = vmul.f32 %v11172_v31, %v11156_v57  ;;  %10607 = vmatprep.mubr.msk.f32.mxu0 %vm11301_vm1, %v11302_v14  ;;  %10615 = vmatprep.subr.mxu0 %v11302_v14  ;;  %v11904_v57 = vld [vmem:[%s12579_s2 + $0x20] sm:$0xff]  ;;  %v4641_v41 = vrot.slane %v4625_v9, %v11542_v59 }
 0x74f   : > { %v9156_v45 = vrot.slane %v3435_v42, 4  ;;  %v9153_v5 = vsel %vm5380_vm6, %v9152_v38, %v9151_v43  ;;  %10608 = vmatmul.mubr.msk.f32.vlgmr.msra.gmra.mrb[32].mxu0 %vm2099_vm4, %v3435_v42  ;;  %10610 = vmatprep.subr.mxu1 %v11302_v14  ;;  %v4618_v31 = vcombine.high %v4032_v27, %v4032_v27 }
 0x750   : > { %v11174_v11 = vpop.eup %11173  ;;  %v9154_v12 = vrot.slane %v3434_v44, 5  ;;  %10603 = vmatmul.mubr.msk.f32.vlgmr.msra.gmra.mrb[28].mxu1 %vm2099_vm4, %v3434_v44  ;;  %10616 = vmatpush3.msra.mxu0 %v11764_v13 }
 0x751   : > { %v11176_v46 = vpop.eup %11175  ;;  %v3437_v49 = vmul.f32 %v11174_v11, %v11158_v63  ;;  %10611 = vmatpush3.msra.mxu1 %v11770_v15  ;;  %10612 = vmatprep.mubr.msk.f32.mxu1 %vm11301_vm1, %v11302_v14  ;;  %v4024_v15 = vld [vmem:[%s12579_s2] sm:$0xff]  ;;  %v11927_v63 = vld [vmem:[%s12579_s2 + $0x28] sm:$0xff] }
 0x752   : > { %v9155_v36 = vsel %vm5383_vm7, %v9154_v12, %v9153_v5  ;;  %v3436_v50 = vmul.f32 %v11176_v46, %v11160_v0  ;;  %10617 = vmatprep.mubr.msk.f32.mxu0 %vm11301_vm1, %v11302_v14  ;;  %10620 = vmatprep.subr.mxu1 %v11302_v14  ;;  %v11944_v0 = vld [vmem:[%s12579_s2 + $0x38] sm:$0xff]  ;;  %v4633_v5 = vcombine.high %v4625_v9, %v4625_v9 }
 0x753   : > { %v9160_v40 = vrot.slane %v3437_v49, 2  ;;  %v9157_v51 = vsel %vm5386_vm8, %v9156_v45, %v9155_v36  ;;  %10618 = vmatmul.mubr.msk.f32.vlgmr.msra.gmra.mrb[34].mxu0 %vm2099_vm4, %v3437_v49  ;;  %10625 = vmatprep.subr.mxu0 %v11302_v14  ;;  %v4675_v49 = vmul.f32 1e+30, %v4641_v41  ;;  %v4663_v36 = vcombine.high %v4641_v41, %v4641_v41 }
 0x754   : > { %v9158_v13 = vrot.slane %v3436_v50, 3  ;;  %10613 = vmatmul.mubr.msk.f32.vlgmr.msra.gmra.mrb[30].mxu1 %vm2099_vm4, %v3436_v50  ;;  %10627 = vmatprep.mubr.msk.f32.mxu0 %vm11301_vm1, %v11302_v14  ;;  %v4632_v50 = vrot.slane %v4618_v31, %v11542_v59 }
 0x755   : > { %v11178_v47 = vpop.eup %11177  ;;  %10621 = vmatpush3.msra.mxu1 %v11787_v16  ;;  %10622 = vmatprep.mubr.msk.f32.mxu1 %vm11301_vm1, %v11302_v14  ;;  %v11887_v16 = vld [vmem:[%s12579_s2 + $0x10] sm:$0xff] }
 0x756   : > { %v9159_v54 = vsel %vm5389_vm9, %v9158_v13, %v9157_v51  ;;  %v3438_v52 = vmul.f32 %v11178_v47, %v11838_v1  ;;  %10630 = vmatprep.subr.mxu1 %v11302_v14  ;;  %v4655_v51 = vrot.slane %v4633_v5, %v11542_v59 }
 0x757   : > { %10626 = vmatpush3.xpose.msk.msra.mxu0 %vm961_vm2, %v4024_v15  ;;  %v9161_v55 = vsel %vm5392_vm10, %v9160_v40, %v9159_v54 }
 0x758   : > { %v9162_v21 = vrot.slane %v3438_v52, 1  ;;  %10623 = vmatmul.mubr.msk.f32.vlgmr.msra.gmra.mrb[32].mxu1 %vm2099_vm4, %v3438_v52  ;;  %10635 = vmatprep.subr.mxu0 %v11302_v14 }
 0x759   : > { %10632 = vmatprep.mubr.msk.f32.mxu1 %vm11301_vm1, %v11302_v14 }
 0x75a   : > { %10628 = vmatmul.mubr.msk.f32.vlgmr.msra.gmra.mrb[36].mxu0 %vm961_vm2, %v11566_v22  ;;  %v11895_v23 = vsel %vm5395_vm11, %v9162_v21, %v9161_v55  ;;  %v4677_v21 = vmul.f32 1e+30, %v4663_v36 }
 0x75b   : > { %10636 = vmatpush3.xpose.msk.msra.mxu0 %vm961_vm2, %v11887_v16  ;;  %10637 = vmatprep.mubr.msk.f32.mxu0 %vm11301_vm1, %v11302_v14 }
 0x75c   : > { %10631 = vmatpush3.xpose.msk.msra.mxu1 %vm961_vm2, %v4025_v56  ;;  %10645 = vmatprep.subr.mxu0 %v11302_v14 }
 0x75d   : > { %10640 = vmatprep.subr.mxu1 %v11302_v14 }
 0x75e   : > { %10638 = vmatmul.mubr.msk.f32.vlgmr.msra.gmra.mrb[38].mxu0 %vm961_vm2, %v11585_v26 }
 0x75f   : > { %10633 = vmatmul.mubr.msk.f32.vlgmr.msra.gmra.mrb[34].mxu1 %vm961_vm2, %v11575_v24  ;;  %10646 = vmatpush3.xpose.msk.msra.mxu0 %vm961_vm2, %v11904_v57 }
 0x760   : > { %10641 = vmatpush3.xpose.msk.msra.mxu1 %vm961_vm2, %v11908_v58  ;;  %10642 = vmatprep.mubr.msk.f32.mxu1 %vm11301_vm1, %v11302_v14 }
 0x761   : > { %10647 = vmatprep.mubr.msk.f32.mxu0 %vm11301_vm1, %v11302_v14  ;;  %10650 = vmatprep.subr.mxu1 %v11302_v14 }
 0x762   : > { %10648 = vmatmul.mubr.msk.f32.vlgmr.msra.gmra.mrb[40].mxu0 %vm961_vm2, %v11611_v30  ;;  %10655 = vmatprep.subr.mxu0 %v11302_v14 }
 0x763   : > { %10643 = vmatmul.mubr.msk.f32.vlgmr.msra.gmra.mrb[36].mxu1 %vm961_vm2, %v11599_v28  ;;  %10656 = vmatpush3.xpose.msk.msra.mxu0 %vm961_vm2, %v11921_v62 }
 0x764   : > { %10651 = vmatpush3.xpose.msk.msra.mxu1 %vm961_vm2, %v11927_v63  ;;  %10652 = vmatprep.mubr.msk.f32.mxu1 %vm11301_vm1, %v11302_v14 }
 0x765   : > { %10657 = vmatprep.mubr.msk.f32.mxu0 %vm11301_vm1, %v11302_v14  ;;  %10660 = vmatprep.subr.mxu1 %v11302_v14 }
 0x766   : > { %10658 = vmatmul.mubr.msk.f32.vlgmr.msra.gmra.mrb[42].mxu0 %vm961_vm2, %v11630_v33  ;;  %10665 = vmatprep.subr.mxu0 %v11302_v14 }
 0x767   : > { %10653 = vmatmul.mubr.msk.f32.vlgmr.msra.gmra.mrb[38].mxu1 %vm961_vm2, %v11623_v32  ;;  %10666 = vmatpush3.msra.mxu0 %v4024_v15 }
 0x768   : > { %10661 = vmatpush3.xpose.msk.msra.mxu1 %vm961_vm2, %v11944_v0  ;;  %10662 = vmatprep.mubr.msk.f32.mxu1 %vm11301_vm1, %v11302_v14 }
 0x769   : > { %10667 = vmatprep.mubr.msk.f32.mxu0 %vm11301_vm1, %v11302_v14  ;;  %10670 = vmatprep.subr.mxu1 %v11302_v14 }
 0x76a   : > { %10675 = vmatprep.subr.mxu0 %v11302_v14 }
 0x76b   : > { %10663 = vmatmul.mubr.msk.f32.vlgmr.msra.gmra.mrb[40].mxu1 %vm961_vm2, %v11639_v34 }
 0x76c   : > { %10671 = vmatpush3.msra.mxu1 %v4025_v56  ;;  %10672 = vmatprep.mubr.msk.f32.mxu1 %vm11301_vm1, %v11302_v14  ;;  %v4648_v56 = vrot.slane %v4632_v50, %v11542_v59 }
 0x76d   : > { %10680 = vmatprep.subr.mxu1 %v11302_v14 }
 0x81a   : > { %v3508_v25 = vpop.f32.mrb[28].mxu0 }
 0x81b   : > { %v10589_v48 = vpop.f32.mrb[29].mxu0 }
 0x81c   : > { %v4676_v48 = vmul.f32 1e+30, %v4655_v51 }
 0x81e   : > { %v3654_v1 = vpop.f32.mrb[30].mxu0 }
 0x81f   : > { %v3581_v53 = vpop.f32.mrb[26].mxu1  ;;  %v8142_v2 = vrot.slane %v3654_v1, 6  ;;  %v10599_v29 = vpop.f32.mrb[31].mxu0  ;;  %v4665_v1 = vcombine.high %v4655_v51, %v4655_v51 }
 0x820   : > { %v8140_v4 = vrot.slane %v3581_v53, 7  ;;  %v10594_v61 = vpop.f32.mrb[27].mxu1  ;;  %v4634_v53 = vcombine.high %v4632_v50, %v4632_v50 }
 0x822   : > { %v8141_v7 = vsel %vm5377_vm5, %v8140_v4, %v3508_v25  ;;  %v3800_v8 = vpop.f32.mrb[32].mxu0 }
 0x823   : > { %v8143_v17 = vsel %vm5380_vm6, %v8142_v2, %v8141_v7  ;;  %v3727_v18 = vpop.f32.mrb[28].mxu1  ;;  %v8146_v19 = vrot.slane %v3800_v8, 4  ;;  %v10609_v20 = vpop.f32.mrb[33].mxu0  ;;  %v4679_v7 = vmul.f32 1e+30, %v4648_v56  ;;  %v4664_v8 = vcombine.high %v4648_v56, %v4648_v56 }
 0x824   : > { %v8144_v35 = vrot.slane %v3727_v18, 5  ;;  %v10604_v37 = vpop.f32.mrb[29].mxu1  ;;  %v4678_v18 = vmul.f32 1e+30, %v4665_v1  ;;  %v11307_v56 = vmov 0  }
 0x825   : > { %v4681_v31 = vmul.f32 1e+30, %v4664_v8  ;;  %11101 = vset.pattern.permute.xlu1 %v11307_v56  ;;  %11104 = vset.pattern.permute.xlu0 %v11307_v56 }
 0x826   : > { %v8145_v38 = vsel %vm5383_vm7, %v8144_v35, %v8143_v17  ;;  %v3946_v39 = vpop.f32.mrb[34].mxu0 }
 0x827   : > { %v8147_v42 = vsel %vm5386_vm8, %v8146_v19, %v8145_v38  ;;  %v3873_v43 = vpop.f32.mrb[30].mxu1  ;;  %v8150_v44 = vrot.slane %v3946_v39, 2  ;;  %v10619_v45 = vpop.f32.mrb[35].mxu0  ;;  %v4662_v19 = vrot.slane %v4634_v53, %v11542_v59 }
 0x828   : > { %v8148_v11 = vrot.slane %v3873_v43, 3  ;;  %v10614_v12 = vpop.f32.mrb[31].mxu1 }
 0x829   : > { %v4666_v45 = vcombine.high %v4662_v19, %v4662_v19 }
 0x82a   : > { %v8149_v46 = vsel %vm5389_vm9, %v8148_v11, %v8147_v42 }
 0x82b   : > { %v4019_v40 = vpop.f32.mrb[32].mxu1  ;;  %v8151_v13 = vsel %vm5392_vm10, %v8150_v44, %v8149_v46  ;;  %v4680_v44 = vmul.f32 1e+30, %v4662_v19  ;;  %v4682_v51 = vmul.f32 1e+30, %v4666_v45 }
 0x82c   : > { %v8152_v15 = vrot.slane %v4019_v40, 1  ;;  %v10624_v47 = vpop.f32.mrb[33].mxu1 }
 0x82d   : > { %v4102_v54 = vpop.f32.mrb[36].mxu0 }
 0x82e   : > { %v4683_v52 = vsub.f32 %v4102_v54, %v4675_v49  ;;  %v10629_v55 = vpop.f32.mrb[37].mxu0  ;;  %v11977_v25 = vsel %vm5395_vm11, %v8152_v15, %v8151_v13 }
 0x830   : > { %v4691_v2 = vsel %vm2010_vm3, %v4683_v52, -inf }
 0x831   : > { %4692 = vmax.xlane.f32.xlu1 %v4691_v2  ;;  %v4248_v29 = vpop.f32.mrb[38].mxu0 }
 0x832   : > { %v4175_v27 = vpop.f32.mrb[34].mxu1  ;;  %v4685_v4 = vsub.f32 %v4248_v29, %v4677_v21  ;;  %v10639_v61 = vpop.f32.mrb[39].mxu0 }
 0x833   : > { %v4684_v9 = vsub.f32 %v4175_v27, %v4676_v48  ;;  %v10634_v17 = vpop.f32.mrb[35].mxu1 }
 0x834   : > { %v4697_v20 = vsel %vm2010_vm3, %v4685_v4, -inf }
 0x835   : > { %4698 = vmax.xlane.f32.xlu1 %v4697_v20  ;;  %v4394_v35 = vpop.f32.mrb[40].mxu0  ;;  %v4694_v37 = vsel %vm2010_vm3, %v4684_v9, -inf }
 0x836   : > { %v4687_v38 = vsub.f32 %v4394_v35, %v4679_v7  ;;  %4695 = vmax.xlane.f32.xlu0 %v4694_v37  ;;  %v4321_v39 = vpop.f32.mrb[36].mxu1  ;;  %v10649_v41 = vpop.f32.mrb[41].mxu0 }
 0x837   : > { %v4686_v42 = vsub.f32 %v4321_v39, %v4678_v18  ;;  %v10644_v43 = vpop.f32.mrb[37].mxu1 }
 0x838   : > { %v4703_v5 = vsel %vm2010_vm3, %v4687_v38, -inf }
 0x839   : > { %4704 = vmax.xlane.f32.xlu1 %v4703_v5  ;;  %v4540_v11 = vpop.f32.mrb[42].mxu0  ;;  %v4700_v12 = vsel %vm2010_vm3, %v4686_v42, -inf }
 0x83a   : > { %v4689_v46 = vsub.f32 %v4540_v11, %v4681_v31  ;;  %4701 = vmax.xlane.f32.xlu0 %v4700_v12  ;;  %v4467_v49 = vpop.f32.mrb[38].mxu1  ;;  %v10659_v36 = vpop.f32.mrb[43].mxu0 }
 0x83b   : > { %v4688_v50 = vsub.f32 %v4467_v49, %v4680_v44  ;;  %v10654_v40 = vpop.f32.mrb[39].mxu1 }
 0x83c   : > { %v4709_v13 = vsel %vm2010_vm3, %v4689_v46, -inf }
 0x83d   : > { %4710 = vmax.xlane.f32.xlu1 %v4709_v13  ;;  %v4706_v15 = vsel %vm2010_vm3, %v4688_v50, -inf }
 0x83e   : > { %4707 = vmax.xlane.f32.xlu0 %v4706_v15  ;;  %v4613_v47 = vpop.f32.mrb[40].mxu1 }
 0x83f   : > { %v4690_v54 = vsub.f32 %v4613_v47, %v4682_v51  ;;  %v10664_v55 = vpop.f32.mrb[41].mxu1 }
 0x841   : > { %v4712_v21 = vsel %vm2010_vm3, %v4690_v54, -inf }
 0x842   : > { %4713 = vmax.xlane.f32.xlu0 %v4712_v21  ;;  %v12005_v21 = vld [vmem:[%s12581_s11] sm:$0xff]  ;;  %s12584_s11 = sld [smem:[#allocation12_spill]] }
 0x8be   : > { %v4693_v48 = vpop.xlane.xlu1 %4692 }
 0x8bf   : > { %v4715_v1 = vsub.f32 %v4683_v52, %v4693_v48 }
 0x8c1   : > { %v4723_v53 = vmul.f32 1.442695, %v4715_v1 }
 0x8c2   : > { %v4699_v2 = vpop.xlane.xlu1 %4698 }
 0x8c3   : > { %11179 = vpow2.f32 %v4723_v53  ;;  %v4717_v29 = vsub.f32 %v4685_v4, %v4699_v2  ;;  %v4696_v27 = vpop.xlane.xlu0 %4695 }
 0x8c4   : > { %v4716_v61 = vsub.f32 %v4684_v9, %v4696_v27 }
 0x8c5   : > { %v4727_v7 = vmul.f32 1.442695, %v4717_v29 }
 0x8c6   : > { %v4725_v8 = vmul.f32 1.442695, %v4716_v61  ;;  %v4705_v17 = vpop.xlane.xlu1 %4704 }
 0x8c7   : > { %11181 = vpow2.f32 %v4727_v7  ;;  %v4719_v18 = vsub.f32 %v4687_v38, %v4705_v17  ;;  %v4702_v19 = vpop.xlane.xlu0 %4701 }
 0x8c8   : > { %11183 = vpow2.f32 %v4725_v8  ;;  %v4718_v20 = vsub.f32 %v4686_v42, %v4702_v19 }
 0x8c9   : > { %v4731_v35 = vmul.f32 1.442695, %v4719_v18 }
 0x8ca   : > { %v4729_v37 = vmul.f32 1.442695, %v4718_v20  ;;  %v4711_v39 = vpop.xlane.xlu1 %4710 }
 0x8cb   : > { %11185 = vpow2.f32 %v4731_v35  ;;  %v4721_v41 = vsub.f32 %v4689_v46, %v4711_v39  ;;  %v4708_v52 = vpop.xlane.xlu0 %4707 }
 0x8cc   : > { %11187 = vpow2.f32 %v4729_v37  ;;  %v4720_v31 = vsub.f32 %v4688_v50, %v4708_v52 }
 0x8cd   : > { %v11180_v43 = vpop.eup %11179  ;;  %v4735_v4 = vmul.f32 1.442695, %v4721_v41 }
 0x8ce   : > { %v4733_v44 = vmul.f32 1.442695, %v4720_v31  ;;  %v4739_v9 = vsel %vm2010_vm3, %v11180_v43, 0.0 }
 0x8cf   : > { %11189 = vpow2.f32 %v4735_v4  ;;  %v4714_v45 = vpop.xlane.xlu0 %4713  ;;  %4740 = vadd.xlane.f32.xlu1 %v4739_v9 }
 0x8d0   : > { %11191 = vpow2.f32 %v4733_v44  ;;  %v4722_v38 = vsub.f32 %v4690_v54, %v4714_v45 }
 0x8d1   : > { %v11182_v5 = vpop.eup %11181 }
 0x8d2   : > { %v11184_v42 = vpop.eup %11183  ;;  %v4737_v11 = vmul.f32 1.442695, %v4722_v38  ;;  %v4745_v12 = vsel %vm2010_vm3, %v11182_v5, 0.0  ;;  %v5466_v38 = vld [vmem:[%s12582_s0] sm:$0xff] }
 0x8d3   : > { %4746 = vadd.xlane.f32.xlu1 %v4745_v12  ;;  %v4742_v46 = vsel %vm2010_vm3, %v11184_v42, 0.0 }
 0x8d4   : > { %11193 = vpow2.f32 %v4737_v11  ;;  %4743 = vadd.xlane.f32.xlu0 %v4742_v46 }
 0x8d5   : > { %v11186_v49 = vpop.eup %11185 }
 0x8d6   : > { %v11188_v36 = vpop.eup %11187  ;;  %v4751_v50 = vsel %vm2010_vm3, %v11186_v49, 0.0 }
 0x8d7   : > { %4752 = vadd.xlane.f32.xlu1 %v4751_v50  ;;  %v4748_v40 = vsel %vm2010_vm3, %v11188_v36, 0.0 }
 0x8d8   : > { %4749 = vadd.xlane.f32.xlu0 %v4748_v40 }
 0x8d9   : > { %v11190_v51 = vpop.eup %11189 }
 0x8da   : > { %v11995_v13 = vpop.eup %11191  ;;  %v4757_v15 = vsel %vm2010_vm3, %v11190_v51, 0.0 }
 0x8db   : > { %4758 = vadd.xlane.f32.xlu1 %v4757_v15  ;;  %v4754_v47 = vsel %vm2010_vm3, %v11995_v13, 0.0 }
 0x8dc   : > { %4755 = vadd.xlane.f32.xlu0 %v4754_v47 }
 0x8de   : > { %v12000_v54 = vpop.eup %11193 }
 0x8df   : > { %v4760_v55 = vsel %vm2010_vm3, %v12000_v54, 0.0 }
 0x8e0   : > { %4761 = vadd.xlane.f32.xlu0 %v4760_v55 }
 0x8ec   : > { %5365 = vperm.xlu1 %11101, %v12005_v21  }
 0x95c   : > { %v4741_v48 = vpop.xlane.xlu1 %4740 }
 0x95d   : > { %11195 = vrcp.f32 %v4741_v48  ;;  %v5468_v48 = vld [vmem:[%s12582_s0 + $0x10] sm:$0xff] }
 0x960   : > { %v4747_v1 = vpop.xlane.xlu1 %4746 }
 0x961   : > { %11197 = vrcp.f32 %v4747_v1  ;;  %v4744_v53 = vpop.xlane.xlu0 %4743 }
 0x962   : > { %11199 = vrcp.f32 %v4744_v53 }
 0x964   : > { %v4753_v2 = vpop.xlane.xlu1 %4752 }
 0x965   : > { %11201 = vrcp.f32 %v4753_v2  ;;  %v4750_v29 = vpop.xlane.xlu0 %4749  ;;  %v5469_v2 = vld [vmem:[%s12582_s0 + $0x18] sm:$0xff] }
 0x966   : > { %11203 = vrcp.f32 %v4750_v29 }
 0x967   : > { %v11196_v27 = vpop.eup %11195 }
 0x968   : > { %v4771_v61 = vmul.f32 %v11196_v27, %v11180_v43  ;;  %v4759_v7 = vpop.xlane.xlu1 %4758  ;;  %v5470_v27 = vld [vmem:[%s12582_s0 + $0x20] sm:$0xff] }
 0x969   : > { %11205 = vrcp.f32 %v4759_v7  ;;  %v4756_v8 = vpop.xlane.xlu0 %4755 }
 0x96a   : > { %11207 = vrcp.f32 %v4756_v8  ;;  %10668 = vmatmul.mubr.msk.f32.vlgmr.msra.gmra.mrb[44].mxu0 %vm2099_vm4, %v4771_v61  ;;  %v5471_v8 = vld [vmem:[%s12582_s0 + $0x28] sm:$0xff] }
 0x96b   : > { %v11198_v17 = vpop.eup %11197  ;;  %10676 = vmatpush3.msra.mxu0 %v11887_v16  ;;  %10677 = vmatprep.mubr.msk.f32.mxu0 %vm11301_vm1, %v11302_v14 }
 0x96c   : > { %v11200_v18 = vpop.eup %11199  ;;  %v4773_v19 = vmul.f32 %v11198_v17, %v11182_v5  ;;  %10685 = vmatprep.subr.mxu0 %v11302_v14 }
 0x96d   : > { %v4772_v20 = vmul.f32 %v11200_v18, %v11184_v42  ;;  %v4762_v35 = vpop.xlane.xlu0 %4761  ;;  %v5472_v18 = vld [vmem:[%s12582_s0 + $0x30] sm:$0xff] }
 0x96e   : > { %11209 = vrcp.f32 %v4762_v35  ;;  %10678 = vmatmul.mubr.msk.f32.vlgmr.msra.gmra.mrb[46].mxu0 %vm2099_vm4, %v4773_v19  ;;  %v5402_v16 = vrot.slane %v4773_v19, 6 }
 0x96f   : > { %v11202_v37 = vpop.eup %11201  ;;  %v5400_v39 = vrot.slane %v4772_v20, 7  ;;  %10673 = vmatmul.mubr.msk.f32.vlgmr.msra.gmra.mrb[42].mxu1 %vm2099_vm4, %v4772_v20  ;;  %10686 = vmatpush3.msra.mxu0 %v11904_v57  ;;  %v5473_v20 = vld [vmem:[%s12582_s0 + $0x38] sm:$0xff] }
 0x970   : > { %v11204_v41 = vpop.eup %11203  ;;  %v4775_v52 = vmul.f32 %v11202_v37, %v11186_v49  ;;  %10681 = vmatpush3.msra.mxu1 %v11908_v58  ;;  %10682 = vmatprep.mubr.msk.f32.mxu1 %vm11301_vm1, %v11302_v14 }
 0x971   : > { %v4774_v31 = vmul.f32 %v11204_v41, %v11188_v36  ;;  %10687 = vmatprep.mubr.msk.f32.mxu0 %vm11301_vm1, %v11302_v14  ;;  %10690 = vmatprep.subr.mxu1 %v11302_v14  ;;  %v5401_v43 = vsel %vm5377_vm5, %v5400_v39, %v4771_v61  ;;  %v5467_v36 = vld [vmem:[%s12582_s0 + $0x8] sm:$0xff]  ;;  %v10132_v39 = vld [vmem:[%s12579_s2 + $0x40] sm:$0xff] }
 0x972   : > { %10688 = vmatmul.mubr.msk.f32.vlgmr.msra.gmra.mrb[48].mxu0 %vm2099_vm4, %v4775_v52  ;;  %10695 = vmatprep.subr.mxu0 %v11302_v14  ;;  %v5406_v44 = vrot.slane %v4775_v52, 4  ;;  %v5403_v45 = vsel %vm5380_vm6, %v5402_v16, %v5401_v43  ;;  %v10133_v41 = vld [vmem:[%s12579_s2 + $0x48] sm:$0xff]  ;;  %v12107_v16 = vld [vmem:[%s12579_s2 + $0x50] sm:$0xff]  ;;  %v12114_v52 = vld [vmem:[%s12579_s2 + $0x58] sm:$0xff] }
 0x973   : > { %v11206_v57 = vpop.eup %11205  ;;  %v5404_v4 = vrot.slane %v4774_v31, 5  ;;  %10683 = vmatmul.mubr.msk.f32.vlgmr.msra.gmra.mrb[44].mxu1 %vm2099_vm4, %v4774_v31  ;;  %10696 = vmatpush3.msra.mxu0 %v11921_v62  ;;  %v12124_v31 = vld [vmem:[%s12579_s2 + $0x60] sm:$0xff] }
 0x974   : > { %v11208_v58 = vpop.eup %11207  ;;  %v4777_v9 = vmul.f32 %v11206_v57, %v11190_v51  ;;  %10691 = vmatpush3.msra.mxu1 %v11927_v63  ;;  %10692 = vmatprep.mubr.msk.f32.mxu1 %vm11301_vm1, %v11302_v14 }
 0x975   : > { %v4776_v5 = vmul.f32 %v11208_v58, %v11995_v13  ;;  %10697 = vmatprep.mubr.msk.f32.mxu0 %vm11301_vm1, %v11302_v14  ;;  %10700 = vmatprep.subr.mxu1 %v11302_v14  ;;  %v5405_v62 = vsel %vm5383_vm7, %v5404_v4, %v5403_v45 }
 0x976   : > { %10698 = vmatmul.mubr.msk.f32.vlgmr.msra.gmra.mrb[50].mxu0 %vm2099_vm4, %v4777_v9  ;;  %10705 = vmatprep.subr.mxu0 %v11302_v14  ;;  %v5410_v11 = vrot.slane %v4777_v9, 2  ;;  %v5407_v12 = vsel %vm5386_vm8, %v5406_v44, %v5405_v62 }
 0x977   : > { %10693 = vmatmul.mubr.msk.f32.vlgmr.msra.gmra.mrb[46].mxu1 %vm2099_vm4, %v4776_v5  ;;  %v5408_v63 = vrot.slane %v4776_v5, 3  ;;  %10706 = vmatpush3.msra.mxu0 %v5466_v38 }
 0x978   : > { %v11210_v42 = vpop.eup %11209  ;;  %10701 = vmatpush3.msra.mxu1 %v11944_v0  ;;  %10702 = vmatprep.mubr.msk.f32.mxu1 %vm11301_vm1, %v11302_v14  ;;  %v12052_v0 = vpop.permute.xlu1 %5365 }
 0x979   : > { %v4778_v46 = vmul.f32 %v11210_v42, %v12000_v54  ;;  %v5409_v49 = vsel %vm5389_vm9, %v5408_v63, %v5407_v12  ;;  %10707 = vmatprep.mubr.msk.f32.mxu0 %vm11301_vm1, %v11302_v14  ;;  %10710 = vmatprep.subr.mxu1 %v11302_v14 }
 0x97a   : > { %10715 = vmatprep.subr.mxu0 %v11302_v14  ;;  %v5411_v40 = vsel %vm5392_vm10, %v5410_v11, %v5409_v49 }
 0x97b   : > { %10703 = vmatmul.mubr.msk.f32.vlgmr.msra.gmra.mrb[48].mxu1 %vm2099_vm4, %v4778_v46  ;;  %v5412_v50 = vrot.slane %v4778_v46, 1 }
 0x97c   : > { %10711 = vmatpush3.msra.mxu1 %v5467_v36  ;;  %10712 = vmatprep.mubr.msk.f32.mxu1 %vm11301_vm1, %v11302_v14 }
 0x97d   : > { %v5413_v51 = vsel %vm5395_vm11, %v5412_v50, %v5411_v40  ;;  %10720 = vmatprep.subr.mxu1 %v11302_v14 }
 0x97e   : > { %v5415_v13 = vmul.f32 %v5413_v51, %v12052_v0 }
 0x980   : > { %v5417_v15 = vcombine.high %v5415_v13, %v5415_v13  ;;  %v5424_v47 = vrot.slane %v5415_v13, %v11542_v59 }
 0x982   : > { %v5432_v54 = vcombine.high %v5424_v47, %v5424_v47  ;;  %v5440_v55 = vrot.slane %v5424_v47, %v11542_v59  ;;  %v5431_v1 = vrot.slane %v5417_v15, %v11542_v59 }
 0x984   : > { %v5454_v53 = vrot.slane %v5432_v54, %v11542_v59  ;;  %10708 = vmatmul.mubr.msk.f32.vlgmr.msra.gmra.mrb[52].mxu0 %vm2099_vm4, %v5440_v55  ;;  %v5462_v29 = vcombine.high %v5440_v55, %v5440_v55  ;;  %v5433_v61 = vcombine.high %v5431_v1, %v5431_v1  ;;  %v5447_v17 = vrot.slane %v5431_v1, %v11542_v59 }
 0x985   : > { %10716 = vmatpush3.msra.mxu0 %v5468_v48  ;;  %10717 = vmatprep.mubr.msk.f32.mxu0 %vm11301_vm1, %v11302_v14  ;;  %v10140_v48 = vld [vmem:[%s12580_s10 + $0x8] sm:$0xff] }
 0x986   : > { %10713 = vmatmul.mubr.msk.f32.vlgmr.msra.gmra.mrb[50].mxu1 %vm2099_vm4, %v5454_v53  ;;  %10725 = vmatprep.subr.mxu0 %v11302_v14  ;;  %v5464_v7 = vcombine.high %v5454_v53, %v5454_v53  ;;  %v5461_v19 = vrot.slane %v5433_v61, %v11542_v59  ;;  %v5463_v35 = vcombine.high %v5447_v17, %v5447_v17 }
 0x987   : > { %10721 = vmatpush3.msra.mxu1 %v5469_v2  ;;  %10722 = vmatprep.mubr.msk.f32.mxu1 %vm11301_vm1, %v11302_v14  ;;  %v6661_v1 = vrot.slane %v10140_v48, %v11542_v59 }
 0x988   : > { %10718 = vmatmul.mubr.msk.f32.vlgmr.msra.gmra.mrb[54].mxu0 %vm2099_vm4, %v5462_v29  ;;  %10730 = vmatprep.subr.mxu1 %v11302_v14  ;;  %v5465_v37 = vcombine.high %v5461_v19, %v5461_v19  ;;  %v6654_v29 = vcombine.high %v10140_v48, %v10140_v48 }
 0x989   : > { %10726 = vmatpush3.msra.mxu0 %v5470_v27  ;;  %10727 = vmatprep.mubr.msk.f32.mxu0 %vm11301_vm1, %v11302_v14  ;;  %v6669_v53 = vcombine.high %v6661_v1, %v6661_v1  ;;  %v6677_v2 = vrot.slane %v6661_v1, %v11542_v59 }
 0x98a   : > { %10723 = vmatmul.mubr.msk.f32.vlgmr.msra.gmra.mrb[52].mxu1 %vm2099_vm4, %v5464_v7  ;;  %10735 = vmatprep.subr.mxu0 %v11302_v14  ;;  %v6668_v7 = vrot.slane %v6654_v29, %v11542_v59 }
 0x98b   : > { %10731 = vmatpush3.msra.mxu1 %v5471_v8  ;;  %10732 = vmatprep.mubr.msk.f32.mxu1 %vm11301_vm1, %v11302_v14  ;;  %v6691_v27 = vrot.slane %v6669_v53, %v11542_v59  ;;  %v6711_v61 = vmul.f32 1e+30, %v6677_v2 }
 0x98c   : > { %10728 = vmatmul.mubr.msk.f32.vlgmr.msra.gmra.mrb[56].mxu0 %vm2099_vm4, %v5447_v17  ;;  %10740 = vmatprep.subr.mxu1 %v11302_v14  ;;  %v6699_v17 = vcombine.high %v6677_v2, %v6677_v2 }
 0x98d   : > { %10736 = vmatpush3.msra.mxu0 %v5472_v18  ;;  %10737 = vmatprep.mubr.msk.f32.mxu0 %vm11301_vm1, %v11302_v14  ;;  %v6712_v8 = vmul.f32 1e+30, %v6691_v27 }
 0x98e   : > { %10733 = vmatmul.mubr.msk.f32.vlgmr.msra.gmra.mrb[54].mxu1 %vm2099_vm4, %v5461_v19  ;;  %10745 = vmatprep.subr.mxu0 %v11302_v14 }
 0x98f   : > { %10741 = vmatpush3.msra.mxu1 %v5473_v20  ;;  %10742 = vmatprep.mubr.msk.f32.mxu1 %vm11301_vm1, %v11302_v14 }
 0x990   : > { %10738 = vmatmul.mubr.msk.f32.vlgmr.msra.gmra.mrb[58].mxu0 %vm2099_vm4, %v5463_v35  ;;  %10750 = vmatprep.subr.mxu1 %v11302_v14  ;;  %v6684_v35 = vrot.slane %v6668_v7, %v11542_v59 }
 0x991   : > { %10747 = vmatprep.mubr.msk.f32.mxu0 %vm11301_vm1, %v11302_v14 }
 0x992   : > { %10743 = vmatmul.mubr.msk.f32.vlgmr.msra.gmra.mrb[56].mxu1 %vm2099_vm4, %v5465_v37 }
 0x993   : > { %10752 = vmatprep.mubr.msk.f32.mxu1 %vm11301_vm1, %v11302_v14 }
 0x994   : > { %10746 = vmatpush3.xpose.msk.msra.mxu0 %vm961_vm2, %v10132_v39 }
 0x995   : > { %10755 = vmatprep.subr.mxu0 %v11302_v14 }
 0x996   : > { %10751 = vmatpush3.xpose.msk.msra.mxu1 %vm961_vm2, %v10133_v41 }
 0x997   : > { %10748 = vmatmul.mubr.msk.f32.vlgmr.msra.gmra.mrb[60].mxu0 %vm961_vm2, %v11566_v22  ;;  %10760 = vmatprep.subr.mxu1 %v11302_v14  ;;  %v12134_v22 = vld [vmem:[%s12579_s2 + $0x68] sm:$0xff] }
 0x998   : > { %10756 = vmatpush3.xpose.msk.msra.mxu0 %vm961_vm2, %v12107_v16  ;;  %10757 = vmatprep.mubr.msk.f32.mxu0 %vm11301_vm1, %v11302_v14 }
 0x999   : > { %10753 = vmatmul.mubr.msk.f32.vlgmr.msra.gmra.mrb[58].mxu1 %vm961_vm2, %v11575_v24  ;;  %10765 = vmatprep.subr.mxu0 %v11302_v14  ;;  %v12144_v24 = vld [vmem:[%s12579_s2 + $0x70] sm:$0xff] }
 0x99a   : > { %10761 = vmatpush3.xpose.msk.msra.mxu1 %vm961_vm2, %v12114_v52  ;;  %10762 = vmatprep.mubr.msk.f32.mxu1 %vm11301_vm1, %v11302_v14 }
 0x99b   : > { %10758 = vmatmul.mubr.msk.f32.vlgmr.msra.gmra.mrb[62].mxu0 %vm961_vm2, %v11585_v26  ;;  %10770 = vmatprep.subr.mxu1 %v11302_v14  ;;  %v12154_v26 = vld [vmem:[%s12579_s2 + $0x78] sm:$0xff] }
 0x99c   : > { %10766 = vmatpush3.xpose.msk.msra.mxu0 %vm961_vm2, %v12124_v31  ;;  %10767 = vmatprep.mubr.msk.f32.mxu0 %vm11301_vm1, %v11302_v14 }
 0x99d   : > { %10763 = vmatmul.mubr.msk.f32.vlgmr.msra.gmra.mrb[60].mxu1 %vm961_vm2, %v11599_v28  ;;  %10775 = vmatprep.subr.mxu0 %v11302_v14 }
 0x99e   : > { %10771 = vmatpush3.xpose.msk.msra.mxu1 %vm961_vm2, %v12134_v22  ;;  %10772 = vmatprep.mubr.msk.f32.mxu1 %vm11301_vm1, %v11302_v14 }
 0x99f   : > { %10768 = vmatmul.mubr.msk.f32.vlgmr.msra.gmra.mrb[64].mxu0 %vm961_vm2, %v11611_v30  ;;  %10780 = vmatprep.subr.mxu1 %v11302_v14 }
 0x9a0   : > { %10776 = vmatpush3.xpose.msk.msra.mxu0 %vm961_vm2, %v12144_v24  ;;  %10777 = vmatprep.mubr.msk.f32.mxu0 %vm11301_vm1, %v11302_v14 }
 0x9a1   : > { %10773 = vmatmul.mubr.msk.f32.vlgmr.msra.gmra.mrb[62].mxu1 %vm961_vm2, %v11623_v32  ;;  %10785 = vmatprep.subr.mxu0 %v11302_v14 }
 0x9a2   : > { %10781 = vmatpush3.xpose.msk.msra.mxu1 %vm961_vm2, %v12154_v26  ;;  %10782 = vmatprep.mubr.msk.f32.mxu1 %vm11301_vm1, %v11302_v14 }
 0x9a3   : > { %10778 = vmatmul.mubr.msk.f32.vlgmr.msra.gmra.mrb[66].mxu0 %vm961_vm2, %v11630_v33  ;;  %10790 = vmatprep.subr.mxu1 %v11302_v14 }
 0x9a4   : > { %10786 = vmatpush3.msra.mxu0 %v10132_v39  ;;  %10787 = vmatprep.mubr.msk.f32.mxu0 %vm11301_vm1, %v11302_v14  ;;  %v6670_v39 = vcombine.high %v6668_v7, %v6668_v7 }
 0x9a5   : > { %10783 = vmatmul.mubr.msk.f32.vlgmr.msra.gmra.mrb[64].mxu1 %vm961_vm2, %v11639_v34  ;;  %10795 = vmatprep.subr.mxu0 %v11302_v14 }
 0x9a6   : > { %10791 = vmatpush3.msra.mxu1 %v10133_v41  ;;  %10792 = vmatprep.mubr.msk.f32.mxu1 %vm11301_vm1, %v11302_v14 }
 0x9a7   : > { %10800 = vmatprep.subr.mxu1 %v11302_v14 }
 0xa3d   : > { %v4848_v28 = vpop.f32.mrb[44].mxu0 }
 0xa3e   : > { %v10669_v30 = vpop.f32.mrb[45].mxu0 }
 0xa41   : > { %v4994_v32 = vpop.f32.mrb[46].mxu0 }
 0xa42   : > { %v4921_v33 = vpop.f32.mrb[42].mxu1  ;;  %v5379_v43 = vrot.slane %v4994_v32, 6  ;;  %v10679_v57 = vpop.f32.mrb[47].mxu0  ;;  %v6713_v32 = vmul.f32 1e+30, %v6699_v17 }
 0xa43   : > { %v5376_v4 = vrot.slane %v4921_v33, 7  ;;  %v10674_v58 = vpop.f32.mrb[43].mxu1  ;;  %v6701_v33 = vcombine.high %v6691_v27, %v6691_v27 }
 0xa45   : > { %v5378_v44 = vsel %vm5377_vm5, %v5376_v4, %v4848_v28  ;;  %v5140_v9 = vpop.f32.mrb[48].mxu0  ;;  %v6715_v4 = vmul.f32 1e+30, %v6684_v35 }
 0xa46   : > { %v5381_v34 = vsel %vm5380_vm6, %v5379_v43, %v5378_v44  ;;  %v5067_v45 = vpop.f32.mrb[44].mxu1  ;;  %v5385_v38 = vrot.slane %v5140_v9, 4  ;;  %v10689_v5 = vpop.f32.mrb[49].mxu0  ;;  %v6698_v44 = vrot.slane %v6670_v39, %v11542_v59 }
 0xa47   : > { %v5382_v62 = vrot.slane %v5067_v45, 5  ;;  %v10684_v63 = vpop.f32.mrb[45].mxu1 }
 0xa49   : > { %v5384_v42 = vsel %vm5383_vm7, %v5382_v62, %v5381_v34  ;;  %v5286_v11 = vpop.f32.mrb[50].mxu0  ;;  %v6714_v34 = vmul.f32 1e+30, %v6701_v33 }
 0xa4a   : > { %v5387_v12 = vsel %vm5386_vm8, %v5385_v38, %v5384_v42  ;;  %v5213_v46 = vpop.f32.mrb[46].mxu1  ;;  %v5391_v49 = vrot.slane %v5286_v11, 2  ;;  %v10699_v36 = vpop.f32.mrb[51].mxu0  ;;  %v6716_v11 = vmul.f32 1e+30, %v6698_v44 }
 0xa4b   : > { %v5388_v50 = vrot.slane %v5213_v46, 3  ;;  %v10694_v40 = vpop.f32.mrb[47].mxu1  ;;  %v6700_v36 = vcombine.high %v6684_v35, %v6684_v35 }
 0xa4d   : > { %v5390_v51 = vsel %vm5389_vm9, %v5388_v50, %v5387_v12 }
 0xa4e   : > { %v5393_v13 = vsel %vm5392_vm10, %v5391_v49, %v5390_v51  ;;  %v5359_v15 = vpop.f32.mrb[48].mxu1 }
 0xa4f   : > { %v5394_v47 = vrot.slane %v5359_v15, 1  ;;  %v10704_v54 = vpop.f32.mrb[49].mxu1 }
 0xa50   : > { %v6702_v54 = vcombine.high %v6698_v44, %v6698_v44 }
 0xa51   : > { %v12185_v55 = vsel %vm5395_vm11, %v5394_v47, %v5393_v13  ;;  %v6717_v47 = vmul.f32 1e+30, %v6700_v36 }
 0xa52   : > { %v6718_v2 = vmul.f32 1e+30, %v6702_v54 }
 0xa6a   : > { %v6138_v18 = vpop.f32.mrb[60].mxu0 }
 0xa6b   : > { %v6719_v19 = vsub.f32 %v6138_v18, %v6711_v61  ;;  %v10749_v20 = vpop.f32.mrb[61].mxu0 }
 0xa6c   : > { %v6211_v37 = vpop.f32.mrb[58].mxu1 }
 0xa6d   : > { %v6720_v41 = vsub.f32 %v6211_v37, %v6712_v8  ;;  %v10754_v28 = vpop.f32.mrb[59].mxu1  ;;  %v6727_v30 = vsel %vm2010_vm3, %v6719_v19, -inf  ;;  %v11308_v8 = vmov 1  }
 0xa6e   : > { %6728 = vmax.xlane.f32.xlu0 %v6727_v30  ;;  %v6284_v43 = vpop.f32.mrb[62].mxu0  ;;  %11102 = vset.pattern.permute.xlu1 %v11308_v8 }
 0xa6f   : > { %v10759_v57 = vpop.f32.mrb[63].mxu0  ;;  %v6721_v9 = vsub.f32 %v6284_v43, %v6713_v32  ;;  %v6730_v38 = vsel %vm2010_vm3, %v6720_v41, -inf }
 0xa70   : > { %v6357_v58 = vpop.f32.mrb[60].mxu1 }
 0xa71   : > { %v10764_v45 = vpop.f32.mrb[61].mxu1  ;;  %v6722_v12 = vsub.f32 %v6357_v58, %v6714_v34  ;;  %v6733_v50 = vsel %vm2010_vm3, %v6721_v9, -inf }
 0xa72   : > { %v6430_v5 = vpop.f32.mrb[64].mxu0  ;;  %6731 = vmax.xlane.f32.xlu0 %v6730_v38 }
 0xa73   : > { %v6723_v62 = vsub.f32 %v6430_v5, %v6715_v4  ;;  %v10769_v63 = vpop.f32.mrb[65].mxu0  ;;  %v6736_v1 = vsel %vm2010_vm3, %v6722_v12, -inf }
 0xa74   : > { %v6503_v42 = vpop.f32.mrb[62].mxu1 }
 0xa75   : > { %v10774_v46 = vpop.f32.mrb[63].mxu1  ;;  %v6739_v49 = vsel %vm2010_vm3, %v6723_v62, -inf  ;;  %v6724_v15 = vsub.f32 %v6503_v42, %v6716_v11 }
 0xa76   : > { %6740 = vmax.xlane.f32.xlu1 %v6739_v49  ;;  %v6576_v40 = vpop.f32.mrb[66].mxu0  ;;  %6734 = vmax.xlane.f32.xlu0 %v6733_v50 }
 0xa77   : > { %v10779_v51 = vpop.f32.mrb[67].mxu0  ;;  %v6725_v53 = vsub.f32 %v6576_v40, %v6717_v47  ;;  %v6742_v29 = vsel %vm2010_vm3, %v6724_v15, -inf }
 0xa78   : > { %v6649_v13 = vpop.f32.mrb[64].mxu1 }
 0xa79   : > { %v10784_v48 = vpop.f32.mrb[65].mxu1  ;;  %v6726_v27 = vsub.f32 %v6649_v13, %v6718_v2  ;;  %v6745_v61 = vsel %vm2010_vm3, %v6725_v53, -inf }
 0xa7a   : > { %6737 = vmax.xlane.f32.xlu0 %v6736_v1 }
 0xa7b   : > { %v6748_v7 = vsel %vm2010_vm3, %v6726_v27, -inf }
 0xa7e   : > { %6743 = vmax.xlane.f32.xlu0 %v6742_v29 }
 0xa82   : > { %6746 = vmax.xlane.f32.xlu0 %v6745_v61 }
 0xa86   : > { %6749 = vmax.xlane.f32.xlu0 %v6748_v7 }
 0xafb   : > { %v6729_v17 = vpop.xlane.xlu0 %6728 }
 0xafc   : > { %v6751_v18 = vsub.f32 %v6719_v19, %v6729_v17 }
 0xafe   : > { %v6759_v20 = vmul.f32 1.442695, %v6751_v18 }
 0xaff   : > { %v6732_v35 = vpop.xlane.xlu0 %6731 }
 0xb00   : > { %11211 = vpow2.f32 %v6759_v20  ;;  %v6752_v37 = vsub.f32 %v6720_v41, %v6732_v35 }
 0xb02   : > { %v6761_v39 = vmul.f32 1.442695, %v6752_v37 }
 0xb03   : > { %v6735_v28 = vpop.xlane.xlu0 %6734  ;;  %v6741_v30 = vpop.xlane.xlu1 %6740 }
 0xb04   : > { %11213 = vpow2.f32 %v6761_v39  ;;  %v6753_v32 = vsub.f32 %v6721_v9, %v6735_v28  ;;  %v6755_v43 = vsub.f32 %v6723_v62, %v6741_v30 }
 0xb06   : > { %v6763_v33 = vmul.f32 1.442695, %v6753_v32  ;;  %v6767_v34 = vmul.f32 1.442695, %v6755_v43 }
 0xb07   : > { %v6738_v57 = vpop.xlane.xlu0 %6737 }
 0xb08   : > { %v6754_v4 = vsub.f32 %v6722_v12, %v6738_v57  ;;  %11215 = vpow2.f32 %v6763_v33 }
 0xb0a   : > { %v11212_v58 = vpop.eup %11211  ;;  %v6765_v44 = vmul.f32 1.442695, %v6754_v4 }
 0xb0b   : > { %v6744_v45 = vpop.xlane.xlu0 %6743  ;;  %v6775_v19 = vsel %vm2010_vm3, %v11212_v58, 0.0 }
 0xb0c   : > { %11217 = vpow2.f32 %v6765_v44  ;;  %v6756_v38 = vsub.f32 %v6724_v15, %v6744_v45  ;;  %6776 = vadd.xlane.f32.xlu0 %v6775_v19 }
 0xb0d   : > { %11219 = vpow2.f32 %v6767_v34 }
 0xb0e   : > { %v11214_v41 = vpop.eup %11213  ;;  %v6769_v5 = vmul.f32 1.442695, %v6756_v38  ;;  %v10165_v38 = vld [vmem:[%s12582_s0 + $0x40] sm:$0xff] }
 0xb0f   : > { %v6747_v63 = vpop.xlane.xlu0 %6746  ;;  %v6778_v9 = vsel %vm2010_vm3, %v11214_v41, 0.0 }
 0xb10   : > { %v6757_v42 = vsub.f32 %v6725_v53, %v6747_v63  ;;  %6779 = vadd.xlane.f32.xlu0 %v6778_v9  ;;  %11221 = vpow2.f32 %v6769_v5 }
 0xb12   : > { %v6771_v62 = vmul.f32 1.442695, %v6757_v42  ;;  %v11216_v11 = vpop.eup %11215 }
 0xb13   : > { %v6750_v12 = vpop.xlane.xlu0 %6749  ;;  %v6781_v49 = vsel %vm2010_vm3, %v11216_v11, 0.0 }
 0xb14   : > { %11223 = vpow2.f32 %v6771_v62  ;;  %v6758_v46 = vsub.f32 %v6726_v27, %v6750_v12  ;;  %6782 = vadd.xlane.f32.xlu0 %v6781_v49 }
 0xb16   : > { %v11218_v36 = vpop.eup %11217  ;;  %v6773_v50 = vmul.f32 1.442695, %v6758_v46 }
 0xb17   : > { %v6784_v40 = vsel %vm2010_vm3, %v11218_v36, 0.0  ;;  %v11220_v51 = vpop.eup %11219 }
 0xb18   : > { %11225 = vpow2.f32 %v6773_v50  ;;  %6785 = vadd.xlane.f32.xlu0 %v6784_v40  ;;  %v6787_v13 = vsel %vm2010_vm3, %v11220_v51, 0.0 }
 0xb1a   : > { %v12207_v15 = vpop.eup %11221 }
 0xb1b   : > { %v6790_v48 = vsel %vm2010_vm3, %v12207_v15, 0.0 }
 0xb1c   : > { %6788 = vadd.xlane.f32.xlu0 %v6787_v13 }
 0xb1e   : > { %v11224_v47 = vpop.eup %11223 }
 0xb1f   : > { %v6793_v54 = vsel %vm2010_vm3, %v11224_v47, 0.0 }
 0xb20   : > { %6794 = vadd.xlane.f32.xlu1 %v6793_v54  ;;  %6791 = vadd.xlane.f32.xlu0 %v6790_v48  ;;  %v10168_v48 = vld [vmem:[%s12582_s0 + $0x58] sm:$0xff] }
 0xb22   : > { %v12212_v1 = vpop.eup %11225 }
 0xb23   : > { %v6796_v53 = vsel %vm2010_vm3, %v12212_v1, 0.0 }
 0xb24   : > { %6797 = vadd.xlane.f32.xlu0 %v6796_v53  ;;  %v10169_v53 = vld [vmem:[%s12582_s0 + $0x60] sm:$0xff] }
 0xb31   : > { %7400 = vperm.xlu1 %11102, %v12005_v21  }
 0xb35   : > { %11103 = vset.pattern.permute.xlu1 %v11307_v56 }
 0xb3a   : > { %8109 = vrot.lane.b32.xlu0 %v11820_v3, %s12566_s28 }
 0xb99   : > { %v6777_v2 = vpop.xlane.xlu0 %6776 }
 0xb9a   : > { %11227 = vrcp.f32 %v6777_v2 }
 0xb9d   : > { %v6780_v29 = vpop.xlane.xlu0 %6779 }
 0xb9e   : > { %11229 = vrcp.f32 %v6780_v29 }
 0xba1   : > { %v6783_v27 = vpop.xlane.xlu0 %6782 }
 0xba2   : > { %11231 = vrcp.f32 %v6783_v27  ;;  %v10170_v27 = vld [vmem:[%s12582_s0 + $0x68] sm:$0xff] }
 0xba4   : > { %v11228_v61 = vpop.eup %11227 }
 0xba5   : > { %v6807_v7 = vmul.f32 %v11228_v61, %v11212_v58  ;;  %v6786_v8 = vpop.xlane.xlu0 %6785 }
 0xba6   : > { %11233 = vrcp.f32 %v6786_v8 }
 0xba7   : > { %10788 = vmatmul.mubr.msk.f32.vlgmr.msra.gmra.mrb[68].mxu0 %vm2099_vm4, %v6807_v7 }
 0xba8   : > { %v11230_v17 = vpop.eup %11229  ;;  %10796 = vmatpush3.msra.mxu0 %v12107_v16  ;;  %10797 = vmatprep.mubr.msk.f32.mxu0 %vm11301_vm1, %v11302_v14 }
 0xba9   : > { %v6808_v56 = vmul.f32 %v11230_v17, %v11214_v41  ;;  %10805 = vmatprep.subr.mxu0 %v11302_v14  ;;  %v6789_v21 = vpop.xlane.xlu0 %6788  ;;  %v10172_v17 = vld [vmem:[%s12582_s0 + $0x78] sm:$0xff] }
 0xbaa   : > { %11235 = vrcp.f32 %v6789_v21 }
 0xbab   : > { %10793 = vmatmul.mubr.msk.f32.vlgmr.msra.gmra.mrb[66].mxu1 %vm2099_vm4, %v6808_v56  ;;  %v7428_v30 = vrot.slane %v6808_v56, 7 }
 0xbac   : > { %10801 = vmatpush3.msra.mxu1 %v12114_v52  ;;  %10802 = vmatprep.mubr.msk.f32.mxu1 %vm11301_vm1, %v11302_v14  ;;  %v11232_v18 = vpop.eup %11231 }
 0xbad   : > { %v6795_v20 = vpop.xlane.xlu1 %6794  ;;  %10810 = vmatprep.subr.mxu1 %v11302_v14  ;;  %v6809_v16 = vmul.f32 %v11232_v18, %v11216_v11  ;;  %v6792_v35 = vpop.xlane.xlu0 %6791  ;;  %v7429_v45 = vsel %vm5377_vm5, %v7428_v30, %v6807_v7  ;;  %v10166_v11 = vld [vmem:[%s12582_s0 + $0x48] sm:$0xff]  ;;  %v10171_v7 = vld [vmem:[%s12582_s0 + $0x70] sm:$0xff] }
 0xbae   : > { %11237 = vrcp.f32 %v6795_v20 }
 0xbaf   : > { %11239 = vrcp.f32 %v6792_v35  ;;  %10798 = vmatmul.mubr.msk.f32.vlgmr.msra.gmra.mrb[70].mxu0 %vm2099_vm4, %v6809_v16 }
 0xbb0   : > { %v11234_v37 = vpop.eup %11233  ;;  %10806 = vmatpush3.msra.mxu0 %v12124_v31  ;;  %10807 = vmatprep.mubr.msk.f32.mxu0 %vm11301_vm1, %v11302_v14  ;;  %v7430_v31 = vrot.slane %v6809_v16, 6 }
 0xbb1   : > { %v6810_v52 = vmul.f32 %v11234_v37, %v11218_v36  ;;  %v6798_v39 = vpop.xlane.xlu0 %6797  ;;  %10815 = vmatprep.subr.mxu0 %v11302_v14 }
 0xbb2   : > { %11241 = vrcp.f32 %v6798_v39  ;;  %v7431_v19 = vsel %vm5380_vm6, %v7430_v31, %v7429_v45 }
 0xbb3   : > { %10803 = vmatmul.mubr.msk.f32.vlgmr.msra.gmra.mrb[68].mxu1 %vm2099_vm4, %v6810_v52  ;;  %v7432_v4 = vrot.slane %v6810_v52, 5 }
 0xbb4   : > { %v11236_v28 = vpop.eup %11235  ;;  %10811 = vmatpush3.msra.mxu1 %v12134_v22  ;;  %10812 = vmatprep.mubr.msk.f32.mxu1 %vm11301_vm1, %v11302_v14 }
 0xbb5   : > { %v6811_v32 = vmul.f32 %v11236_v28, %v11220_v51  ;;  %v8110_v33 = vpop.permute.xlu0 %8109  ;;  %10820 = vmatprep.subr.mxu1 %v11302_v14  ;;  %v7433_v41 = vsel %vm5383_vm7, %v7432_v4, %v7431_v19 }
 0xbb6   : > { %v8112_v43 = vmul.f32 %v8110_v33, %v11544_v60 }
 0xbb7   : > { %10808 = vmatmul.mubr.msk.f32.vlgmr.msra.gmra.mrb[72].mxu0 %vm2099_vm4, %v6811_v32  ;;  %v7434_v44 = vrot.slane %v6811_v32, 4 }
 0xbb8   : > { %v11238_v57 = vpop.eup %11237  ;;  %8114 = vrot.lane.b32.xlu0 %v8112_v43, %s11304_s1  ;;  %10816 = vmatpush3.msra.mxu0 %v12144_v24 }
 0xbb9   : > { %v11240_v58 = vpop.eup %11239  ;;  %v6813_v34 = vmul.f32 %v11238_v57, %v11224_v47  ;;  %10817 = vmatprep.mubr.msk.f32.mxu0 %vm11301_vm1, %v11302_v14  ;;  %10825 = vmatprep.subr.mxu0 %v11302_v14  ;;  %v7435_v9 = vsel %vm5386_vm8, %v7434_v44, %v7433_v41 }
 0xbba   : > { %v6812_v22 = vmul.f32 %v11240_v58, %v12207_v15  ;;  %v10167_v15 = vld [vmem:[%s12582_s0 + $0x50] sm:$0xff] }
 0xbbb   : > { %10818 = vmatmul.mubr.msk.f32.vlgmr.msra.gmra.mrb[74].mxu0 %vm2099_vm4, %v6813_v34  ;;  %v7438_v63 = vrot.slane %v6813_v34, 2 }
 0xbbc   : > { %10813 = vmatmul.mubr.msk.f32.vlgmr.msra.gmra.mrb[70].mxu1 %vm2099_vm4, %v6812_v22  ;;  %v7436_v24 = vrot.slane %v6812_v22, 3  ;;  %v11242_v5 = vpop.eup %11241  ;;  %10826 = vmatpush3.msra.mxu0 %v10165_v38 }
 0xbbd   : > { %10821 = vmatpush3.msra.mxu1 %v12154_v26  ;;  %10822 = vmatprep.mubr.msk.f32.mxu1 %vm11301_vm1, %v11302_v14  ;;  %v6814_v42 = vmul.f32 %v11242_v5, %v12212_v1  ;;  %v12266_v26 = vpop.permute.xlu1 %7400 }
 0xbbe   : > { %v7437_v62 = vsel %vm5389_vm9, %v7436_v24, %v7435_v9  ;;  %10827 = vmatprep.mubr.msk.f32.mxu0 %vm11301_vm1, %v11302_v14  ;;  %10830 = vmatprep.subr.mxu1 %v11302_v14 }
 0xbbf   : > { %10835 = vmatprep.subr.mxu0 %v11302_v14  ;;  %v7440_v12 = vrot.slane %v6814_v42, 1  ;;  %v7439_v46 = vsel %vm5392_vm10, %v7438_v63, %v7437_v62 }
 0xbc0   : > { %10823 = vmatmul.mubr.msk.f32.vlgmr.msra.gmra.mrb[72].mxu1 %vm2099_vm4, %v6814_v42 }
 0xbc1   : > { %10831 = vmatpush3.msra.mxu1 %v10166_v11  ;;  %10832 = vmatprep.mubr.msk.f32.mxu1 %vm11301_vm1, %v11302_v14  ;;  %v7441_v49 = vsel %vm5395_vm11, %v7440_v12, %v7439_v46  ;;  %v5398_v12 = vmul.f32 %v12185_v55, %v12052_v0 }
 0xbc2   : > { %10840 = vmatprep.subr.mxu1 %v11302_v14  ;;  %v7443_v36 = vmul.f32 %v7441_v49, %v12266_v26 }
 0xbc4   : > { %v7445_v50 = vcombine.high %v7443_v36, %v7443_v36  ;;  %v7452_v40 = vrot.slane %v7443_v36, %v11542_v59 }
 0xbc6   : > { %v7460_v51 = vcombine.high %v7452_v40, %v7452_v40  ;;  %v7468_v13 = vrot.slane %v7452_v40, %v11542_v59  ;;  %v7459_v47 = vrot.slane %v7445_v50, %v11542_v59 }
 0xbc8   : > { %v7482_v54 = vrot.slane %v7460_v51, %v11542_v59  ;;  %10828 = vmatmul.mubr.msk.f32.vlgmr.msra.gmra.mrb[52].mxu0 %vm2099_vm4, %v7468_v13  ;;  %v7490_v1 = vcombine.high %v7468_v13, %v7468_v13  ;;  %v7461_v2 = vcombine.high %v7459_v47, %v7459_v47  ;;  %v7475_v61 = vrot.slane %v7459_v47, %v11542_v59 }
 0xbc9   : > { %10836 = vmatpush3.msra.mxu0 %v10167_v15  ;;  %10837 = vmatprep.mubr.msk.f32.mxu0 %vm11301_vm1, %v11302_v14 }
 0xbca   : > { %10833 = vmatmul.mubr.msk.f32.vlgmr.msra.gmra.mrb[50].mxu1 %vm2099_vm4, %v7482_v54  ;;  %10845 = vmatprep.subr.mxu0 %v11302_v14  ;;  %v7492_v29 = vcombine.high %v7482_v54, %v7482_v54  ;;  %v7489_v8 = vrot.slane %v7461_v2, %v11542_v59  ;;  %v7491_v56 = vcombine.high %v7475_v61, %v7475_v61 }
 0xbcb   : > { %10841 = vmatpush3.msra.mxu1 %v10168_v48  ;;  %10842 = vmatprep.mubr.msk.f32.mxu1 %vm11301_vm1, %v11302_v14 }
 0xbcc   : > { %10838 = vmatmul.mubr.msk.f32.vlgmr.msra.gmra.mrb[54].mxu0 %vm2099_vm4, %v7490_v1  ;;  %10850 = vmatprep.subr.mxu1 %v11302_v14  ;;  %v7493_v21 = vcombine.high %v7489_v8, %v7489_v8 }
 0xbcd   : > { %10846 = vmatpush3.msra.mxu0 %v10169_v53  ;;  %10847 = vmatprep.mubr.msk.f32.mxu0 %vm11301_vm1, %v11302_v14 }
 0xbce   : > { %10843 = vmatmul.mubr.msk.f32.vlgmr.msra.gmra.mrb[52].mxu1 %vm2099_vm4, %v7492_v29  ;;  %10855 = vmatprep.subr.mxu0 %v11302_v14 }
 0xbcf   : > { %10851 = vmatpush3.msra.mxu1 %v10170_v27  ;;  %10852 = vmatprep.mubr.msk.f32.mxu1 %vm11301_vm1, %v11302_v14 }
 0xbd0   : > { %10848 = vmatmul.mubr.msk.f32.vlgmr.msra.gmra.mrb[56].mxu0 %vm2099_vm4, %v7475_v61  ;;  %10860 = vmatprep.subr.mxu1 %v11302_v14 }
 0xbd1   : > { %10856 = vmatpush3.msra.mxu0 %v10171_v7  ;;  %10857 = vmatprep.mubr.msk.f32.mxu0 %vm11301_vm1, %v11302_v14 }
 0xbd2   : > { %10853 = vmatmul.mubr.msk.f32.vlgmr.msra.gmra.mrb[54].mxu1 %vm2099_vm4, %v7489_v8  ;;  %10996 = vmatprep.subr.bf16.mxu0 %v11300_v6 }
 0xbd3   : > { %10861 = vmatpush3.msra.mxu1 %v10172_v17  ;;  %10862 = vmatprep.mubr.msk.f32.mxu1 %vm11301_vm1, %v11302_v14 }
 0xbd4   : > { %10858 = vmatmul.mubr.msk.f32.vlgmr.msra.gmra.mrb[58].mxu0 %vm2099_vm4, %v7491_v56  ;;  %11002 = vmatprep.subr.bf16.mxu1 %v11300_v6 }
 0xbd5   : > { %10873 = vmatprep.mubr.msk.f32.mxu0 %vm11301_vm1, %v11302_v14 }
 0xbd6   : > { %10863 = vmatmul.mubr.msk.f32.vlgmr.msra.gmra.mrb[56].mxu1 %vm2099_vm4, %v7493_v21 }
 0xbd7   : > { %10884 = vmatprep.mubr.msk.f32.mxu1 %vm11301_vm1, %v11302_v14 }
 0xc7a   : > { %v6884_v18 = vpop.f32.mrb[68].mxu0 }
 0xc7b   : > { %v10789_v20 = vpop.f32.mrb[69].mxu0 }
 0xc7e   : > { %v6957_v16 = vpop.f32.mrb[66].mxu1 }
 0xc7f   : > { %v7411_v35 = vrot.slane %v6957_v16, 7  ;;  %v10794_v37 = vpop.f32.mrb[67].mxu1 }
 0xc81   : > { %v7412_v52 = vsel %vm5377_vm5, %v7411_v35, %v6884_v18 }
 0xc82   : > { %v7030_v39 = vpop.f32.mrb[70].mxu0 }
 0xc83   : > { %v7413_v28 = vrot.slane %v7030_v39, 6  ;;  %v10799_v30 = vpop.f32.mrb[71].mxu0 }
 0xc85   : > { %v7414_v32 = vsel %vm5380_vm6, %v7413_v28, %v7412_v52 }
 0xc86   : > { %v7103_v33 = vpop.f32.mrb[68].mxu1 }
 0xc87   : > { %v7415_v31 = vrot.slane %v7103_v33, 5  ;;  %v10804_v43 = vpop.f32.mrb[69].mxu1 }
 0xc88   : > { %v8245_v43 = vld [vmem:[%s12583_s26 + $0x8] sm:$0xff] }
 0xc89   : > { %v7416_v57 = vsel %vm5383_vm7, %v7415_v31, %v7414_v32  ;;  %v8244_v31 = vld [vmem:[%s12583_s26] sm:$0xff] }
 0xc8a   : > { %v7176_v4 = vpop.f32.mrb[72].mxu0 }
 0xc8b   : > { %v7417_v58 = vrot.slane %v7176_v4, 4  ;;  %v10809_v44 = vpop.f32.mrb[73].mxu0  ;;  %v8115_v4 = vpop.permute.xlu0 %8114 }
 0xc8c   : > { %v8246_v44 = vld [vmem:[%s12583_s26 + $0x10] sm:$0xff] }
 0xc8d   : > { %v7418_v34 = vsel %vm5386_vm8, %v7417_v58, %v7416_v57  ;;  %v11003_v57 = vpack.c.bf16 %v8245_v43, %v8244_v31  ;;  %v8117_v58 = vsel %vm961_vm2, %v8115_v4, 0.0  ;;  %v11259_v31 = vld [vmem:[%s11483_s18] sm:$0xff]  ;;  %v8569_v4 = vld [vmem:[%s12586_s23 + $0x18] sm:$0xff]  ;;  %s12589_s18 = sld [smem:[#allocation10_spill]] }
 0xc8e   : > { %v7322_v45 = vpop.f32.mrb[74].mxu0 }
 0xc8f   : > { %v7249_v22 = vpop.f32.mrb[70].mxu1  ;;  %v7421_v38 = vrot.slane %v7322_v45, 2  ;;  %v10819_v24 = vpop.f32.mrb[75].mxu0  ;;  %11004 = vmatpush3.bf16.msra.mxu1 %v11003_v57 }
 0xc90   : > { %v7419_v19 = vrot.slane %v7249_v22, 3  ;;  %v10814_v41 = vpop.f32.mrb[71].mxu1  ;;  %11005 = vmatprep.subr.bf16.mxu1 %v11300_v6  ;;  %v10182_v24 = vld [vmem:[%s12584_s11] ss:$0 sm:$0xff]  ;;  %s12587_s11 = scalar_lea.vmem %s11322_s9, %s11479_s19 }
 0xc92   : > { %v7420_v5 = vsel %vm5389_vm9, %v7419_v19, %v7418_v34  ;;  %v8247_v34 = vld [vmem:[%s12583_s26 + $0x18] sm:$0xff] }
 0xc93   : > { %v7422_v63 = vsel %vm5392_vm10, %v7421_v38, %v7420_v5  ;;  %v7395_v9 = vpop.f32.mrb[72].mxu1  ;;  %v11006_v22 = vpack.c.bf16 %v8247_v34, %v8246_v44  ;;  %v8248_v5 = vld [vmem:[%s12585_s22] sm:$0xff]  ;;  %v8571_v34 = vld [vmem:[%s12586_s23 + $0x28] sm:$0xff] }
 0xc94   : > { %v7423_v42 = vrot.slane %v7395_v9, 1  ;;  %v10824_v62 = vpop.f32.mrb[73].mxu1 }
 0xc95   : > { %11007 = vmatpush3.bf16.msra.mxu1 %v11006_v22  ;;  %v8251_v62 = vld [vmem:[%s12585_s22 + $0x18] sm:$0xff] }
 0xc96   : > { %v7424_v11 = vsel %vm5395_vm11, %v7423_v42, %v7422_v63  ;;  %10898 = vmatprep.subr.mxu1 %v11302_v14  ;;  %v8249_v63 = vld [vmem:[%s12585_s22 + $0x8] sm:$0xff]  ;;  %v8250_v42 = vld [vmem:[%s12585_s22 + $0x10] sm:$0xff] }
 0xc97   : > { %v7426_v46 = vmul.f32 %v7424_v11, %v12266_v26  ;;  %v10997_v9 = vpack.c.bf16 %v8249_v63, %v8248_v5  ;;  %v11000_v11 = vpack.c.bf16 %v8251_v62, %v8250_v42 }
 0xc99   : > { %v12326_v49 = vadd.f32 %v7426_v46, %v5398_v12  ;;  %10998 = vmatpush3.bf16.msra.mxu0 %v10997_v9  ;;  %v8566_v46 = vld [vmem:[%s12586_s23] sm:$0xff]  ;;  %v9217_v9 = vld [vmem:[%s12589_s18 + $0x8] sm:$0xff] }
 0xc9a   : > { %10999 = vmatprep.subr.bf16.mxu0 %v11300_v6 }
 0xc9b   : > { %8121 = vrot.lane.b32.xlu1 %v12326_v49, %s12566_s28  ;;  %v7571_v36 = vpop.f32.mrb[52].mxu0 }
 0xc9c   : > { %v10829_v50 = vpop.f32.mrb[53].mxu0 }
 0xc9d   : > { %v7643_v40 = vpop.f32.mrb[50].mxu1  ;;  %11001 = vmatpush3.bf16.msra.mxu0 %v11000_v11  ;;  %v9219_v11 = vld [vmem:[%s12589_s18 + $0x18] sm:$0xff] }
 0xc9e   : > { %v9815_v51 = vrot.slane %v7643_v40, 7  ;;  %v10834_v13 = vpop.f32.mrb[51].mxu1  ;;  %11008 = vmatprep.subr.bf16.mxu0 %v11300_v6 }
 0xc9f   : > { %8154 = vrot.lane.b32.xlu1 %v11977_v25, %s12566_s28  ;;  %v7715_v15 = vpop.f32.mrb[54].mxu0 }
 0xca0   : > { %v9816_v47 = vsel %vm5377_vm5, %v9815_v51, %v7571_v36  ;;  %v9817_v54 = vrot.slane %v7715_v15, 6  ;;  %v10839_v0 = vpop.f32.mrb[55].mxu0 }
 0xca1   : > { %v7787_v55 = vpop.f32.mrb[52].mxu1 }
 0xca2   : > { %v9818_v26 = vsel %vm5380_vm6, %v9817_v54, %v9816_v47  ;;  %v9819_v48 = vrot.slane %v7787_v55, 5  ;;  %v10844_v1 = vpop.f32.mrb[53].mxu1  ;;  %v12372_v55 = vld [vmem:[%s12587_s11] sm:$0xff]  ;;  %s12591_s11 = sld [smem:[#allocation13_spill]] }
 0xca3   : > { %v7859_v53 = vpop.f32.mrb[56].mxu0 }
 0xca4   : > { %v9820_v2 = vsel %vm5383_vm7, %v9819_v48, %v9818_v26  ;;  %v9821_v29 = vrot.slane %v7859_v53, 4  ;;  %v10849_v27 = vpop.f32.mrb[57].mxu0 }
 0xca5   : > { %v7931_v61 = vpop.f32.mrb[54].mxu1 }
 0xca6   : > { %v9822_v7 = vsel %vm5386_vm8, %v9821_v29, %v9820_v2  ;;  %v9823_v8 = vrot.slane %v7931_v61, 3  ;;  %v10854_v17 = vpop.f32.mrb[55].mxu1  ;;  %v9901_v2 = vsub.f32 1.0, %v12372_v55 }
 0xca7   : > { %v8003_v56 = vpop.f32.mrb[58].mxu0 }
 0xca8   : > { %v9824_v21 = vsel %vm5389_vm9, %v9823_v8, %v9822_v7  ;;  %v9825_v18 = vrot.slane %v8003_v56, 2  ;;  %v10859_v20 = vpop.f32.mrb[59].mxu0 }
 0xca9   : > { %v8075_v16 = vpop.f32.mrb[56].mxu1 }
 0xcaa   : > { %v9826_v35 = vsel %vm5392_vm10, %v9825_v18, %v9824_v21  ;;  %v9827_v37 = vrot.slane %v8075_v16, 1  ;;  %v10864_v52 = vpop.f32.mrb[57].mxu1 }
 0xcac   : > { %v12339_v39 = vsel %vm5395_vm11, %v9827_v37, %v9826_v35 }
 0xd0d   : > { %v8122_v28 = vpop.permute.xlu1 %8121 }
 0xd0e   : > { %v8124_v30 = vmul.f32 %v8122_v28, %v11544_v60 }
 0xd10   : > { %8126 = vrot.lane.b32.xlu1 %v8124_v30, %s11304_s1 }
 0xd11   : > { %v8155_v32 = vpop.permute.xlu1 %8154 }
 0xd12   : > { %v8157_v33 = vmul.f32 %v8155_v32, %v11544_v60 }
 0xd14   : > { %8159 = vrot.lane.b32.xlu0 %v8157_v33, %s11304_s1 }
 0xd34   : > { %8118 = vadd.xlane.f32.xlu1 %v8117_v58 }
 0xd45   : > { %8325 = vrot.lane.b32.xlu1 %v11544_v60, %s11304_s1 }
 0xd82   : > { %v8127_v45 = vpop.permute.xlu1 %8126 }
 0xd83   : > { %v8129_v19 = vsel %vm961_vm2, %v8127_v45, 0.0 }
 0xd84   : > { %8130 = vadd.xlane.f32.xlu0 %v8129_v19 }
 0xd86   : > { %v8160_v38 = vpop.permute.xlu0 %8159 }
 0xd87   : > { %v8162_v41 = vsel %vm961_vm2, %v8160_v38, 0.0  ;;  %v8573_v38 = vld [vmem:[%s12586_s23 + $0x38] sm:$0xff] }
 0xd88   : > { %8163 = vadd.xlane.f32.xlu0 %v8162_v41 }
 0xd9e   : > { %8206 = vrot.lane.b32.xlu0 %v10182_v24, %s12566_s28  ;;  %s12588_s28 = sld [smem:[#allocation11_spill]]  ;;  %v9216_v24 = vld [vmem:[%s12589_s18] sm:$0xff] }
 0xda4   : > { %v10181_v52 = vld [vmem:[%s12588_s28] ss:$0 sm:$0xff]  ;;  %s12590_s28 = sld [smem:[#allocation16_spill]] }
 0xda5   : > { %v8196_v43 = vmul.f32 %v11259_v31, %v10181_v52 }
 0xdc1   : > { %v8119_v12 = vpop.xlane.xlu1 %8118 }
 0xdc5   : > { %v8326_v36 = vpop.permute.xlu1 %8325 }
 0xdc6   : > { %10885 = vmatmul.mubr.msk.f32.vlgmr.msra.gmra.mrb[74].mxu1 %vm961_vm2, %v8326_v36  ;;  %v9221_v36 = vld [vmem:[%s12589_s18 + $0x28] sm:$0xff] }
 0xdc7   : > { %10899 = vmatpush3.msra.mxu1 %v8566_v46  ;;  %10900 = vmatprep.mubr.msk.f32.mxu1 %vm11301_vm1, %v11302_v14 }
 0xdc8   : > { %10903 = vmatprep.subr.mxu1 %v11302_v14 }
 0xe11   : > { %v8131_v50 = vpop.xlane.xlu0 %8130 }
 0xe12   : > { %v8165_v40 = vmax.f32 %v8119_v12, %v8131_v50 }
 0xe15   : > { %v8164_v51 = vpop.xlane.xlu0 %8163 }
 0xe16   : > { %v8166_v13 = vmax.f32 %v8165_v40, %v8164_v51  ;;  %v8407_v40 = vld [vmem:[%s11445_s29] sm:$0xff] }
 0xe18   : > { %v8167_v15 = vsub.f32 %v8119_v12, %v8166_v13  ;;  %v8170_v47 = vsub.f32 %v8131_v50, %v8166_v13  ;;  %v8173_v54 = vsub.f32 %v8164_v51, %v8166_v13  ;;  %v8408_v51 = vld [vmem:[%s11445_s29 + $0x8] sm:$0xff] }
 0xe19   : > { %v8207_v0 = vpop.permute.xlu0 %8206  ;;  %v11009_v13 = vpack.c.bf16 %v8408_v51, %v8407_v40 }
 0xe1a   : > { %v8168_v26 = vmul.f32 1.442695, %v8167_v15  ;;  %v8171_v48 = vmul.f32 1.442695, %v8170_v47  ;;  %v8209_v1 = vmul.f32 %v8207_v0, %v11544_v60  ;;  %v8174_v53 = vmul.f32 1.442695, %v8173_v54 }
 0xe1b   : > { %v9223_v47 = vld [vmem:[%s12589_s18 + $0x38] sm:$0xff] }
 0xe1c   : > { %11243 = vpow2.f32 %v8168_v26  ;;  %8211 = vrot.lane.b32.xlu1 %v8209_v1, %s11304_s1  ;;  %v8409_v26 = vld [vmem:[%s11445_s29 + $0x10] sm:$0xff] }
 0xe1d   : > { %11245 = vpow2.f32 %v8171_v48  ;;  %v8410_v48 = vld [vmem:[%s11445_s29 + $0x18] sm:$0xff] }
 0xe1e   : > { %11247 = vpow2.f32 %v8174_v53  ;;  %v11012_v1 = vpack.c.bf16 %v8410_v48, %v8409_v26 }
 0xe20   : > { %9904 = vperm.xlu1 %11103, %v9901_v2  }
 0xe26   : > { %v11244_v29 = vpop.eup %11243 }
 0xe27   : > { %v11246_v27 = vpop.eup %11245 }
 0xe28   : > { %v8176_v61 = vadd.f32 %v11246_v27, %v11244_v29  ;;  %v11248_v7 = vpop.eup %11247 }
 0xe2a   : > { %v8177_v8 = vadd.f32 %v11248_v7, %v8176_v61 }
 0xe2c   : > { %11249 = vrcp.f32 %v8177_v8 }
 0xe36   : > { %v11250_v17 = vpop.eup %11249 }
 0xe37   : > { %v8181_v56 = vmul.f32 %v11250_v17, %v11248_v7  ;;  %v8179_v21 = vmul.f32 %v11250_v17, %v11244_v29  ;;  %v8180_v18 = vmul.f32 %v11250_v17, %v11246_v27  ;;  %v11260_v27 = vld [vmem:[#allocation3] sm:$0xff] }
 0xe39   : > { %v8183_v20 = vmul.f32 %v8179_v21, %v11820_v3  ;;  %v8184_v16 = vmul.f32 %v8180_v18, %v12326_v49  ;;  %v12380_v35 = vmul.f32 %v12339_v39, %v8180_v18  ;;  %v8515_v37 = vmul.f32 %v11738_v10, %v8179_v21  ;;  %v8567_v49 = vld [vmem:[%s12586_s23 + $0x8] sm:$0xff]  ;;  %v10188_v21 = vld [vmem:[%s12590_s28] ss:$0 sm:$0xff]  ;;  %s12592_s28 = smov 32  }
 0xe3a   : > { %v8187_v30 = vmul.f32 %v8181_v56, %v11977_v25  ;;  %v8197_v10 = vsel %vm961_vm2, %v8196_v43, 0.0  ;;  %v9165_v45 = vmul.f32 %v11895_v23, %v8181_v56  ;;  %v9218_v43 = vld [vmem:[%s12589_s18 + $0x10] sm:$0xff] }
 0xe3b   : > { %v8185_v28 = vadd.f32 %v8184_v16, %v8183_v20  ;;  %v8524_v32 = vrot.slane %v8515_v37, %v11542_v59  ;;  %v8517_v39 = vcombine.high %v8515_v37, %v8515_v37  ;;  %v8568_v37 = vld [vmem:[%s12586_s23 + $0x10] sm:$0xff]  ;;  %v9835_v48 = vrot.slane %v12380_v35, 4 }
 0xe3c   : > { %v9174_v5 = vrot.slane %v9165_v45, %v11542_v59  ;;  %v9167_v23 = vcombine.high %v9165_v45, %v9165_v45 }
 0xe3d   : > { %v12386_v33 = vadd.f32 %v8187_v30, %v8185_v28  ;;  %v12390_v3 = vrot.slane %v8524_v32, %v11542_v59  ;;  %v8532_v57 = vcombine.high %v8524_v32, %v8524_v32  ;;  %v12406_v58 = vrot.slane %v8517_v39, %v11542_v59  ;;  %v8570_v28 = vld [vmem:[%s12586_s23 + $0x20] sm:$0xff]  ;;  %v8572_v32 = vld [vmem:[%s12586_s23 + $0x30] sm:$0xff] }
 0xe3e   : > { %v12432_v63 = vrot.slane %v9174_v5, %v11542_v59  ;;  %v9182_v42 = vcombine.high %v9174_v5, %v9174_v5  ;;  %v12445_v12 = vrot.slane %v9167_v23, %v11542_v59  ;;  %v9836_v23 = vrot.slane %v12380_v35, 5 }
 0xe3f   : > { %10874 = vmatmul.mubr.msk.f32.vlgmr.msra.gmra.mrb[76].mxu0 %vm961_vm2, %v12386_v33  ;;  %10901 = vmatmul.mubr.msk.f32.vlgmr.msra.gmra.mrb[76].mxu1 %vm2099_vm4, %v12390_v3  ;;  %v8554_v25 = vrot.slane %v8532_v57, %v11542_v59  ;;  %v8533_v22 = vcombine.high %v12406_v58, %v12406_v58  ;;  %v8562_v52 = vcombine.high %v12390_v3, %v12390_v3 }
 0xe40   : > { %10895 = vmatprep.mubr.msk.f32.mxu0 %vm11301_vm1, %v11302_v14  ;;  %10904 = vmatpush3.msra.mxu1 %v8567_v49  ;;  %v9204_v62 = vrot.slane %v9182_v42, %v11542_v59  ;;  %v9183_v50 = vcombine.high %v12445_v12, %v12445_v12  ;;  %v8547_v30 = vrot.slane %v12406_v58, %v11542_v59  ;;  %v9220_v49 = vld [vmem:[%s12589_s18 + $0x20] sm:$0xff]  ;;  %v9832_v58 = vrot.slane %v12380_v35, 1 }
 0xe41   : > { %10905 = vmatprep.mubr.msk.f32.mxu1 %vm11301_vm1, %v11302_v14  ;;  %10913 = vmatprep.subr.mxu1 %v11302_v14  ;;  %v8564_v44 = vcombine.high %v8554_v25, %v8554_v25  ;;  %v8561_v19 = vrot.slane %v8533_v22, %v11542_v59  ;;  %v9212_v3 = vcombine.high %v12432_v63, %v12432_v63 }
 0xe42   : > { %v9214_v46 = vcombine.high %v9204_v62, %v9204_v62  ;;  %v9211_v15 = vrot.slane %v9183_v50, %v11542_v59  ;;  %11010 = vmatpush3.bf16.msra.mxu0 %v11009_v13  ;;  %v8563_v31 = vcombine.high %v8547_v30, %v8547_v30 }
 0xe43   : > { %10906 = vmatmul.mubr.msk.f32.vlgmr.msra.gmra.mrb[78].mxu1 %vm2099_vm4, %v8554_v25  ;;  %v8565_v41 = vcombine.high %v8561_v19, %v8561_v19  ;;  %11011 = vmatprep.subr.bf16.mxu0 %v11300_v6  ;;  %v9197_v25 = vrot.slane %v12445_v12, %v11542_v59  ;;  %v9834_v59 = vrot.slane %v12380_v35, 3 }
 0xe44   : > { %8198 = vadd.xlane.f32.xlu1 %v8197_v10  ;;  %10914 = vmatpush3.msra.mxu1 %v8569_v4  ;;  %v9215_v54 = vcombine.high %v9211_v15, %v9211_v15  ;;  %v9222_v4 = vld [vmem:[%s12589_s18 + $0x30] sm:$0xff] }
 0xe45   : > { %10915 = vmatprep.mubr.msk.f32.mxu1 %vm11301_vm1, %v11302_v14  ;;  %10923 = vmatprep.subr.mxu1 %v11302_v14  ;;  %v9213_v45 = vcombine.high %v9197_v25, %v9197_v25 }
 0xe46   : > { %11013 = vmatpush3.bf16.msra.mxu0 %v11012_v1 }
 0xe47   : > { %10916 = vmatmul.mubr.msk.f32.vlgmr.msra.gmra.mrb[80].mxu1 %vm2099_vm4, %v8564_v44  ;;  %10908 = vmatprep.subr.mxu0 %v11302_v14 }
 0xe48   : > { %10924 = vmatpush3.msra.mxu1 %v8571_v34  ;;  %10925 = vmatprep.mubr.msk.f32.mxu1 %vm11301_vm1, %v11302_v14 }
 0xe49   : > { %10933 = vmatprep.subr.mxu1 %v11302_v14 }
 0xe4b   : > { %10926 = vmatmul.mubr.msk.f32.vlgmr.msra.gmra.mrb[82].mxu1 %vm2099_vm4, %v8561_v19 }
 0xe4c   : > { %10934 = vmatpush3.msra.mxu1 %v8573_v38  ;;  %10935 = vmatprep.mubr.msk.f32.mxu1 %vm11301_vm1, %v11302_v14 }
 0xe4d   : > { %10938 = vmatprep.subr.mxu1 %v11302_v14 }
 0xe4f   : > { %10936 = vmatmul.mubr.msk.f32.vlgmr.msra.gmra.mrb[84].mxu1 %vm2099_vm4, %v8565_v41 }
 0xe50   : > { %10939 = vmatpush3.msra.mxu1 %v9216_v24  ;;  %10940 = vmatprep.mubr.msk.f32.mxu1 %vm11301_vm1, %v11302_v14 }
 0xe51   : > { %10943 = vmatprep.subr.mxu1 %v11302_v14 }
 0xe53   : > { %10941 = vmatmul.mubr.msk.f32.vlgmr.msra.gmra.mrb[76].mxu1 %vm2099_vm4, %v12432_v63 }
 0xe54   : > { %10944 = vmatpush3.msra.mxu1 %v9217_v9  ;;  %10945 = vmatprep.mubr.msk.f32.mxu1 %vm11301_vm1, %v11302_v14 }
 0xe55   : > { %9895 = vperm.xlu1 %11103, %v12372_v55   ;;  %10953 = vmatprep.subr.mxu1 %v11302_v14 }
 0xe57   : > { %10946 = vmatmul.mubr.msk.f32.vlgmr.msra.gmra.mrb[78].mxu1 %vm2099_vm4, %v9204_v62 }
 0xe58   : > { %10954 = vmatpush3.msra.mxu1 %v9219_v11  ;;  %10955 = vmatprep.mubr.msk.f32.mxu1 %vm11301_vm1, %v11302_v14 }
 0xe59   : > { %10963 = vmatprep.subr.mxu1 %v11302_v14 }
 0xe5b   : > { %10956 = vmatmul.mubr.msk.f32.vlgmr.msra.gmra.mrb[80].mxu1 %vm2099_vm4, %v9214_v46  ;;  %v10189_v46 = vld [vmem:[%s11450_s24] ss:$0 sm:$0xff] }
 0xe5c   : > { %10964 = vmatpush3.msra.mxu1 %v9221_v36  ;;  %10965 = vmatprep.mubr.msk.f32.mxu1 %vm11301_vm1, %v11302_v14  ;;  %v10183_v36 = vld [vmem:[%s12591_s11] ss:$0 sm:$0xff]  ;;  %s12593_s11 = scalar_lea.vmem %s11455_s30, %s11479_s19 }
 0xe5d   : > { %10973 = vmatprep.subr.mxu1 %v11302_v14  ;;  %v8225_v13 = vmul.f32 %v10183_v36, %v12386_v33 }
 0xe5f   : > { %10966 = vmatmul.mubr.msk.f32.vlgmr.msra.gmra.mrb[82].mxu1 %vm2099_vm4, %v9211_v15  ;;  %v8226_v15 = vsel %vm961_vm2, %v8225_v13, 0.0 }
 0xe60   : > { %10974 = vmatpush3.msra.mxu1 %v9223_v47  ;;  %10975 = vmatprep.mubr.msk.f32.mxu1 %vm11301_vm1, %v11302_v14  ;;  %v9833_v47 = vrot.slane %v12380_v35, 2 }
 0xe63   : > { %10976 = vmatmul.mubr.msk.f32.vlgmr.msra.gmra.mrb[84].mxu1 %vm2099_vm4, %v9215_v54 }
 0xe8e   : > { %v8212_v0 = vpop.permute.xlu1 %8211 }
 0xe8f   : > { %v8214_v55 = vsel %vm961_vm2, %v8212_v0, 0.0 }
 0xe90   : > { %8215 = vadd.xlane.f32.xlu0 %v8214_v55 }
 0xe99   : > { %v8395_v6 = vpop.f32.mrb[74].mxu1 }
 0xe9a   : > { %v10886_v53 = vpop.f32.mrb[75].mxu1 }
 0xe9f   : > { %v12471_v2 = vpop.permute.xlu1 %9904 }
 0xea0   : > { %v9919_v61 = vmul.f32 %v11260_v27, %v12471_v2 }
 0xed1   : > { %v12473_v29 = vpop.xlane.xlu1 %8198 }
 0xed5   : > { %v12476_v7 = vpop.permute.xlu1 %9895 }
 0xed6   : > { %v9918_v8 = vmul.f32 %v12476_v7, %v12386_v33 }
 0xed8   : > { %v9920_v17 = vadd.f32 %v9919_v61, %v9918_v8 }
 0xeda   : > { %9921 = vst.msk [vmem:[#allocation3] sm:$0xff] %vm961_vm2, %v9920_v17  ;;  %v9837_v17 = vrot.slane %v12380_v35, 6 }
 0xf12   : > { %v8321_v56 = vpop.f32.mrb[76].mxu0 }
 0xf13   : > { %v8396_v18 = vadd.f32 %v8395_v6, %v8321_v56  ;;  %v10875_v20 = vpop.f32.mrb[77].mxu0 }
 0xf15   : > { %v8406_v16 = vadd.f32 %v10188_v21, %v8396_v18  ;;  %v11261_v18 = vld [vmem:[#allocation2] sm:$0xff] }
 0xf16   : > { %v9907_v20 = vmul.f32 %v11261_v18, %v12471_v2 }
 0xf17   : > { %10896 = vmatmul.mubr.msk.f32.vlgmr.msra.gmra.mrb[78].mxu0 %vm961_vm2, %v8406_v16 }
 0xf18   : > { %10909 = vmatpush3.msra.mxu0 %v8568_v37  ;;  %10910 = vmatprep.mubr.msk.f32.mxu0 %vm11301_vm1, %v11302_v14 }
 0xf19   : > { %10918 = vmatprep.subr.mxu0 %v11302_v14 }
 0xf1b   : > { %10911 = vmatmul.mubr.msk.f32.vlgmr.msra.gmra.mrb[80].mxu0 %vm2099_vm4, %v8562_v52 }
 0xf1c   : > { %10919 = vmatpush3.msra.mxu0 %v8570_v28  ;;  %10920 = vmatprep.mubr.msk.f32.mxu0 %vm11301_vm1, %v11302_v14 }
 0xf1d   : > { %10928 = vmatprep.subr.mxu0 %v11302_v14 }
 0xf1f   : > { %10921 = vmatmul.mubr.msk.f32.vlgmr.msra.gmra.mrb[82].mxu0 %vm2099_vm4, %v8547_v30 }
 0xf20   : > { %10929 = vmatpush3.msra.mxu0 %v8572_v32  ;;  %10930 = vmatprep.mubr.msk.f32.mxu0 %vm11301_vm1, %v11302_v14 }
 0xf21   : > { %10948 = vmatprep.subr.mxu0 %v11302_v14 }
 0xf23   : > { %10931 = vmatmul.mubr.msk.f32.vlgmr.msra.gmra.mrb[84].mxu0 %vm2099_vm4, %v8563_v31 }
 0xf24   : > { %10949 = vmatpush3.msra.mxu0 %v9218_v43  ;;  %10950 = vmatprep.mubr.msk.f32.mxu0 %vm11301_vm1, %v11302_v14 }
 0xf25   : > { %10958 = vmatprep.subr.mxu0 %v11302_v14 }
 0xf26   : > { %v9292_v57 = vpop.f32.mrb[76].mxu1 }
 0xf27   : > { %10951 = vmatmul.mubr.msk.f32.vlgmr.msra.gmra.mrb[80].mxu0 %vm2099_vm4, %v9212_v3  ;;  %v11014_v39 = vadd.f32 %v12380_v35, %v9292_v57  ;;  %v10942_v10 = vpop.f32.mrb[77].mxu1 }
 0xf28   : > { %10959 = vmatpush3.msra.mxu0 %v9220_v49  ;;  %10960 = vmatprep.mubr.msk.f32.mxu0 %vm11301_vm1, %v11302_v14 }
 0xf29   : > { %10968 = vmatprep.subr.mxu0 %v11302_v14 }
 0xf2a   : > { %v9364_v44 = vpop.f32.mrb[78].mxu1 }
 0xf2b   : > { %10961 = vmatmul.mubr.msk.f32.vlgmr.msra.gmra.mrb[82].mxu0 %vm2099_vm4, %v9197_v25  ;;  %v11015_v34 = vadd.f32 %v9832_v58, %v9364_v44  ;;  %v10947_v22 = vpop.f32.mrb[79].mxu1 }
 0xf2c   : > { %10969 = vmatpush3.msra.mxu0 %v9222_v4  ;;  %10970 = vmatprep.mubr.msk.f32.mxu0 %vm11301_vm1, %v11302_v14  ;;  %v9838_v14 = vrot.slane %v12380_v35, 7  ;;  %v8216_v35 = vpop.xlane.xlu0 %8215 }
 0xf2d   : > { %v9876_v19 = vrot.slane %v11015_v34, 7  ;;  %v8217_v57 = vadd.f32 %v8216_v35, %v12473_v29  ;;  %v9900_v29 = vmul.f32 %v12476_v7, %v11544_v60 }
 0xf2e   : > { %v9508_v38 = vpop.f32.mrb[80].mxu1 }
 0xf2f   : > { %10971 = vmatmul.mubr.msk.f32.vlgmr.msra.gmra.mrb[84].mxu0 %vm2099_vm4, %v9213_v45  ;;  %v9877_v41 = vsel %vm5377_vm5, %v9876_v19, %v11014_v39  ;;  %v11017_v24 = vadd.f32 %v9834_v59, %v9508_v38  ;;  %v10957_v5 = vpop.f32.mrb[81].mxu1  ;;  %v10184_v39 = vld [vmem:[#allocation4] ss:$0 sm:$0xff] }
 0xf31   : > { %v9880_v1 = vrot.slane %v11017_v24, 5 }
 0xf32   : > { %v9652_v63 = vpop.f32.mrb[82].mxu1 }
 0xf33   : > { %v11019_v9 = vadd.f32 %v9836_v23, %v9652_v63  ;;  %v10967_v42 = vpop.f32.mrb[83].mxu1 }
 0xf35   : > { %v9884_v56 = vrot.slane %v11019_v9, 3 }
 0xf36   : > { %v9796_v62 = vpop.f32.mrb[84].mxu1 }
 0xf37   : > { %v11021_v11 = vadd.f32 %v9838_v14, %v9796_v62  ;;  %v10977_v12 = vpop.f32.mrb[85].mxu1 }
 0xf38   : > { %v9928_v12 = vld [vmem:[#allocation3] sm:$0xff] (!%p10207_p5) }
 0xf39   : > { %v9888_v32 = vrot.slane %v11021_v11, 1  ;;  %9929 = vst.msk [vmem:[%s11465_s16] sm:$0xff] (!%p10207_p5), %vm961_vm2, %v9928_v12 }
 0xfea   : > { %v8487_v50 = vpop.f32.mrb[78].mxu0 }
 0xfeb   : > { %v8488_v40 = vadd.f32 %v10189_v46, %v8487_v50  ;;  %v10897_v51 = vpop.f32.mrb[79].mxu0 }
 0xfed   : > { %8491 = vmax.xlane.f32.xlu0 %v8488_v40 }
 0xff1   : > { %8227 = vadd.xlane.f32.xlu0 %v8226_v15 }
 0xffa   : > { %v9436_v54 = vpop.f32.mrb[80].mxu0 }
 0xffb   : > { %v11016_v0 = vadd.f32 %v9833_v47, %v9436_v54  ;;  %v10952_v55 = vpop.f32.mrb[81].mxu0 }
 0xffd   : > { %v9878_v26 = vrot.slane %v11016_v0, 6 }
 0xffe   : > { %v9580_v6 = vpop.f32.mrb[82].mxu0 }
 0xfff   : > { %v9879_v53 = vsel %vm5380_vm6, %v9878_v26, %v9877_v41  ;;  %v11018_v27 = vadd.f32 %v9835_v48, %v9580_v6  ;;  %v10962_v61 = vpop.f32.mrb[83].mxu0 }
0x1000   : > { %v9881_v33 = vsel %vm5383_vm7, %v9880_v1, %v9879_v53 }
0x1001   : > { %v9882_v8 = vrot.slane %v11018_v27, 4 }
0x1002   : > { %v9724_v21 = vpop.f32.mrb[84].mxu0 }
0x1003   : > { %v9883_v16 = vsel %vm5386_vm8, %v9882_v8, %v9881_v33  ;;  %v11020_v37 = vadd.f32 %v9837_v17, %v9724_v21  ;;  %v10972_v52 = vpop.f32.mrb[85].mxu0 }
0x1004   : > { %v9885_v28 = vsel %vm5389_vm9, %v9884_v56, %v9883_v16 }
0x1005   : > { %v9886_v30 = vrot.slane %v11020_v37, 2 }
0x1007   : > { %9909 = vrot.lane.b32.xlu0 %v9907_v20, %s12592_s28  ;;  %v9887_v31 = vsel %vm5392_vm10, %v9886_v30, %v9885_v28 }
0x1008   : > { %v9889_v43 = vsel %vm5395_vm11, %v9888_v32, %v9887_v31 }
0x107a   : > { %v8492_v3 = vpop.xlane.xlu0 %8491 }
0x107b   : > { %v8493_v49 = vsub.f32 %v8488_v40, %v8492_v3 }
0x107d   : > { %v8494_v2 = vmul.f32 1.442695, %v8493_v49 }
0x107e   : > { %v8228_v10 = vpop.xlane.xlu0 %8227 }
0x107f   : > { %11251 = vpow2.f32 %v8494_v2  ;;  %v8229_v25 = vadd.f32 %v8228_v10, %v8217_v57 }
0x1081   : > { %v8237_v4 = vadd.f32 %v10184_v39, %v8229_v25 }
0x1082   : > { %v9910_v59 = vpop.permute.xlu0 %9909 }
0x1083   : > { %v10185_v58 = vmul.f32 -1.442695, %v8237_v4  ;;  %v9912_v38 = vadd.f32 %v9910_v59, %v9900_v29 }
0x1085   : > { %11253 = vpow2.f32 %v10185_v58 }
0x1089   : > { %v11252_v44 = vpop.eup %11251 }
0x108a   : > { %8496 = vadd.xlane.f32.xlu1 %v11252_v44 }
0x108f   : > { %v11254_v34 = vpop.eup %11253 }
0x1090   : > { %v8241_v22 = vadd.f32 1.0, %v11254_v34 }
0x1092   : > { %11255 = vrcp.f32 %v8241_v22 }
0x109c   : > { %v11256_v45 = vpop.eup %11255 }
0x109d   : > { %9802 = vperm.xlu0 %11104, %v11256_v45   ;;  %v9806_v19 = vsub.f32 1.0, %v11256_v45 }
0x10a1   : > { %9865 = vperm.xlu0 %11104, %v9806_v19  }
0x10a5   : > { %9914 = vrot.lane.b32.xlu0 %v9912_v38, %s11304_s1 }
0x1117   : > { %v8497_v41 = vpop.xlane.xlu1 %8496 }
0x1118   : > { %11257 = vrcp.f32 %v8497_v41 }
0x111c   : > { %v9803_v24 = vpop.permute.xlu0 %9802 }
0x1120   : > { %v9866_v5 = vpop.permute.xlu0 %9865 }
0x1121   : > { %v9891_v14 = vmul.f32 %v9889_v43, %v9866_v5 }
0x1122   : > { %v11258_v23 = vpop.eup %11257 }
0x1123   : > { %v8499_v63 = vmul.f32 %v11258_v23, %v11252_v44 }
0x1124   : > { %v9915_v9 = vpop.permute.xlu0 %9914 }
0x1125   : > { %v9805_v42 = vmul.f32 %v9803_v24, %v8499_v63  ;;  %9917 = vst.msk [vmem:[#allocation2] sm:$0xff] %vm961_vm2, %v9915_v9  ;;  %9925 = sbr.rel (%p10207_p5) target bundleno = 4398 (0x112e), region = 140 }
0x1127   : > { %v9892_v62 = vadd.f32 %v9891_v14, %v9805_v42 }
0x1129   : > { %v9898_v60 = vmul.f32 %v12476_v7, %v9892_v62 }
0x112b   : > { %9899 = vst [vmem:[%s12593_s11] sm:$0xff] %v9898_v60 }
0x112c   : > { %v9926_v11 = vld [vmem:[#allocation2] sm:$0xff] }
0x112d   : > { %9927 = vst.msk [vmem:[%s11460_s7] sm:$0xff] %vm961_vm2, %v9926_v11 }
0x112e PF: > { %s74_s15 = sadd.s32 1, %s11268_s15  }
0x112f   : > { %p71_p6 = scmp.ge.s32.totalorder %s74_s15, 8  }
0x1131   :  { %73 = sbr.rel (!%p71_p6) target bundleno = 47 (0x2f), region = 222 }

</bundles_post_ra>
